<compile_context>
chip_gen: v7x
topology: tpu7x:2x2x1
jax: 0.10.0
libtpu: 0.0.40
codegen_flags: <defaults>
</compile_context>

<pallas_src>
import functools

import jax
import jax.numpy as jnp
from jax.experimental import pallas as pl
from jax.experimental.pallas import tpu as pltpu

_LANE = 128


def _cpad(c: int) -> int:
    """Round channel count up to a lane-dense multiple of 128."""
    return max(_LANE, ((c + _LANE - 1) // _LANE) * _LANE)


def _vmem_limit_bytes() -> int:
    """Generation-aware VMEM cap: ~3/4 of physical, clipped to 100 MiB.
    (v5e/v6e: 128 MiB physical -> 96 MiB; v7x: 64 MiB -> 48 MiB.)"""
    try:
        cap = int(pltpu.get_tpu_info().vmem_capacity_bytes)
    except Exception:
        cap = 128 * 1024 * 1024
    return int(min(cap * 3 // 4, 100 * 1024 * 1024))


# ----------------------------- fused bottleneck-layer kernel -----------------------------


def _bottleneck_layer_kernel(x_ref, w1_ref, b1_ref, w2_ref, b2_ref, w3_ref, b3_ref,
                             *rest, cin_p, has_projection):
    """Fused layer: relu(bn(conv1)) -> relu(bn(conv2 3x3)) -> relu(bn(conv3)) + residual.

    x_ref : (Ho, Wo, s*cin_p) bf16 (H-stride already folded into the BlockSpec)
    w*    : bf16 weights with the BN scale folded in; b* : (1, C) f32 biases
    y1_ref: (Ho+2, Wo+2, cmid_p) f32 VMEM scratch providing the zero halo for the 3x3.
    """
    if has_projection:
        wp_ref, bp_ref, o_ref, y1_ref = rest
    else:
        o_ref, y1_ref = rest

    Ho, Wo, _ = x_ref.shape
    cmid_p = w1_ref.shape[-1]
    cout_p = o_ref.shape[-1]

    # ---- conv1 (1x1): drop the unused W-stride tap, one MXU matmul ----
    x = x_ref[:, :, :cin_p].reshape(Ho * Wo, cin_p)                       # bf16, lane-dense
    y1 = jnp.maximum(
        jnp.dot(x, w1_ref[...], preferred_element_type=jnp.float32) + b1_ref[...], 0.0)

    # ---- stage conv1 output into the zero-padded scratch (3x3 halo = 0) ----
    y1_ref[...] = jnp.zeros_like(y1_ref)
    y1_ref[1:Ho + 1, 1:Wo + 1, :] = y1.reshape(Ho, Wo, cmid_p)

    # ---- conv2 (3x3, stride 1, pad 1): 9 accumulated tap matmuls (no im2col concat) ----
    acc = jnp.zeros((Ho * Wo, cmid_p), jnp.float32)
    for kh in range(3):
        for kw in range(3):
            tap = y1_ref[kh:kh + Ho, kw:kw + Wo, :].reshape(Ho * Wo, cmid_p)
            acc = acc + jnp.dot(tap.astype(jnp.bfloat16), w2_ref[kh * 3 + kw],
                                preferred_element_type=jnp.float32)
    y2 = jnp.maximum(acc + b2_ref[...], 0.0).astype(jnp.bfloat16)

    # ---- conv3 (1x1) ----
    y3 = jnp.maximum(
        jnp.dot(y2, w3_ref[...], preferred_element_type=jnp.float32) + b3_ref[...], 0.0)

    # ---- residual (added AFTER each branch's ReLU; no trailing ReLU in this module) ----
    if has_projection:
        res = jnp.maximum(
            jnp.dot(x, wp_ref[...], preferred_element_type=jnp.float32) + bp_ref[...], 0.0)
    else:
        res = x.astype(jnp.float32)            # identity residual: cin_p == cout_p here

    o_ref[...] = (res + y3).reshape(Ho, Wo, cout_p).astype(o_ref.dtype)


# ------------------------------------- JAX wrapper ---------------------------------------


def _fused_bottleneck_layer(x, cb1, cb2, cb3, proj, *, stride):
    """x: (N, H, W, cin_p) bf16, channel-padded. Returns (N, Ho, Wo, cout_p) bf16."""
    N, H, W, cin_p = x.shape
    assert H % stride == 0 and W % stride == 0, (
        "TODO(synk): odd spatial extents with stride>1 (PyTorch floor semantics)")
    Ho, Wo = H // stride, W // stride
    cmid_p, cout_p = cb1.cout_p, cb3.cout_p
    assert cb1.cin_p == cin_p and cb2.cin_p == cmid_p and cb3.cin_p == cmid_p
    assert cb2.k == 3 and cb2.pad == 1 and cb2.stride == 1

    # Fold the H-stride into the BlockSpec (size-1 block on the row-parity axis so only the
    # used rows are DMA'd); the W-stride taps stay adjacent in the lane dim and the unused
    # one is dropped in-kernel before the matmul.
    x5 = x.reshape(N, Ho, stride, Wo, stride * cin_p)

    in_specs = [
        pl.BlockSpec((None, Ho, None, Wo, stride * cin_p), lambda n: (n, 0, 0, 0, 0)),
        pl.BlockSpec((cin_p, cmid_p), lambda n: (0, 0)),
        pl.BlockSpec((1, cmid_p), lambda n: (0, 0)),
        pl.BlockSpec((9, cmid_p, cmid_p), lambda n: (0, 0, 0)),
        pl.BlockSpec((1, cmid_p), lambda n: (0, 0)),
        pl.BlockSpec((cmid_p, cout_p), lambda n: (0, 0)),
        pl.BlockSpec((1, cout_p), lambda n: (0, 0)),
    ]
    args = [x5, cb1.w_mat, cb1.bias_p, cb2.w_taps, cb2.bias_p, cb3.w_mat, cb3.bias_p]
    if proj is not None:
        assert proj.cin_p == cin_p and proj.cout_p == cout_p
        in_specs += [pl.BlockSpec((cin_p, cout_p), lambda n: (0, 0)),
                     pl.BlockSpec((1, cout_p), lambda n: (0, 0))]
        args += [proj.w_mat, proj.bias_p]

    kernel = functools.partial(_bottleneck_layer_kernel, cin_p=cin_p,
                               has_projection=proj is not None)

    flops = 2 * N * Ho * Wo * (cin_p * cmid_p + 9 * cmid_p * cmid_p + cmid_p * cout_p
                               + (cin_p * cout_p if proj is not None else 0))
    bytes_accessed = (int(sum(a.size * a.dtype.itemsize for a in args))
                      + N * Ho * Wo * cout_p * 2)

    # TODO(synk): for very large feature maps, tile the output rows (halo'd row blocks)
    #             instead of keeping the whole image per batch element resident in VMEM,
    #             and single-buffer the constant weight operands (pl.Buffered(1)) to free
    #             headroom under v7x's 64 MiB VMEM.
    return pl.pallas_call(
        kernel,
        out_shape=jax.ShapeDtypeStruct((N, Ho, Wo, cout_p), jnp.bfloat16),
        grid_spec=pltpu.PrefetchScalarGridSpec(
            num_scalar_prefetch=0,
            grid=(N,),
            in_specs=in_specs,
            out_specs=pl.BlockSpec((None, Ho, Wo, cout_p), lambda n: (n, 0, 0, 0)),
            scratch_shapes=[pltpu.VMEM((Ho + 2, Wo + 2, cmid_p), jnp.float32)]),
        compiler_params=pltpu.CompilerParams(
            dimension_semantics=("parallel",),
            vmem_limit_bytes=_vmem_limit_bytes()),
        cost_estimate=pl.CostEstimate(flops=flops, transcendentals=0,
                                      bytes_accessed=bytes_accessed),
    )(*args)


# ------------------------------------ module classes -------------------------------------


class ConvBlockPallas:
    """Conv2d(bias=False) + BatchNorm2d + ReLU (eval-mode BN folded into weight/bias)."""

    def __init__(self, key, in_channels, out_channels, kernel_size, padding=0, stride=1,
                 eps=1e-5):
        self.cin, self.cout = in_channels, out_channels
        self.k, self.pad, self.stride = kernel_size, padding, stride
        self.cin_p, self.cout_p = _cpad(in_channels), _cpad(out_channels)

        kw_, kg, kb, km, kv = jax.random.split(key, 5)
        fan = in_channels * kernel_size * kernel_size
        self.w_hwio = jax.random.normal(
            kw_, (kernel_size, kernel_size, in_channels, out_channels),
            jnp.float32) / jnp.sqrt(fan)
        gamma = 1.0 + 0.1 * jax.random.normal(kg, (out_channels,), jnp.float32)
        beta = 0.1 * jax.random.normal(kb, (out_channels,), jnp.float32)
        mean = 0.1 * jax.random.normal(km, (out_channels,), jnp.float32)
        var = 1.0 + 0.1 * jnp.abs(jax.random.normal(kv, (out_channels,), jnp.float32))
        self.scale = gamma / jnp.sqrt(var + eps)
        self.bias = beta - mean * self.scale

        # Kernel-side params: BN scale folded into the weight, channels zero-padded to a
        # lane-dense multiple of 128, stored ONCE as bf16 (no per-call astype HBM copies).
        # 1x1 -> (Cin_p, Cout_p) GEMM weight; 3x3 -> (9, Cin_p, Cout_p) per-tap weights.
        w_folded = self.w_hwio * self.scale                  # broadcast over out channels
        w_p = jnp.zeros((kernel_size, kernel_size, self.cin_p, self.cout_p), jnp.float32)
        w_p = w_p.at[:, :, :in_channels, :out_channels].set(w_folded)
        if kernel_size == 1:
            self.w_mat = w_p.reshape(self.cin_p, self.cout_p).astype(jnp.bfloat16)
        else:
            self.w_taps = w_p.reshape(kernel_size * kernel_size, self.cin_p,
                                      self.cout_p).astype(jnp.bfloat16)
        self.bias_p = (jnp.zeros((1, self.cout_p), jnp.float32)
                       .at[0, :out_channels].set(self.bias))


class BottleNeckLayerPallas:
    def __init__(self, key, input_channels, intermediate_channels, output_channels,
                 block_number, stride):
        k1, k2, k3, k4 = jax.random.split(key, 4)
        if block_number == 0:
            self.convBlock1 = ConvBlockPallas(k1, input_channels, intermediate_channels, 1,
                                              stride=stride)
            self.projection = ConvBlockPallas(k4, input_channels, output_channels, 1,
                                              stride=stride)
            self.stride = stride
        else:
            self.convBlock1 = ConvBlockPallas(k1, output_channels, intermediate_channels, 1)
            self.projection = None
            self.stride = 1
        self.convBlock2 = ConvBlockPallas(k2, intermediate_channels, intermediate_channels,
                                          3, padding=1)
        self.convBlock3 = ConvBlockPallas(k3, intermediate_channels, output_channels, 1)

    def __call__(self, x_padded):
        # layer output = residual + relu(bn3(conv3(...))) (no trailing ReLU) — the whole
        # layer (including the residual) runs inside one fused pallas_call.
        return _fused_bottleneck_layer(x_padded, self.convBlock1, self.convBlock2,
                                       self.convBlock3, self.projection, stride=self.stride)


class BottleNeckBlockPallas:
    def __init__(self, key, input_channels, intermediate_channels, output_channels,
                 n_blocks, stride=2):
        keys = jax.random.split(key, n_blocks)
        self.layers = [
            BottleNeckLayerPallas(keys[i], input_channels, intermediate_channels,
                                  output_channels, i, stride)
            for i in range(n_blocks)
        ]
        self.input_channels = input_channels
        self.output_channels = output_channels

    def __call__(self, x_nchw):
        # NCHW -> NHWC, pad channels to a lane-dense multiple of 128, cast to bf16 once.
        x = jnp.transpose(x_nchw, (0, 2, 3, 1))
        cp = _cpad(self.input_channels)
        x = jnp.pad(x, ((0, 0), (0, 0), (0, 0), (0, cp - x.shape[-1]))).astype(jnp.bfloat16)
        for layer in self.layers:
            x = layer(x)
        out = x[..., :self.output_channels].astype(jnp.float32)
        return jnp.transpose(out, (0, 3, 1, 2))        # NHWC -> NCHW


# ---------------------------------- pure-JAX reference -----------------------------------


def _ref_convblock(cb, x):
    y = jax.lax.conv_general_dilated(
        x, cb.w_hwio, (cb.stride, cb.stride), [(cb.pad, cb.pad)] * 2,
        dimension_numbers=("NHWC", "HWIO", "NHWC"))
    return jax.nn.relu(y * cb.scale + cb.bias)


def ref_forward(block, x_nchw):
    x = jnp.transpose(x_nchw, (0, 2, 3, 1))
    for layer in block.layers:
        y = _ref_convblock(layer.convBlock1, x)
        y = _ref_convblock(layer.convBlock2, y)
        y = _ref_convblock(layer.convBlock3, y)
        res = _ref_convblock(layer.projection, x) if layer.projection is not None else x
        x = res + y
    return jnp.transpose(x, (0, 3, 1, 2))


# ----------------------------------------- main ------------------------------------------


if __name__ == "__main__":
    key = jax.random.PRNGKey(0)
    kx, kb = jax.random.split(key)
    # BottleNeckBlock(input_channels=4, intermediate_channels=4, output_channels=8,
    #                 n_blocks=2, stride=2) on a (2, 4, 16, 16) NCHW input.
    x = jax.random.normal(kx, (2, 4, 16, 16), jnp.float32)
    block = BottleNeckBlockPallas(kb, 4, 4, 8, n_blocks=2, stride=2)

    fwd = jax.jit(block.__call__)
    out = jax.block_until_ready(fwd(x))
    ref = ref_forward(block, x)

    assert out.shape == (2, 8, 8, 8), out.shape
    max_err = float(jnp.max(jnp.abs(out - ref)))
    # bf16 activations / MXU operands with f32 accumulation -> bf16-level tolerance.
    assert jnp.allclose(out, ref, rtol=5e-2, atol=5e-2), max_err
    print("KERNEL_OK")
</pallas_src>

<mosaic_0001>
module attributes {stable_mosaic.version = 11 : i64} {
  func.func @_bottleneck_layer_kernel(%arg0: i32, %arg1: memref<1x8x1x8x256xbf16, #tpu.memory_space<vmem>>, %arg2: memref<128x128xbf16, #tpu.memory_space<vmem>>, %arg3: memref<1x128xf32, #tpu.memory_space<vmem>>, %arg4: memref<9x128x128xbf16, #tpu.memory_space<vmem>>, %arg5: memref<1x128xf32, #tpu.memory_space<vmem>>, %arg6: memref<128x128xbf16, #tpu.memory_space<vmem>>, %arg7: memref<1x128xf32, #tpu.memory_space<vmem>>, %arg8: memref<128x128xbf16, #tpu.memory_space<vmem>>, %arg9: memref<1x128xf32, #tpu.memory_space<vmem>>, %arg10: memref<1x8x8x128xbf16, #tpu.memory_space<vmem>>, %arg11: memref<10x10x128xf32, #tpu.memory_space<vmem>>) attributes {dimension_semantics = [#tpu.dimension_semantics<parallel>], iteration_bounds = array<i64: 2>, scalar_prefetch = 0 : i64, scratch_operands = 1 : i64, tpu.core_type = #tpu.core_type<tc>, window_params = [{transform_indices = @transform_0, window_bounds = array<i64: 1, 8, 1, 8, 256>}, {pipeline_mode = #tpu.pipeline_mode<synchronous>, transform_indices = @transform_1, window_bounds = array<i64: 128, 128>}, {pipeline_mode = #tpu.pipeline_mode<synchronous>, transform_indices = @transform_2, window_bounds = array<i64: 1, 128>}, {pipeline_mode = #tpu.pipeline_mode<synchronous>, transform_indices = @transform_3, window_bounds = array<i64: 9, 128, 128>}, {pipeline_mode = #tpu.pipeline_mode<synchronous>, transform_indices = @transform_4, window_bounds = array<i64: 1, 128>}, {pipeline_mode = #tpu.pipeline_mode<synchronous>, transform_indices = @transform_5, window_bounds = array<i64: 128, 128>}, {pipeline_mode = #tpu.pipeline_mode<synchronous>, transform_indices = @transform_6, window_bounds = array<i64: 1, 128>}, {pipeline_mode = #tpu.pipeline_mode<synchronous>, transform_indices = @transform_7, window_bounds = array<i64: 128, 128>}, {pipeline_mode = #tpu.pipeline_mode<synchronous>, transform_indices = @transform_8, window_bounds = array<i64: 1, 128>}, {transform_indices = @transform_9, window_bounds = array<i64: 1, 8, 8, 128>}]} {
    %c0 = arith.constant 0 : index
    %c0_0 = arith.constant 0 : index
    %c0_1 = arith.constant 0 : index
    %c0_2 = arith.constant 0 : index
    %c0_3 = arith.constant 0 : index
    %0 = vector.load %arg1[%c0, %c0_0, %c0_1, %c0_2, %c0_3] : memref<1x8x1x8x256xbf16, #tpu.memory_space<vmem>>, vector<1x8x1x8x128xbf16>
    %1 = vector.shape_cast %0 : vector<1x8x1x8x128xbf16> to vector<8x8x128xbf16>
    %2 = vector.shape_cast %1 : vector<8x8x128xbf16> to vector<64x128xbf16>
    %c0_4 = arith.constant 0 : index
    %c0_5 = arith.constant 0 : index
    %3 = vector.load %arg2[%c0_4, %c0_5] : memref<128x128xbf16, #tpu.memory_space<vmem>>, vector<128x128xbf16>
    %cst = arith.constant dense<0.000000e+00> : vector<64x128xf32>
    %4 = tpu.matmul %2, %3, %cst {dimension_numbers = #tpu.dot_dimension_numbers<[1], [0], [0], [1], [0, 0, 1, 1], [], []>} : vector<64x128xbf16>, vector<128x128xbf16>, vector<64x128xf32> -> vector<64x128xf32>
    %c0_6 = arith.constant 0 : index
    %c0_7 = arith.constant 0 : index
    %5 = vector.load %arg3[%c0_6, %c0_7] : memref<1x128xf32, #tpu.memory_space<vmem>>, vector<1x128xf32>
    %6 = vector.broadcast %5 : vector<1x128xf32> to vector<64x128xf32>
    %7 = arith.addf %4, %6 : vector<64x128xf32>
    %cst_8 = arith.constant 0.000000e+00 : f32
    %8 = vector.broadcast %cst_8 : f32 to vector<64x128xf32>
    %9 = arith.maximumf %7, %8 : vector<64x128xf32>
    %cst_9 = arith.constant 0.000000e+00 : f32
    %10 = vector.broadcast %cst_9 : f32 to vector<10x10x128xf32>
    %c0_10 = arith.constant 0 : index
    %c0_11 = arith.constant 0 : index
    %c0_12 = arith.constant 0 : index
    %11 = vector.load %arg11[%c0_10, %c0_11, %c0_12] : memref<10x10x128xf32, #tpu.memory_space<vmem>>, vector<10x10x128xf32>
    tpu.vector_store %arg11[%c0_10, %c0_11, %c0_12], %10 {strides = array<i32>} : memref<10x10x128xf32, #tpu.memory_space<vmem>>, vector<10x10x128xf32>,
    %12 = vector.shape_cast %9 : vector<64x128xf32> to vector<8x8x128xf32>
    %c1 = arith.constant 1 : index
    %c1_13 = arith.constant 1 : index
    %c0_14 = arith.constant 0 : index
    %13 = vector.load %arg11[%c1, %c1_13, %c0_14] : memref<10x10x128xf32, #tpu.memory_space<vmem>>, vector<8x8x128xf32>
    tpu.vector_store %arg11[%c1, %c1_13, %c0_14], %12 {strides = array<i32>} : memref<10x10x128xf32, #tpu.memory_space<vmem>>, vector<8x8x128xf32>,
    %cst_15 = arith.constant 0.000000e+00 : f32
    %14 = vector.broadcast %cst_15 : f32 to vector<64x128xf32>
    %c0_16 = arith.constant 0 : index
    %c0_17 = arith.constant 0 : index
    %c0_18 = arith.constant 0 : index
    %15 = vector.load %arg11[%c0_16, %c0_17, %c0_18] : memref<10x10x128xf32, #tpu.memory_space<vmem>>, vector<8x8x128xf32>
    %16 = vector.shape_cast %15 : vector<8x8x128xf32> to vector<64x128xf32>
    %17 = arith.truncf %16 : vector<64x128xf32> to vector<64x128xbf16>
    %c0_19 = arith.constant 0 : index
    %c0_20 = arith.constant 0 : index
    %c0_21 = arith.constant 0 : index
    %18 = vector.load %arg4[%c0_19, %c0_20, %c0_21] : memref<9x128x128xbf16, #tpu.memory_space<vmem>>, vector<1x128x128xbf16>
    %19 = vector.shape_cast %18 : vector<1x128x128xbf16> to vector<128x128xbf16>
    %cst_22 = arith.constant dense<0.000000e+00> : vector<64x128xf32>
    %20 = tpu.matmul %17, %19, %cst_22 {dimension_numbers = #tpu.dot_dimension_numbers<[1], [0], [0], [1], [0, 0, 1, 1], [], []>} : vector<64x128xbf16>, vector<128x128xbf16>, vector<64x128xf32> -> vector<64x128xf32>
    %21 = arith.addf %14, %20 : vector<64x128xf32>
    %c0_23 = arith.constant 0 : index
    %c1_24 = arith.constant 1 : index
    %c0_25 = arith.constant 0 : index
    %22 = vector.load %arg11[%c0_23, %c1_24, %c0_25] : memref<10x10x128xf32, #tpu.memory_space<vmem>>, vector<8x8x128xf32>
    %23 = vector.shape_cast %22 : vector<8x8x128xf32> to vector<64x128xf32>
    %24 = arith.truncf %23 : vector<64x128xf32> to vector<64x128xbf16>
    %c1_26 = arith.constant 1 : index
    %c0_27 = arith.constant 0 : index
    %c0_28 = arith.constant 0 : index
    %25 = vector.load %arg4[%c1_26, %c0_27, %c0_28] : memref<9x128x128xbf16, #tpu.memory_space<vmem>>, vector<1x128x128xbf16>
    %26 = vector.shape_cast %25 : vector<1x128x128xbf16> to vector<128x128xbf16>
    %cst_29 = arith.constant dense<0.000000e+00> : vector<64x128xf32>
    %27 = tpu.matmul %24, %26, %cst_29 {dimension_numbers = #tpu.dot_dimension_numbers<[1], [0], [0], [1], [0, 0, 1, 1], [], []>} : vector<64x128xbf16>, vector<128x128xbf16>, vector<64x128xf32> -> vector<64x128xf32>
    %28 = arith.addf %21, %27 : vector<64x128xf32>
    %c0_30 = arith.constant 0 : index
    %c2 = arith.constant 2 : index
    %c0_31 = arith.constant 0 : index
    %29 = vector.load %arg11[%c0_30, %c2, %c0_31] : memref<10x10x128xf32, #tpu.memory_space<vmem>>, vector<8x8x128xf32>
    %30 = vector.shape_cast %29 : vector<8x8x128xf32> to vector<64x128xf32>
    %31 = arith.truncf %30 : vector<64x128xf32> to vector<64x128xbf16>
    %c2_32 = arith.constant 2 : index
    %c0_33 = arith.constant 0 : index
    %c0_34 = arith.constant 0 : index
    %32 = vector.load %arg4[%c2_32, %c0_33, %c0_34] : memref<9x128x128xbf16, #tpu.memory_space<vmem>>, vector<1x128x128xbf16>
    %33 = vector.shape_cast %32 : vector<1x128x128xbf16> to vector<128x128xbf16>
    %cst_35 = arith.constant dense<0.000000e+00> : vector<64x128xf32>
    %34 = tpu.matmul %31, %33, %cst_35 {dimension_numbers = #tpu.dot_dimension_numbers<[1], [0], [0], [1], [0, 0, 1, 1], [], []>} : vector<64x128xbf16>, vector<128x128xbf16>, vector<64x128xf32> -> vector<64x128xf32>
    %35 = arith.addf %28, %34 : vector<64x128xf32>
    %c1_36 = arith.constant 1 : index
    %c0_37 = arith.constant 0 : index
    %c0_38 = arith.constant 0 : index
    %36 = vector.load %arg11[%c1_36, %c0_37, %c0_38] : memref<10x10x128xf32, #tpu.memory_space<vmem>>, vector<8x8x128xf32>
    %37 = vector.shape_cast %36 : vector<8x8x128xf32> to vector<64x128xf32>
    %38 = arith.truncf %37 : vector<64x128xf32> to vector<64x128xbf16>
    %c3 = arith.constant 3 : index
    %c0_39 = arith.constant 0 : index
    %c0_40 = arith.constant 0 : index
    %39 = vector.load %arg4[%c3, %c0_39, %c0_40] : memref<9x128x128xbf16, #tpu.memory_space<vmem>>, vector<1x128x128xbf16>
    %40 = vector.shape_cast %39 : vector<1x128x128xbf16> to vector<128x128xbf16>
    %cst_41 = arith.constant dense<0.000000e+00> : vector<64x128xf32>
    %41 = tpu.matmul %38, %40, %cst_41 {dimension_numbers = #tpu.dot_dimension_numbers<[1], [0], [0], [1], [0, 0, 1, 1], [], []>} : vector<64x128xbf16>, vector<128x128xbf16>, vector<64x128xf32> -> vector<64x128xf32>
    %42 = arith.addf %35, %41 : vector<64x128xf32>
    %c1_42 = arith.constant 1 : index
    %c1_43 = arith.constant 1 : index
    %c0_44 = arith.constant 0 : index
    %43 = vector.load %arg11[%c1_42, %c1_43, %c0_44] : memref<10x10x128xf32, #tpu.memory_space<vmem>>, vector<8x8x128xf32>
    %44 = vector.shape_cast %43 : vector<8x8x128xf32> to vector<64x128xf32>
    %45 = arith.truncf %44 : vector<64x128xf32> to vector<64x128xbf16>
    %c4 = arith.constant 4 : index
    %c0_45 = arith.constant 0 : index
    %c0_46 = arith.constant 0 : index
    %46 = vector.load %arg4[%c4, %c0_45, %c0_46] : memref<9x128x128xbf16, #tpu.memory_space<vmem>>, vector<1x128x128xbf16>
    %47 = vector.shape_cast %46 : vector<1x128x128xbf16> to vector<128x128xbf16>
    %cst_47 = arith.constant dense<0.000000e+00> : vector<64x128xf32>
    %48 = tpu.matmul %45, %47, %cst_47 {dimension_numbers = #tpu.dot_dimension_numbers<[1], [0], [0], [1], [0, 0, 1, 1], [], []>} : vector<64x128xbf16>, vector<128x128xbf16>, vector<64x128xf32> -> vector<64x128xf32>
    %49 = arith.addf %42, %48 : vector<64x128xf32>
    %c1_48 = arith.constant 1 : index
    %c2_49 = arith.constant 2 : index
    %c0_50 = arith.constant 0 : index
    %50 = vector.load %arg11[%c1_48, %c2_49, %c0_50] : memref<10x10x128xf32, #tpu.memory_space<vmem>>, vector<8x8x128xf32>
    %51 = vector.shape_cast %50 : vector<8x8x128xf32> to vector<64x128xf32>
    %52 = arith.truncf %51 : vector<64x128xf32> to vector<64x128xbf16>
    %c5 = arith.constant 5 : index
    %c0_51 = arith.constant 0 : index
    %c0_52 = arith.constant 0 : index
    %53 = vector.load %arg4[%c5, %c0_51, %c0_52] : memref<9x128x128xbf16, #tpu.memory_space<vmem>>, vector<1x128x128xbf16>
    %54 = vector.shape_cast %53 : vector<1x128x128xbf16> to vector<128x128xbf16>
    %cst_53 = arith.constant dense<0.000000e+00> : vector<64x128xf32>
    %55 = tpu.matmul %52, %54, %cst_53 {dimension_numbers = #tpu.dot_dimension_numbers<[1], [0], [0], [1], [0, 0, 1, 1], [], []>} : vector<64x128xbf16>, vector<128x128xbf16>, vector<64x128xf32> -> vector<64x128xf32>
    %56 = arith.addf %49, %55 : vector<64x128xf32>
    %c2_54 = arith.constant 2 : index
    %c0_55 = arith.constant 0 : index
    %c0_56 = arith.constant 0 : index
    %57 = vector.load %arg11[%c2_54, %c0_55, %c0_56] : memref<10x10x128xf32, #tpu.memory_space<vmem>>, vector<8x8x128xf32>
    %58 = vector.shape_cast %57 : vector<8x8x128xf32> to vector<64x128xf32>
    %59 = arith.truncf %58 : vector<64x128xf32> to vector<64x128xbf16>
    %c6 = arith.constant 6 : index
    %c0_57 = arith.constant 0 : index
    %c0_58 = arith.constant 0 : index
    %60 = vector.load %arg4[%c6, %c0_57, %c0_58] : memref<9x128x128xbf16, #tpu.memory_space<vmem>>, vector<1x128x128xbf16>
    %61 = vector.shape_cast %60 : vector<1x128x128xbf16> to vector<128x128xbf16>
    %cst_59 = arith.constant dense<0.000000e+00> : vector<64x128xf32>
    %62 = tpu.matmul %59, %61, %cst_59 {dimension_numbers = #tpu.dot_dimension_numbers<[1], [0], [0], [1], [0, 0, 1, 1], [], []>} : vector<64x128xbf16>, vector<128x128xbf16>, vector<64x128xf32> -> vector<64x128xf32>
    %63 = arith.addf %56, %62 : vector<64x128xf32>
    %c2_60 = arith.constant 2 : index
    %c1_61 = arith.constant 1 : index
    %c0_62 = arith.constant 0 : index
    %64 = vector.load %arg11[%c2_60, %c1_61, %c0_62] : memref<10x10x128xf32, #tpu.memory_space<vmem>>, vector<8x8x128xf32>
    %65 = vector.shape_cast %64 : vector<8x8x128xf32> to vector<64x128xf32>
    %66 = arith.truncf %65 : vector<64x128xf32> to vector<64x128xbf16>
    %c7 = arith.constant 7 : index
    %c0_63 = arith.constant 0 : index
    %c0_64 = arith.constant 0 : index
    %67 = vector.load %arg4[%c7, %c0_63, %c0_64] : memref<9x128x128xbf16, #tpu.memory_space<vmem>>, vector<1x128x128xbf16>
    %68 = vector.shape_cast %67 : vector<1x128x128xbf16> to vector<128x128xbf16>
    %cst_65 = arith.constant dense<0.000000e+00> : vector<64x128xf32>
    %69 = tpu.matmul %66, %68, %cst_65 {dimension_numbers = #tpu.dot_dimension_numbers<[1], [0], [0], [1], [0, 0, 1, 1], [], []>} : vector<64x128xbf16>, vector<128x128xbf16>, vector<64x128xf32> -> vector<64x128xf32>
    %70 = arith.addf %63, %69 : vector<64x128xf32>
    %c2_66 = arith.constant 2 : index
    %c2_67 = arith.constant 2 : index
    %c0_68 = arith.constant 0 : index
    %71 = vector.load %arg11[%c2_66, %c2_67, %c0_68] : memref<10x10x128xf32, #tpu.memory_space<vmem>>, vector<8x8x128xf32>
    %72 = vector.shape_cast %71 : vector<8x8x128xf32> to vector<64x128xf32>
    %73 = arith.truncf %72 : vector<64x128xf32> to vector<64x128xbf16>
    %c8 = arith.constant 8 : index
    %c0_69 = arith.constant 0 : index
    %c0_70 = arith.constant 0 : index
    %74 = vector.load %arg4[%c8, %c0_69, %c0_70] : memref<9x128x128xbf16, #tpu.memory_space<vmem>>, vector<1x128x128xbf16>
    %75 = vector.shape_cast %74 : vector<1x128x128xbf16> to vector<128x128xbf16>
    %cst_71 = arith.constant dense<0.000000e+00> : vector<64x128xf32>
    %76 = tpu.matmul %73, %75, %cst_71 {dimension_numbers = #tpu.dot_dimension_numbers<[1], [0], [0], [1], [0, 0, 1, 1], [], []>} : vector<64x128xbf16>, vector<128x128xbf16>, vector<64x128xf32> -> vector<64x128xf32>
    %77 = arith.addf %70, %76 : vector<64x128xf32>
    %c0_72 = arith.constant 0 : index
    %c0_73 = arith.constant 0 : index
    %78 = vector.load %arg5[%c0_72, %c0_73] : memref<1x128xf32, #tpu.memory_space<vmem>>, vector<1x128xf32>
    %79 = vector.broadcast %78 : vector<1x128xf32> to vector<64x128xf32>
    %80 = arith.addf %77, %79 : vector<64x128xf32>
    %cst_74 = arith.constant 0.000000e+00 : f32
    %81 = vector.broadcast %cst_74 : f32 to vector<64x128xf32>
    %82 = arith.maximumf %80, %81 : vector<64x128xf32>
    %83 = arith.truncf %82 : vector<64x128xf32> to vector<64x128xbf16>
    %c0_75 = arith.constant 0 : index
    %c0_76 = arith.constant 0 : index
    %84 = vector.load %arg6[%c0_75, %c0_76] : memref<128x128xbf16, #tpu.memory_space<vmem>>, vector<128x128xbf16>
    %cst_77 = arith.constant dense<0.000000e+00> : vector<64x128xf32>
    %85 = tpu.matmul %83, %84, %cst_77 {dimension_numbers = #tpu.dot_dimension_numbers<[1], [0], [0], [1], [0, 0, 1, 1], [], []>} : vector<64x128xbf16>, vector<128x128xbf16>, vector<64x128xf32> -> vector<64x128xf32>
    %c0_78 = arith.constant 0 : index
    %c0_79 = arith.constant 0 : index
    %86 = vector.load %arg7[%c0_78, %c0_79] : memref<1x128xf32, #tpu.memory_space<vmem>>, vector<1x128xf32>
    %87 = vector.broadcast %86 : vector<1x128xf32> to vector<64x128xf32>
    %88 = arith.addf %85, %87 : vector<64x128xf32>
    %cst_80 = arith.constant 0.000000e+00 : f32
    %89 = vector.broadcast %cst_80 : f32 to vector<64x128xf32>
    %90 = arith.maximumf %88, %89 : vector<64x128xf32>
    %c0_81 = arith.constant 0 : index
    %c0_82 = arith.constant 0 : index
    %91 = vector.load %arg8[%c0_81, %c0_82] : memref<128x128xbf16, #tpu.memory_space<vmem>>, vector<128x128xbf16>
    %cst_83 = arith.constant dense<0.000000e+00> : vector<64x128xf32>
    %92 = tpu.matmul %2, %91, %cst_83 {dimension_numbers = #tpu.dot_dimension_numbers<[1], [0], [0], [1], [0, 0, 1, 1], [], []>} : vector<64x128xbf16>, vector<128x128xbf16>, vector<64x128xf32> -> vector<64x128xf32>
    %c0_84 = arith.constant 0 : index
    %c0_85 = arith.constant 0 : index
    %93 = vector.load %arg9[%c0_84, %c0_85] : memref<1x128xf32, #tpu.memory_space<vmem>>, vector<1x128xf32>
    %94 = vector.broadcast %93 : vector<1x128xf32> to vector<64x128xf32>
    %95 = arith.addf %92, %94 : vector<64x128xf32>
    %cst_86 = arith.constant 0.000000e+00 : f32
    %96 = vector.broadcast %cst_86 : f32 to vector<64x128xf32>
    %97 = arith.maximumf %95, %96 : vector<64x128xf32>
    %98 = arith.addf %97, %90 : vector<64x128xf32>
    %99 = vector.shape_cast %98 : vector<64x128xf32> to vector<8x8x128xf32>
    %100 = arith.truncf %99 : vector<8x8x128xf32> to vector<8x8x128xbf16>
    %c0_87 = arith.constant 0 : index
    %c0_88 = arith.constant 0 : index
    %c0_89 = arith.constant 0 : index
    %c0_90 = arith.constant 0 : index
    %101 = vector.load %arg10[%c0_87, %c0_88, %c0_89, %c0_90] : memref<1x8x8x128xbf16, #tpu.memory_space<vmem>>, vector<1x8x8x128xbf16>
    %102 = vector.shape_cast %101 : vector<1x8x8x128xbf16> to vector<8x8x128xbf16>
    %103 = vector.shape_cast %100 : vector<8x8x128xbf16> to vector<1x8x8x128xbf16>
    tpu.vector_store %arg10[%c0_87, %c0_88, %c0_89, %c0_90], %103 {strides = array<i32>} : memref<1x8x8x128xbf16, #tpu.memory_space<vmem>>, vector<1x8x8x128xbf16>,
    return
  }
  func.func @transform_0(%arg0: i32) -> (i32, i32, i32, i32, i32) {
    %c0_i32 = arith.constant 0 : i32
    %c0_i32_0 = arith.constant 0 : i32
    %c0_i32_1 = arith.constant 0 : i32
    %c0_i32_2 = arith.constant 0 : i32
    %c0_i32_3 = arith.constant 0 : i32
    return %arg0, %c0_i32, %c0_i32_0, %c0_i32_1, %c0_i32_2 : i32, i32, i32, i32, i32
  }
  func.func @transform_1(%arg0: i32) -> (i32, i32) {
    %c0_i32 = arith.constant 0 : i32
    %c0_i32_0 = arith.constant 0 : i32
    %c0_i32_1 = arith.constant 0 : i32
    return %c0_i32, %c0_i32_0 : i32, i32
  }
  func.func @transform_2(%arg0: i32) -> (i32, i32) {
    %c0_i32 = arith.constant 0 : i32
    %c0_i32_0 = arith.constant 0 : i32
    %c0_i32_1 = arith.constant 0 : i32
    return %c0_i32, %c0_i32_0 : i32, i32
  }
  func.func @transform_3(%arg0: i32) -> (i32, i32, i32) {
    %c0_i32 = arith.constant 0 : i32
    %c0_i32_0 = arith.constant 0 : i32
    %c0_i32_1 = arith.constant 0 : i32
    %c0_i32_2 = arith.constant 0 : i32
    return %c0_i32, %c0_i32_0, %c0_i32_1 : i32, i32, i32
  }
  func.func @transform_4(%arg0: i32) -> (i32, i32) {
    %c0_i32 = arith.constant 0 : i32
    %c0_i32_0 = arith.constant 0 : i32
    %c0_i32_1 = arith.constant 0 : i32
    return %c0_i32, %c0_i32_0 : i32, i32
  }
  func.func @transform_5(%arg0: i32) -> (i32, i32) {
    %c0_i32 = arith.constant 0 : i32
    %c0_i32_0 = arith.constant 0 : i32
    %c0_i32_1 = arith.constant 0 : i32
    return %c0_i32, %c0_i32_0 : i32, i32
  }
  func.func @transform_6(%arg0: i32) -> (i32, i32) {
    %c0_i32 = arith.constant 0 : i32
    %c0_i32_0 = arith.constant 0 : i32
    %c0_i32_1 = arith.constant 0 : i32
    return %c0_i32, %c0_i32_0 : i32, i32
  }
  func.func @transform_7(%arg0: i32) -> (i32, i32) {
    %c0_i32 = arith.constant 0 : i32
    %c0_i32_0 = arith.constant 0 : i32
    %c0_i32_1 = arith.constant 0 : i32
    return %c0_i32, %c0_i32_0 : i32, i32
  }
  func.func @transform_8(%arg0: i32) -> (i32, i32) {
    %c0_i32 = arith.constant 0 : i32
    %c0_i32_0 = arith.constant 0 : i32
    %c0_i32_1 = arith.constant 0 : i32
    return %c0_i32, %c0_i32_0 : i32, i32
  }
  func.func @transform_9(%arg0: i32) -> (i32, i32, i32, i32) {
    %c0_i32 = arith.constant 0 : i32
    %c0_i32_0 = arith.constant 0 : i32
    %c0_i32_1 = arith.constant 0 : i32
    %c0_i32_2 = arith.constant 0 : i32
    return %arg0, %c0_i32, %c0_i32_0, %c0_i32_1 : i32, i32, i32, i32
  }
}

module attributes {stable_mosaic.version = 11 : i64} {
  func.func @_bottleneck_layer_kernel(%arg0: i32, %arg1: memref<1x8x1x8x128xbf16, #tpu.memory_space<vmem>>, %arg2: memref<128x128xbf16, #tpu.memory_space<vmem>>, %arg3: memref<1x128xf32, #tpu.memory_space<vmem>>, %arg4: memref<9x128x128xbf16, #tpu.memory_space<vmem>>, %arg5: memref<1x128xf32, #tpu.memory_space<vmem>>, %arg6: memref<128x128xbf16, #tpu.memory_space<vmem>>, %arg7: memref<1x128xf32, #tpu.memory_space<vmem>>, %arg8: memref<1x8x8x128xbf16, #tpu.memory_space<vmem>>, %arg9: memref<10x10x128xf32, #tpu.memory_space<vmem>>) attributes {dimension_semantics = [#tpu.dimension_semantics<parallel>], iteration_bounds = array<i64: 2>, scalar_prefetch = 0 : i64, scratch_operands = 1 : i64, tpu.core_type = #tpu.core_type<tc>, window_params = [{transform_indices = @transform_0, window_bounds = array<i64: 1, 8, 1, 8, 128>}, {pipeline_mode = #tpu.pipeline_mode<synchronous>, transform_indices = @transform_1, window_bounds = array<i64: 128, 128>}, {pipeline_mode = #tpu.pipeline_mode<synchronous>, transform_indices = @transform_2, window_bounds = array<i64: 1, 128>}, {pipeline_mode = #tpu.pipeline_mode<synchronous>, transform_indices = @transform_3, window_bounds = array<i64: 9, 128, 128>}, {pipeline_mode = #tpu.pipeline_mode<synchronous>, transform_indices = @transform_4, window_bounds = array<i64: 1, 128>}, {pipeline_mode = #tpu.pipeline_mode<synchronous>, transform_indices = @transform_5, window_bounds = array<i64: 128, 128>}, {pipeline_mode = #tpu.pipeline_mode<synchronous>, transform_indices = @transform_6, window_bounds = array<i64: 1, 128>}, {transform_indices = @transform_7, window_bounds = array<i64: 1, 8, 8, 128>}]} {
    %c0 = arith.constant 0 : index
    %c0_0 = arith.constant 0 : index
    %c0_1 = arith.constant 0 : index
    %c0_2 = arith.constant 0 : index
    %c0_3 = arith.constant 0 : index
    %0 = vector.load %arg1[%c0, %c0_0, %c0_1, %c0_2, %c0_3] : memref<1x8x1x8x128xbf16, #tpu.memory_space<vmem>>, vector<1x8x1x8x128xbf16>
    %1 = vector.shape_cast %0 : vector<1x8x1x8x128xbf16> to vector<8x8x128xbf16>
    %2 = vector.shape_cast %1 : vector<8x8x128xbf16> to vector<64x128xbf16>
    %c0_4 = arith.constant 0 : index
    %c0_5 = arith.constant 0 : index
    %3 = vector.load %arg2[%c0_4, %c0_5] : memref<128x128xbf16, #tpu.memory_space<vmem>>, vector<128x128xbf16>
    %cst = arith.constant dense<0.000000e+00> : vector<64x128xf32>
    %4 = tpu.matmul %2, %3, %cst {dimension_numbers = #tpu.dot_dimension_numbers<[1], [0], [0], [1], [0, 0, 1, 1], [], []>} : vector<64x128xbf16>, vector<128x128xbf16>, vector<64x128xf32> -> vector<64x128xf32>
    %c0_6 = arith.constant 0 : index
    %c0_7 = arith.constant 0 : index
    %5 = vector.load %arg3[%c0_6, %c0_7] : memref<1x128xf32, #tpu.memory_space<vmem>>, vector<1x128xf32>
    %6 = vector.broadcast %5 : vector<1x128xf32> to vector<64x128xf32>
    %7 = arith.addf %4, %6 : vector<64x128xf32>
    %cst_8 = arith.constant 0.000000e+00 : f32
    %8 = vector.broadcast %cst_8 : f32 to vector<64x128xf32>
    %9 = arith.maximumf %7, %8 : vector<64x128xf32>
    %cst_9 = arith.constant 0.000000e+00 : f32
    %10 = vector.broadcast %cst_9 : f32 to vector<10x10x128xf32>
    %c0_10 = arith.constant 0 : index
    %c0_11 = arith.constant 0 : index
    %c0_12 = arith.constant 0 : index
    %11 = vector.load %arg9[%c0_10, %c0_11, %c0_12] : memref<10x10x128xf32, #tpu.memory_space<vmem>>, vector<10x10x128xf32>
    tpu.vector_store %arg9[%c0_10, %c0_11, %c0_12], %10 {strides = array<i32>} : memref<10x10x128xf32, #tpu.memory_space<vmem>>, vector<10x10x128xf32>,
    %12 = vector.shape_cast %9 : vector<64x128xf32> to vector<8x8x128xf32>
    %c1 = arith.constant 1 : index
    %c1_13 = arith.constant 1 : index
    %c0_14 = arith.constant 0 : index
    %13 = vector.load %arg9[%c1, %c1_13, %c0_14] : memref<10x10x128xf32, #tpu.memory_space<vmem>>, vector<8x8x128xf32>
    tpu.vector_store %arg9[%c1, %c1_13, %c0_14], %12 {strides = array<i32>} : memref<10x10x128xf32, #tpu.memory_space<vmem>>, vector<8x8x128xf32>,
    %cst_15 = arith.constant 0.000000e+00 : f32
    %14 = vector.broadcast %cst_15 : f32 to vector<64x128xf32>
    %c0_16 = arith.constant 0 : index
    %c0_17 = arith.constant 0 : index
    %c0_18 = arith.constant 0 : index
    %15 = vector.load %arg9[%c0_16, %c0_17, %c0_18] : memref<10x10x128xf32, #tpu.memory_space<vmem>>, vector<8x8x128xf32>
    %16 = vector.shape_cast %15 : vector<8x8x128xf32> to vector<64x128xf32>
    %17 = arith.truncf %16 : vector<64x128xf32> to vector<64x128xbf16>
    %c0_19 = arith.constant 0 : index
    %c0_20 = arith.constant 0 : index
    %c0_21 = arith.constant 0 : index
    %18 = vector.load %arg4[%c0_19, %c0_20, %c0_21] : memref<9x128x128xbf16, #tpu.memory_space<vmem>>, vector<1x128x128xbf16>
    %19 = vector.shape_cast %18 : vector<1x128x128xbf16> to vector<128x128xbf16>
    %cst_22 = arith.constant dense<0.000000e+00> : vector<64x128xf32>
    %20 = tpu.matmul %17, %19, %cst_22 {dimension_numbers = #tpu.dot_dimension_numbers<[1], [0], [0], [1], [0, 0, 1, 1], [], []>} : vector<64x128xbf16>, vector<128x128xbf16>, vector<64x128xf32> -> vector<64x128xf32>
    %21 = arith.addf %14, %20 : vector<64x128xf32>
    %c0_23 = arith.constant 0 : index
    %c1_24 = arith.constant 1 : index
    %c0_25 = arith.constant 0 : index
    %22 = vector.load %arg9[%c0_23, %c1_24, %c0_25] : memref<10x10x128xf32, #tpu.memory_space<vmem>>, vector<8x8x128xf32>
    %23 = vector.shape_cast %22 : vector<8x8x128xf32> to vector<64x128xf32>
    %24 = arith.truncf %23 : vector<64x128xf32> to vector<64x128xbf16>
    %c1_26 = arith.constant 1 : index
    %c0_27 = arith.constant 0 : index
    %c0_28 = arith.constant 0 : index
    %25 = vector.load %arg4[%c1_26, %c0_27, %c0_28] : memref<9x128x128xbf16, #tpu.memory_space<vmem>>, vector<1x128x128xbf16>
    %26 = vector.shape_cast %25 : vector<1x128x128xbf16> to vector<128x128xbf16>
    %cst_29 = arith.constant dense<0.000000e+00> : vector<64x128xf32>
    %27 = tpu.matmul %24, %26, %cst_29 {dimension_numbers = #tpu.dot_dimension_numbers<[1], [0], [0], [1], [0, 0, 1, 1], [], []>} : vector<64x128xbf16>, vector<128x128xbf16>, vector<64x128xf32> -> vector<64x128xf32>
    %28 = arith.addf %21, %27 : vector<64x128xf32>
    %c0_30 = arith.constant 0 : index
    %c2 = arith.constant 2 : index
    %c0_31 = arith.constant 0 : index
    %29 = vector.load %arg9[%c0_30, %c2, %c0_31] : memref<10x10x128xf32, #tpu.memory_space<vmem>>, vector<8x8x128xf32>
    %30 = vector.shape_cast %29 : vector<8x8x128xf32> to vector<64x128xf32>
    %31 = arith.truncf %30 : vector<64x128xf32> to vector<64x128xbf16>
    %c2_32 = arith.constant 2 : index
    %c0_33 = arith.constant 0 : index
    %c0_34 = arith.constant 0 : index
    %32 = vector.load %arg4[%c2_32, %c0_33, %c0_34] : memref<9x128x128xbf16, #tpu.memory_space<vmem>>, vector<1x128x128xbf16>
    %33 = vector.shape_cast %32 : vector<1x128x128xbf16> to vector<128x128xbf16>
    %cst_35 = arith.constant dense<0.000000e+00> : vector<64x128xf32>
    %34 = tpu.matmul %31, %33, %cst_35 {dimension_numbers = #tpu.dot_dimension_numbers<[1], [0], [0], [1], [0, 0, 1, 1], [], []>} : vector<64x128xbf16>, vector<128x128xbf16>, vector<64x128xf32> -> vector<64x128xf32>
    %35 = arith.addf %28, %34 : vector<64x128xf32>
    %c1_36 = arith.constant 1 : index
    %c0_37 = arith.constant 0 : index
    %c0_38 = arith.constant 0 : index
    %36 = vector.load %arg9[%c1_36, %c0_37, %c0_38] : memref<10x10x128xf32, #tpu.memory_space<vmem>>, vector<8x8x128xf32>
    %37 = vector.shape_cast %36 : vector<8x8x128xf32> to vector<64x128xf32>
    %38 = arith.truncf %37 : vector<64x128xf32> to vector<64x128xbf16>
    %c3 = arith.constant 3 : index
    %c0_39 = arith.constant 0 : index
    %c0_40 = arith.constant 0 : index
    %39 = vector.load %arg4[%c3, %c0_39, %c0_40] : memref<9x128x128xbf16, #tpu.memory_space<vmem>>, vector<1x128x128xbf16>
    %40 = vector.shape_cast %39 : vector<1x128x128xbf16> to vector<128x128xbf16>
    %cst_41 = arith.constant dense<0.000000e+00> : vector<64x128xf32>
    %41 = tpu.matmul %38, %40, %cst_41 {dimension_numbers = #tpu.dot_dimension_numbers<[1], [0], [0], [1], [0, 0, 1, 1], [], []>} : vector<64x128xbf16>, vector<128x128xbf16>, vector<64x128xf32> -> vector<64x128xf32>
    %42 = arith.addf %35, %41 : vector<64x128xf32>
    %c1_42 = arith.constant 1 : index
    %c1_43 = arith.constant 1 : index
    %c0_44 = arith.constant 0 : index
    %43 = vector.load %arg9[%c1_42, %c1_43, %c0_44] : memref<10x10x128xf32, #tpu.memory_space<vmem>>, vector<8x8x128xf32>
    %44 = vector.shape_cast %43 : vector<8x8x128xf32> to vector<64x128xf32>
    %45 = arith.truncf %44 : vector<64x128xf32> to vector<64x128xbf16>
    %c4 = arith.constant 4 : index
    %c0_45 = arith.constant 0 : index
    %c0_46 = arith.constant 0 : index
    %46 = vector.load %arg4[%c4, %c0_45, %c0_46] : memref<9x128x128xbf16, #tpu.memory_space<vmem>>, vector<1x128x128xbf16>
    %47 = vector.shape_cast %46 : vector<1x128x128xbf16> to vector<128x128xbf16>
    %cst_47 = arith.constant dense<0.000000e+00> : vector<64x128xf32>
    %48 = tpu.matmul %45, %47, %cst_47 {dimension_numbers = #tpu.dot_dimension_numbers<[1], [0], [0], [1], [0, 0, 1, 1], [], []>} : vector<64x128xbf16>, vector<128x128xbf16>, vector<64x128xf32> -> vector<64x128xf32>
    %49 = arith.addf %42, %48 : vector<64x128xf32>
    %c1_48 = arith.constant 1 : index
    %c2_49 = arith.constant 2 : index
    %c0_50 = arith.constant 0 : index
    %50 = vector.load %arg9[%c1_48, %c2_49, %c0_50] : memref<10x10x128xf32, #tpu.memory_space<vmem>>, vector<8x8x128xf32>
    %51 = vector.shape_cast %50 : vector<8x8x128xf32> to vector<64x128xf32>
    %52 = arith.truncf %51 : vector<64x128xf32> to vector<64x128xbf16>
    %c5 = arith.constant 5 : index
    %c0_51 = arith.constant 0 : index
    %c0_52 = arith.constant 0 : index
    %53 = vector.load %arg4[%c5, %c0_51, %c0_52] : memref<9x128x128xbf16, #tpu.memory_space<vmem>>, vector<1x128x128xbf16>
    %54 = vector.shape_cast %53 : vector<1x128x128xbf16> to vector<128x128xbf16>
    %cst_53 = arith.constant dense<0.000000e+00> : vector<64x128xf32>
    %55 = tpu.matmul %52, %54, %cst_53 {dimension_numbers = #tpu.dot_dimension_numbers<[1], [0], [0], [1], [0, 0, 1, 1], [], []>} : vector<64x128xbf16>, vector<128x128xbf16>, vector<64x128xf32> -> vector<64x128xf32>
    %56 = arith.addf %49, %55 : vector<64x128xf32>
    %c2_54 = arith.constant 2 : index
    %c0_55 = arith.constant 0 : index
    %c0_56 = arith.constant 0 : index
    %57 = vector.load %arg9[%c2_54, %c0_55, %c0_56] : memref<10x10x128xf32, #tpu.memory_space<vmem>>, vector<8x8x128xf32>
    %58 = vector.shape_cast %57 : vector<8x8x128xf32> to vector<64x128xf32>
    %59 = arith.truncf %58 : vector<64x128xf32> to vector<64x128xbf16>
    %c6 = arith.constant 6 : index
    %c0_57 = arith.constant 0 : index
    %c0_58 = arith.constant 0 : index
    %60 = vector.load %arg4[%c6, %c0_57, %c0_58] : memref<9x128x128xbf16, #tpu.memory_space<vmem>>, vector<1x128x128xbf16>
    %61 = vector.shape_cast %60 : vector<1x128x128xbf16> to vector<128x128xbf16>
    %cst_59 = arith.constant dense<0.000000e+00> : vector<64x128xf32>
    %62 = tpu.matmul %59, %61, %cst_59 {dimension_numbers = #tpu.dot_dimension_numbers<[1], [0], [0], [1], [0, 0, 1, 1], [], []>} : vector<64x128xbf16>, vector<128x128xbf16>, vector<64x128xf32> -> vector<64x128xf32>
    %63 = arith.addf %56, %62 : vector<64x128xf32>
    %c2_60 = arith.constant 2 : index
    %c1_61 = arith.constant 1 : index
    %c0_62 = arith.constant 0 : index
    %64 = vector.load %arg9[%c2_60, %c1_61, %c0_62] : memref<10x10x128xf32, #tpu.memory_space<vmem>>, vector<8x8x128xf32>
    %65 = vector.shape_cast %64 : vector<8x8x128xf32> to vector<64x128xf32>
    %66 = arith.truncf %65 : vector<64x128xf32> to vector<64x128xbf16>
    %c7 = arith.constant 7 : index
    %c0_63 = arith.constant 0 : index
    %c0_64 = arith.constant 0 : index
    %67 = vector.load %arg4[%c7, %c0_63, %c0_64] : memref<9x128x128xbf16, #tpu.memory_space<vmem>>, vector<1x128x128xbf16>
    %68 = vector.shape_cast %67 : vector<1x128x128xbf16> to vector<128x128xbf16>
    %cst_65 = arith.constant dense<0.000000e+00> : vector<64x128xf32>
    %69 = tpu.matmul %66, %68, %cst_65 {dimension_numbers = #tpu.dot_dimension_numbers<[1], [0], [0], [1], [0, 0, 1, 1], [], []>} : vector<64x128xbf16>, vector<128x128xbf16>, vector<64x128xf32> -> vector<64x128xf32>
    %70 = arith.addf %63, %69 : vector<64x128xf32>
    %c2_66 = arith.constant 2 : index
    %c2_67 = arith.constant 2 : index
    %c0_68 = arith.constant 0 : index
    %71 = vector.load %arg9[%c2_66, %c2_67, %c0_68] : memref<10x10x128xf32, #tpu.memory_space<vmem>>, vector<8x8x128xf32>
    %72 = vector.shape_cast %71 : vector<8x8x128xf32> to vector<64x128xf32>
    %73 = arith.truncf %72 : vector<64x128xf32> to vector<64x128xbf16>
    %c8 = arith.constant 8 : index
    %c0_69 = arith.constant 0 : index
    %c0_70 = arith.constant 0 : index
    %74 = vector.load %arg4[%c8, %c0_69, %c0_70] : memref<9x128x128xbf16, #tpu.memory_space<vmem>>, vector<1x128x128xbf16>
    %75 = vector.shape_cast %74 : vector<1x128x128xbf16> to vector<128x128xbf16>
    %cst_71 = arith.constant dense<0.000000e+00> : vector<64x128xf32>
    %76 = tpu.matmul %73, %75, %cst_71 {dimension_numbers = #tpu.dot_dimension_numbers<[1], [0], [0], [1], [0, 0, 1, 1], [], []>} : vector<64x128xbf16>, vector<128x128xbf16>, vector<64x128xf32> -> vector<64x128xf32>
    %77 = arith.addf %70, %76 : vector<64x128xf32>
    %c0_72 = arith.constant 0 : index
    %c0_73 = arith.constant 0 : index
    %78 = vector.load %arg5[%c0_72, %c0_73] : memref<1x128xf32, #tpu.memory_space<vmem>>, vector<1x128xf32>
    %79 = vector.broadcast %78 : vector<1x128xf32> to vector<64x128xf32>
    %80 = arith.addf %77, %79 : vector<64x128xf32>
    %cst_74 = arith.constant 0.000000e+00 : f32
    %81 = vector.broadcast %cst_74 : f32 to vector<64x128xf32>
    %82 = arith.maximumf %80, %81 : vector<64x128xf32>
    %83 = arith.truncf %82 : vector<64x128xf32> to vector<64x128xbf16>
    %c0_75 = arith.constant 0 : index
    %c0_76 = arith.constant 0 : index
    %84 = vector.load %arg6[%c0_75, %c0_76] : memref<128x128xbf16, #tpu.memory_space<vmem>>, vector<128x128xbf16>
    %cst_77 = arith.constant dense<0.000000e+00> : vector<64x128xf32>
    %85 = tpu.matmul %83, %84, %cst_77 {dimension_numbers = #tpu.dot_dimension_numbers<[1], [0], [0], [1], [0, 0, 1, 1], [], []>} : vector<64x128xbf16>, vector<128x128xbf16>, vector<64x128xf32> -> vector<64x128xf32>
    %c0_78 = arith.constant 0 : index
    %c0_79 = arith.constant 0 : index
    %86 = vector.load %arg7[%c0_78, %c0_79] : memref<1x128xf32, #tpu.memory_space<vmem>>, vector<1x128xf32>
    %87 = vector.broadcast %86 : vector<1x128xf32> to vector<64x128xf32>
    %88 = arith.addf %85, %87 : vector<64x128xf32>
    %cst_80 = arith.constant 0.000000e+00 : f32
    %89 = vector.broadcast %cst_80 : f32 to vector<64x128xf32>
    %90 = arith.maximumf %88, %89 : vector<64x128xf32>
    %91 = arith.extf %2 : vector<64x128xbf16> to vector<64x128xf32>
    %92 = arith.addf %91, %90 : vector<64x128xf32>
    %93 = vector.shape_cast %92 : vector<64x128xf32> to vector<8x8x128xf32>
    %94 = arith.truncf %93 : vector<8x8x128xf32> to vector<8x8x128xbf16>
    %c0_81 = arith.constant 0 : index
    %c0_82 = arith.constant 0 : index
    %c0_83 = arith.constant 0 : index
    %c0_84 = arith.constant 0 : index
    %95 = vector.load %arg8[%c0_81, %c0_82, %c0_83, %c0_84] : memref<1x8x8x128xbf16, #tpu.memory_space<vmem>>, vector<1x8x8x128xbf16>
    %96 = vector.shape_cast %95 : vector<1x8x8x128xbf16> to vector<8x8x128xbf16>
    %97 = vector.shape_cast %94 : vector<8x8x128xbf16> to vector<1x8x8x128xbf16>
    tpu.vector_store %arg8[%c0_81, %c0_82, %c0_83, %c0_84], %97 {strides = array<i32>} : memref<1x8x8x128xbf16, #tpu.memory_space<vmem>>, vector<1x8x8x128xbf16>,
    return
  }
  func.func @transform_0(%arg0: i32) -> (i32, i32, i32, i32, i32) {
    %c0_i32 = arith.constant 0 : i32
    %c0_i32_0 = arith.constant 0 : i32
    %c0_i32_1 = arith.constant 0 : i32
    %c0_i32_2 = arith.constant 0 : i32
    %c0_i32_3 = arith.constant 0 : i32
    return %arg0, %c0_i32, %c0_i32_0, %c0_i32_1, %c0_i32_2 : i32, i32, i32, i32, i32
  }
  func.func @transform_1(%arg0: i32) -> (i32, i32) {
    %c0_i32 = arith.constant 0 : i32
    %c0_i32_0 = arith.constant 0 : i32
    %c0_i32_1 = arith.constant 0 : i32
    return %c0_i32, %c0_i32_0 : i32, i32
  }
  func.func @transform_2(%arg0: i32) -> (i32, i32) {
    %c0_i32 = arith.constant 0 : i32
    %c0_i32_0 = arith.constant 0 : i32
    %c0_i32_1 = arith.constant 0 : i32
    return %c0_i32, %c0_i32_0 : i32, i32
  }
  func.func @transform_3(%arg0: i32) -> (i32, i32, i32) {
    %c0_i32 = arith.constant 0 : i32
    %c0_i32_0 = arith.constant 0 : i32
    %c0_i32_1 = arith.constant 0 : i32
    %c0_i32_2 = arith.constant 0 : i32
    return %c0_i32, %c0_i32_0, %c0_i32_1 : i32, i32, i32
  }
  func.func @transform_4(%arg0: i32) -> (i32, i32) {
    %c0_i32 = arith.constant 0 : i32
    %c0_i32_0 = arith.constant 0 : i32
    %c0_i32_1 = arith.constant 0 : i32
    return %c0_i32, %c0_i32_0 : i32, i32
  }
  func.func @transform_5(%arg0: i32) -> (i32, i32) {
    %c0_i32 = arith.constant 0 : i32
    %c0_i32_0 = arith.constant 0 : i32
    %c0_i32_1 = arith.constant 0 : i32
    return %c0_i32, %c0_i32_0 : i32, i32
  }
  func.func @transform_6(%arg0: i32) -> (i32, i32) {
    %c0_i32 = arith.constant 0 : i32
    %c0_i32_0 = arith.constant 0 : i32
    %c0_i32_1 = arith.constant 0 : i32
    return %c0_i32, %c0_i32_0 : i32, i32
  }
  func.func @transform_7(%arg0: i32) -> (i32, i32, i32, i32) {
    %c0_i32 = arith.constant 0 : i32
    %c0_i32_0 = arith.constant 0 : i32
    %c0_i32_1 = arith.constant 0 : i32
    %c0_i32_2 = arith.constant 0 : i32
    return %arg0, %c0_i32, %c0_i32_0, %c0_i32_1 : i32, i32, i32, i32
  }
}

</mosaic_0001>

<bundles_post_ra>
// kernel: a_call__.3
= control target key start
LH: loop header
LB: loop body
LE: loop exit
PB: predicated region body
PF: predicated region fallthrough
CT: control target
= control target key end

     0   :  { %12 = vsyncpa [#allocation4], 0  ;;  %s3888_s0 = inlined_call_operand.hbm [shape: bf16[2,8,1,8,128], index: 0, kind: input, shape index: {}]   ;;  %s3889_s1 = inlined_call_operand.hbm [shape: bf16[128,128], index: 1, kind: input, shape index: {}]   ;;  %s3890_s2 = inlined_call_operand.hbm [shape: f32[1,128], index: 2, kind: input, shape index: {}]   ;;  %s3891_s3 = inlined_call_operand.hbm [shape: bf16[9,128,128], index: 3, kind: input, shape index: {}]   ;;  %s3892_s4 = inlined_call_operand.hbm [shape: f32[1,128], index: 4, kind: input, shape index: {}]   ;;  %s3893_s5 = inlined_call_operand.hbm [shape: bf16[128,128], index: 5, kind: input, shape index: {}]   ;;  %s3894_s6 = inlined_call_operand.hbm [shape: f32[1,128], index: 6, kind: input, shape index: {}]   ;;  %s3895_s7 = inlined_call_operand.hbm [shape: bf16[2,8,8,128], index: 7, kind: output, shape index: {}]  }
   0x1   :  { %14 = vsyncpa [#allocation4 + $0x1], 0 }
   0x2   :  { %15 = vsyncpa [#allocation7], 0 }
   0x3   :  { %16 = vsyncpa [#allocation10], 0 }
   0x4   :  { %17 = vsyncpa [#allocation13], 0 }
   0x5   :  { %18 = vsyncpa [#allocation5], 0 }
   0x6   :  { %20 = vsyncpa [#allocation5 + $0x1], 0  ;;  %s3414_s24 = smov 0   ;;  %s3416_s25 = smov 0  }
   0x7   :  { %s3418_s26 = smov 0   ;;  %s3420_s27 = smov 0  }
   0x8 LB: > { %s3361_s28 = smov [#allocation6]   ;;  %s3435_s30 = sadd.s32 4294967295, %s3359_s27   ;;  %s3359_s27 = sphi %s3420_s27, %s3923_s27   ;;  %s3355_s26 = sphi %s3418_s26, %s3922_s26   ;;  %s3351_s25 = sphi %s3416_s25, %s3921_s25   ;;  %s3347_s24 = sphi %s3414_s24, %s3920_s24  }
   0x9   : > { %s221_s29 = sshll.u32 %s3361_s28, 4  ;;  %p2266_p0 = scmp.ge.s32.totalorder %s3359_s27, 1  ;;  %s3440_s29 = int_to_ptr.vmem [resolvable:$true] %s221_s29 }
   0xa   : > { %p3896_p1 = scmp.eq.s32.totalorder %s3435_s30, 0  ;;  %p209_p2 = scmp.lt.s32.totalorder %s3359_s27, 3 }
   0xb   : > { %s3362_s9 = smov [#allocation9]   ;;  %s3363_s12 = smov [#allocation12]  }
   0xc   : > { %p3442_p3 = pnand %p2266_p0, %p209_p2  ;;  %s245_s10 = sshll.u32 %s3362_s9, 4  ;;  %s3455_s10 = int_to_ptr.vmem [resolvable:$true] %s245_s10 }
   0xd   : > { %s269_s13 = sshll.u32 %s3363_s12, 4  ;;  %s3083_s16 = scalar_lea.hbm %s3889_s1, 1024  ;;  %s3457_s13 = int_to_ptr.vmem [resolvable:$true] %s269_s13 }
   0xe   : > { %s3900_s8 = scalar_select %p3442_p3, 1, 0 }
   0xf   : > { %p2899_p5 = pneg %p3442_p3  ;;  %p3084_p7 = scmp.ne.s32.totalorder %s3889_s1, %s3083_s16 }
  0x10   : > { %p3090_p11 = scmp.lt.u32.totalorder %s3083_s16, %s3889_s1 }
  0x11   : > { %p3451_p6 = pnand %p2899_p5, %p3896_p1 }
  0x13   : > { %p3467_p8 = pneg %p3451_p6 }
  0x15   : > { %p3086_p9 = pnand %p3467_p8, %p3084_p7 }
  0x17   : > { %p3087_p10 = pneg %p3086_p9 }
  0x19   : > { %p3092_p12 = pnand %p3090_p11, %p3087_p10 }
  0x1b   : > { %3095 = shalt.err (!%p3092_p12)
}
  0x1c   : > { %s3096_s22 = scalar_lea.vmem %s3440_s29, 1024  ;;  %p3104_p5 = scmp.lt.s32.totalorder %s3440_s29, %s3440_s29 }
  0x1d   : > { %p3097_p13 = scmp.ne.s32.totalorder %s3440_s29, %s3096_s22  ;;  %p3105_p4 = scmp.lt.s32.totalorder %s3096_s22, %s3096_s22 }
  0x1f   : > { %p3099_p0 = pnand %p3097_p13, %p3467_p8  ;;  %p3106_p7 = por %p3105_p4, %p3104_p5 }
  0x21   : > { %p3100_p2 = pneg %p3099_p0 }
  0x23   : > { %p3107_p9 = pnand %p3106_p7, %p3100_p2 }
  0x25   : > { %3110 = shalt.err (!%p3107_p9)
}
  0x26   : > { %s3898_s23 = smov 64   ;;  %s3365_s28 = smov 4  }
  0x27   : > { %2902 = dma.hbm_to_vmem [thread:$0]  (!%p3451_p6), %s3889_s1, 1024, %s3440_s29, [#allocation7], %s3898_s23, %s3898_s23, %s3365_s28  }
  0x28   : > { %s3111_s16 = scalar_lea.hbm %s3891_s3, 9216 }
  0x29   : > { %p3112_p4 = scmp.ne.s32.totalorder %s3891_s3, %s3111_s16  ;;  %p3118_p12 = scmp.lt.u32.totalorder %s3111_s16, %s3891_s3 }
  0x2b   : > { %p3114_p10 = pnand %p3112_p4, %p3467_p8 }
  0x2d   : > { %p3115_p11 = pneg %p3114_p10 }
  0x2f   : > { %p3120_p13 = pnand %p3118_p12, %p3115_p11 }
  0x31   : > { %3123 = shalt.err (!%p3120_p13)
}
  0x32   : > { %s3124_s29 = scalar_lea.vmem %s3455_s10, 9216  ;;  %p3132_p7 = scmp.lt.s32.totalorder %s3455_s10, %s3455_s10 }
  0x33   : > { %p3125_p0 = scmp.ne.s32.totalorder %s3455_s10, %s3124_s29  ;;  %p3133_p9 = scmp.lt.s32.totalorder %s3124_s29, %s3124_s29 }
  0x35   : > { %p3127_p2 = pnand %p3125_p0, %p3467_p8  ;;  %p3134_p4 = por %p3133_p9, %p3132_p7 }
  0x37   : > { %p3128_p5 = pneg %p3127_p2 }
  0x39   : > { %p3135_p10 = pnand %p3134_p4, %p3128_p5 }
  0x3b   : > { %3138 = shalt.err (!%p3135_p10)
}
  0x3c   : > { %2908 = dma.hbm_to_vmem [thread:$0]  (!%p3451_p6), %s3891_s3, 9216, %s3455_s10, [#allocation10], %s3898_s23, %s3898_s23, %s3365_s28  }
  0x3d   : > { %s3139_s15 = scalar_lea.hbm %s3893_s5, 1024 }
  0x3e   : > { %p3140_p11 = scmp.ne.s32.totalorder %s3893_s5, %s3139_s15  ;;  %p3146_p0 = scmp.lt.u32.totalorder %s3139_s15, %s3893_s5 }
  0x40   : > { %p3142_p12 = pnand %p3140_p11, %p3467_p8 }
  0x42   : > { %p3143_p13 = pneg %p3142_p12 }
  0x44   : > { %p3148_p2 = pnand %p3146_p0, %p3143_p13 }
  0x46   : > { %3151 = shalt.err (!%p3148_p2)
}
  0x47   : > { %s3152_s10 = scalar_lea.vmem %s3457_s13, 1024  ;;  %p3160_p4 = scmp.lt.s32.totalorder %s3457_s13, %s3457_s13 }
  0x48   : > { %p3153_p5 = scmp.ne.s32.totalorder %s3457_s13, %s3152_s10  ;;  %p3161_p10 = scmp.lt.s32.totalorder %s3152_s10, %s3152_s10 }
  0x4a   : > { %p3155_p7 = pnand %p3153_p5, %p3467_p8  ;;  %p3162_p11 = por %p3161_p10, %p3160_p4 }
  0x4c   : > { %p3156_p9 = pneg %p3155_p7 }
  0x4e   : > { %p3163_p12 = pnand %p3162_p11, %p3156_p9 }
  0x50   : > { %3166 = shalt.err (!%p3163_p12)
}
  0x51   : > { %2914 = dma.hbm_to_vmem [thread:$0]  (!%p3451_p6), %s3893_s5, 1024, %s3457_s13, [#allocation13], %s3898_s23, %s3898_s23, %s3365_s28  }
  0x52   : > { %s3366_s22 = smov [#allocation8]   ;;  %s3367_s12 = smov [#allocation11]  }
  0x53   : > { %s235_s9 = sshll.u32 %s3366_s22, 4  ;;  %s259_s14 = sshll.u32 %s3367_s12, 4  ;;  %s236_s9 = int_to_ptr.vmem [resolvable:$true] %s235_s9  ;;  %s260_s14 = int_to_ptr.vmem [resolvable:$true] %s259_s14 }
  0x54   : > { %s3167_s17 = scalar_lea.hbm %s3890_s2, 16 }
  0x55   : > { %p3168_p13 = scmp.ne.s32.totalorder %s3890_s2, %s3167_s17  ;;  %p3174_p5 = scmp.lt.u32.totalorder %s3167_s17, %s3890_s2 }
  0x57   : > { %p3170_p0 = pnand %p3168_p13, %p3467_p8 }
  0x59   : > { %p3171_p2 = pneg %p3170_p0 }
  0x5b   : > { %p3176_p7 = pnand %p3174_p5, %p3171_p2 }
  0x5d   : > { %3179 = shalt.err (!%p3176_p7)
}
  0x5e   : > { %s3180_s13 = scalar_lea.vmem %s236_s9, 16  ;;  %s3187_s29 = scalar_lea.vmem %s236_s9, 32 }
  0x5f   : > { %p3181_p9 = scmp.ne.s32.totalorder %s236_s9, %s3180_s13  ;;  %p3188_p11 = scmp.lt.s32.totalorder %s236_s9, %s236_s9 }
  0x60   : > { %p3189_p12 = scmp.lt.s32.totalorder %s3187_s29, %s3180_s13 }
  0x61   : > { %p3183_p4 = pnand %p3181_p9, %p3467_p8 }
  0x62   : > { %p3190_p1 = por %p3189_p12, %p3188_p11 }
  0x63   : > { %p3184_p10 = pneg %p3183_p4 }
  0x65   : > { %p3191_p3 = pnand %p3190_p1, %p3184_p10 }
  0x67   : > { %3194 = shalt.err (!%p3191_p3)
}
  0x68   : > { %2905 = dma.hbm_to_vmem [thread:$0]  (!%p3451_p6), %s3890_s2, 16, %s236_s9, [#allocation7]  }
  0x69   : > { %s3195_s17 = scalar_lea.hbm %s3892_s4, 16 }
  0x6a   : > { %p3196_p13 = scmp.ne.s32.totalorder %s3892_s4, %s3195_s17  ;;  %p3202_p3 = scmp.lt.u32.totalorder %s3195_s17, %s3892_s4 }
  0x6c   : > { %p3198_p0 = pnand %p3196_p13, %p3467_p8 }
  0x6e   : > { %p3199_p1 = pneg %p3198_p0 }
  0x70   : > { %p3204_p2 = pnand %p3202_p3, %p3199_p1 }
  0x72   : > { %3207 = shalt.err (!%p3204_p2)
}
  0x73   : > { %s3208_s13 = scalar_lea.vmem %s260_s14, 16  ;;  %s3215_s9 = scalar_lea.vmem %s260_s14, 32 }
  0x74   : > { %p3209_p5 = scmp.ne.s32.totalorder %s260_s14, %s3208_s13  ;;  %p3216_p4 = scmp.lt.s32.totalorder %s260_s14, %s260_s14 }
  0x75   : > { %p3217_p10 = scmp.lt.s32.totalorder %s3215_s9, %s3208_s13 }
  0x76   : > { %p3211_p7 = pnand %p3209_p5, %p3467_p8 }
  0x77   : > { %p3218_p11 = por %p3217_p10, %p3216_p4 }
  0x78   : > { %p3212_p9 = pneg %p3211_p7 }
  0x7a   : > { %p3219_p12 = pnand %p3218_p11, %p3212_p9 }
  0x7c   : > { %3222 = shalt.err (!%p3219_p12)
}
  0x7d   : > { %2911 = dma.hbm_to_vmem [thread:$0]  (!%p3451_p6), %s3892_s4, 16, %s260_s14, [#allocation10]  }
  0x7e   : > { %s3368_s12 = smov [#allocation14]   ;;  %s3223_s18 = scalar_lea.hbm %s3894_s6, 16 }
  0x7f   : > { %s283_s15 = sshll.u32 %s3368_s12, 4  ;;  %p3224_p13 = scmp.ne.s32.totalorder %s3894_s6, %s3223_s18  ;;  %s284_s15 = int_to_ptr.vmem [resolvable:$true] %s283_s15 }
  0x80   : > { %p3230_p3 = scmp.lt.u32.totalorder %s3223_s18, %s3894_s6 }
  0x81   : > { %p3226_p0 = pnand %p3224_p13, %p3467_p8 }
  0x83   : > { %p3227_p1 = pneg %p3226_p0 }
  0x85   : > { %p3232_p2 = pnand %p3230_p3, %p3227_p1 }
  0x87   : > { %3235 = shalt.err (!%p3232_p2)
}
  0x88   : > { %s3236_s14 = scalar_lea.vmem %s284_s15, 16  ;;  %s3243_s9 = scalar_lea.vmem %s284_s15, 32 }
  0x89   : > { %p3237_p5 = scmp.ne.s32.totalorder %s284_s15, %s3236_s14  ;;  %p3244_p4 = scmp.lt.s32.totalorder %s284_s15, %s284_s15 }
  0x8a   : > { %p3245_p10 = scmp.lt.s32.totalorder %s3243_s9, %s3236_s14 }
  0x8b   : > { %p3239_p7 = pnand %p3237_p5, %p3467_p8 }
  0x8c   : > { %p3246_p11 = por %p3245_p10, %p3244_p4 }
  0x8d   : > { %p3240_p9 = pneg %p3239_p7 }
  0x8f   : > { %p3247_p12 = pnand %p3246_p11, %p3240_p9 }
  0x91   : > { %3250 = shalt.err (!%p3247_p12)
}
  0x92   : > { %2917 = dma.hbm_to_vmem [thread:$0]  (!%p3451_p6), %s3894_s6, 16, %s284_s15, [#allocation13]  }
  0x93   : > { %s2265_s19 = sadd.s32 4294967294, %s3359_s27   ;;  %s3599_s11 = sadd.s32 1, %s3359_s27  }
  0x94   : > { %s30_s12 = ssub.s32 %s3359_s27, %s3599_s11  ;;  %s33_s16 = sadd.s32 1, %s3355_s26 }
  0x95   : > { %p31_p8 = scmp.eq.s32.totalorder %s30_s12, 0  ;;  %p40_p13 = scmp.ne.s32.totalorder %s3355_s26, %s3351_s25 }
  0x96   : > { %p41_p0 = scmp.eq.s32.totalorder %s3359_s27, 0  ;;  %p46_p1 = scmp.ne.s32.totalorder %s3351_s25, %s3347_s24 }
  0x97   : > { %s3610_s17 = scalar_select %p31_p8, %s3355_s26, %s33_s16  }
  0x98   : > { %p3612_p3 = por %p41_p0, %p40_p13  ;;  %p3904_p2 = scmp.eq.s32.totalorder %s3435_s30, 0 }
  0x99   : > { %p196_p5 = scmp.eq.s32.totalorder %s3435_s30, 1  ;;  %p202_p7 = scmp.eq.s32.totalorder %s2265_s19, 1 }
  0x9a   : > { %p3618_p6 = por %p3904_p2, %p46_p1  ;;  %p2932_p9 = scmp.lt.s32.totalorder %s3359_s27, 2 }
  0x9b   : > { %s294_s20 = sand.u32 1, %s3355_s26   ;;  %p3625_p4 = por %p196_p5, %p40_p13 }
  0x9c   : > { %p3629_p10 = por %p202_p7, %p46_p1  ;;  %s2274_s13 = sshll.u32 %s294_s20, 5 }
  0x9d   : > { %s3906_s10 = scalar_select %p3625_p4, 1, 0 }
  0x9e   : > { %s3907_s21 = scalar_select %p3629_p10, 1, 0 }
  0x9f   : > { %s2386_s14 = sshll.u32 %s3359_s27, 9  ;;  %s298_s19 = scalar_lea.vmem [#allocation3], %s2274_s13 }
  0xa0   : > { %s3637_s22 = scalar_lea.hbm %s3888_s0, %s2386_s14  ;;  %s305_s12 = sshll.u32 %s298_s19, 4  ;;  %s3639_s12 = int_to_ptr.vmem [resolvable:$true] %s305_s12 }
  0xa1   : > { %p3643_p11 = pnand %p2932_p9, %p3612_p3  ;;  %s3647_s23 = scalar_lea.sflag [#allocation4], %s294_s20 }
  0xa2   : > { %s3251_s9 = scalar_lea.hbm %s3637_s22, 512  ;;  %s3256_s18 = scalar_lea.hbm %s3888_s0, 1024 }
  0xa3   : > { %p3252_p12 = scmp.ne.s32.totalorder %s3637_s22, %s3251_s9  ;;  %p3253_p8 = pneg %p3643_p11 }
  0xa4   : > { %p3257_p1 = scmp.lt.u32.totalorder %s3637_s22, %s3888_s0  ;;  %p3258_p3 = scmp.lt.u32.totalorder %s3256_s18, %s3251_s9 }
  0xa5   : > { %p3254_p13 = pnand %p3253_p8, %p3252_p12  ;;  %p3260_p5 = scmp.lt.u32.totalorder %s3251_s9, %s3637_s22 }
  0xa6   : > { %p3259_p2 = por %p3258_p3, %p3257_p1 }
  0xa7   : > { %p3255_p0 = pneg %p3254_p13 }
  0xa8   : > { %p3261_p7 = por %p3260_p5, %p3259_p2 }
  0xaa   : > { %p3262_p9 = pnand %p3261_p7, %p3255_p0 }
  0xac   : > { %3265 = shalt.err (!%p3262_p9)
}
  0xad   : > { %s3266_s20 = scalar_lea.vmem %s3639_s12, 512  ;;  %s3369_s13 = smov [#allocation3]  }
  0xae   : > { %p3267_p12 = scmp.ne.s32.totalorder %s3639_s12, %s3266_s20  ;;  %s3271_s14 = sshll.u32 %s3369_s13, 4  ;;  %s3272_s14 = int_to_ptr.vmem [resolvable:$false] %s3271_s14 }
  0xaf   : > { %s3273_s29 = scalar_lea.vmem %s3272_s14, 1024  ;;  %p3274_p4 = scmp.lt.s32.totalorder %s3639_s12, %s3272_s14 }
  0xb0   : > { %p3269_p13 = pnand %p3267_p12, %p3253_p8  ;;  %p3275_p1 = scmp.lt.s32.totalorder %s3273_s29, %s3266_s20 }
  0xb2   : > { %p3270_p10 = pneg %p3269_p13  ;;  %p3276_p3 = por %p3275_p1, %p3274_p4 }
  0xb4   : > { %p3277_p2 = pnand %p3276_p3, %p3270_p10 }
  0xb6   : > { %3280 = shalt.err (!%p3277_p2)
}
  0xb7   : > { %s3909_s9 = smov 64   ;;  %p3910_p8 = scmp.ne.s32.totalorder %s3900_s8, 0 }
  0xb8   : > { %2921 = dma.hbm_to_vmem [thread:$0]  (!%p3643_p11), %s3637_s22, 512, %s3639_s12, %s3647_s23, %s3909_s9, %s3909_s9, %s3365_s28  }
  0xb9   : > { %317 = sbr.rel (%p3910_p8) target bundleno = 1096 (0x448), region = 48  ;;  %s3681_s18 = sand.u32 (!%p3910_p8), 1, %s3351_s25  }
  0xba   : > { %s2278_s19 = sshll.u32 (!%p3910_p8), %s3681_s18, 5  ;;  %s320_s20 = scalar_lea.sflag (!%p3910_p8), [#allocation4], %s3681_s18 }
  0xbb   : > { %s3687_s16 = scalar_lea.vmem (!%p3910_p8), [#allocation3], %s2278_s19 }
  0xc0   : > { %3326 = dma.done.wait (%p3618_p6), %s320_s20, 512  }
  0xc1   : > { %3328 = vsyncadd (%p3618_p6), %s320_s20, 4294966784  ;;  %p3911_p4 = scmp.eq.s32.totalorder %s3435_s30, 0 }
  0xc3   : > { %3330 = dma.done.wait (%p3911_p4), [#allocation7], 1040   ;;  %p3912_p10 = pmov %p3911_p4 }
  0xc4   : > { %p3913_p11 = pmov %p3911_p4 }
  0xc5   : > { %3332 = vsyncadd (%p3912_p10), [#allocation7], 4294966256 }
  0xc6   : > { %3334 = dma.done.wait (%p3913_p11), [#allocation10], 9232   ;;  %p3914_p0 = pmov %p3911_p4 }
  0xc8   : > { %3336 = vsyncadd (%p3914_p0), [#allocation10], 4294958064  ;;  %p3915_p5 = pmov %p3914_p0 }
  0xc9   : > { %p3916_p7 = pmov %p3914_p0 }
  0xca   : > { %3338 = dma.done.wait (%p3915_p5), [#allocation13], 1040  }
  0xcb   : > { %3340 = vsyncadd (%p3916_p7), [#allocation13], 4294966256  ;;  %v2983_v0 = vld [vmem:[#allocation6] sm:$0xff]   ;;  %v2984_v1 = vld [vmem:[#allocation6 + $0x8] sm:$0xff]   ;;  %v3370_v22 = vmov 0.0   ;;  %s377_s8 = scalar_lea.vmem [#allocation15], %s2278_s19 }
  0xcc   : > { %2543 = vmatprep.subr.bf16.mxu0 %v2983_v0  ;;  %v2985_v2 = vld [vmem:[#allocation6 + $0x10] sm:$0xff]   ;;  %v2986_v3 = vld [vmem:[#allocation6 + $0x18] sm:$0xff]   ;;  %v379_v4 = vld [vmem:[%s3687_s16] sm:$0xff]   ;;  %561 = vst [vmem:[#allocation2 + $0x30] sm:$0xff] %v3370_v22  ;;  %s2135_s23 = sshll.u32 %s377_s8, 4  ;;  %s2387_s28 = sshll.u32 %s3435_s30, 9  ;;  %s3839_s23 = int_to_ptr.vmem [resolvable:$true] %s2135_s23 }
  0xcd   : > { %2544 = vmatpush3.bf16.msra.mxu0 %v2983_v0  ;;  %2559 = vmatprep.mubr.bf16.mxu0 %v379_v4  ;;  %v2996_v5 = vld [vmem:[#allocation9 + $0xc0] sm:$0xff]   ;;  %v2998_v7 = vld [vmem:[#allocation9 + $0xc8] sm:$0xff]   ;;  %v3000_v8 = vld [vmem:[#allocation9 + $0xd0] sm:$0xff]   ;;  %562 = vst [vmem:[#allocation2 + $0x38] sm:$0x3] %v3370_v22  ;;  %s3844_s12 = scalar_lea.hbm %s3895_s7, %s2387_s28  ;;  %s2122_s13 = scalar_lea.sflag [#allocation5], %s3681_s18 }
  0xce   : > { %2545 = vmatprep.subr.bf16.mxu0 %v2984_v1  ;;  %v2987_v6 = vld [vmem:[#allocation6 + $0x20] sm:$0xff]   ;;  %2639 = vmatprep.subr.bf16.mxu1 %v2996_v5  ;;  %v2988_v9 = vld [vmem:[#allocation6 + $0x28] sm:$0xff]   ;;  %v2989_v11 = vld [vmem:[#allocation6 + $0x30] sm:$0xff]   ;;  %555 = vst [vmem:[#allocation2] sm:$0xff] %v3370_v22  ;;  %s3281_s30 = scalar_lea.vmem %s3839_s23, 512  ;;  %p3917_p9 = scmp.ne.s32.totalorder %s3906_s10, 0 }
  0xcf   : > { %2640 = vmatpush3.bf16.msra.mxu1 %v2996_v5  ;;  %v3002_v10 = vld [vmem:[#allocation9 + $0xd8] sm:$0xff]   ;;  %v381_v13 = vld [vmem:[%s3687_s16 + $0x8] sm:$0xff]   ;;  %v383_v14 = vld [vmem:[%s3687_s16 + $0x10] sm:$0xff]   ;;  %556 = vst [vmem:[#allocation2 + $0x8] sm:$0x3] %v3370_v22  ;;  %p3282_p6 = scmp.ne.s32.totalorder %s3839_s23, %s3281_s30  ;;  %s3371_s14 = smov [#allocation15]  }
  0xd0   : > { %2641 = vmatprep.subr.bf16.mxu1 %v2998_v7  ;;  %v2990_v12 = vld [vmem:[#allocation6 + $0x38] sm:$0xff]   ;;  %v2995_v15 = vld [vmem:[#allocation9 + $0x40] sm:$0xff]   ;;  %v2997_v16 = vld [vmem:[#allocation9 + $0x48] sm:$0xff]   ;;  %557 = vst [vmem:[#allocation2 + $0x10] sm:$0xff] %v3370_v22  ;;  %s3285_s29 = sshll.u32 %s3371_s14, 4  ;;  %s3286_s29 = int_to_ptr.vmem [resolvable:$false] %s3285_s29 }
  0xd1   : > { %2546 = vmatpush3.bf16.msra.mxu0 %v2984_v1  ;;  %v385_v17 = vld [vmem:[%s3687_s16 + $0x18] sm:$0xff]   ;;  %v3003_v20 = vld [vmem:[#allocation9 + $0x60] sm:$0xff]   ;;  %v3005_v21 = vld [vmem:[#allocation9 + $0x68] sm:$0xff]   ;;  %558 = vst [vmem:[#allocation2 + $0x18] sm:$0x3] %v3370_v22  ;;  %p3283_p12 = pnand %p3282_p6, %p3917_p9  ;;  %s3287_s9 = scalar_lea.vmem %s3286_s29, 1024 }
  0xd2   : > { %2547 = vmatprep.subr.bf16.mxu0 %v2985_v2  ;;  %v2999_v18 = vld [vmem:[#allocation9 + $0x50] sm:$0xff]   ;;  %v3001_v19 = vld [vmem:[#allocation9 + $0x58] sm:$0xff]   ;;  %559 = vst [vmem:[#allocation2 + $0x20] sm:$0xff] %v3370_v22  ;;  %560 = vst [vmem:[#allocation2 + $0x28] sm:$0x3] %v3370_v22  ;;  %p3288_p1 = scmp.lt.s32.totalorder %s3839_s23, %s3286_s29  ;;  %p3289_p3 = scmp.lt.s32.totalorder %s3287_s9, %s3281_s30 }
  0xd3   : > { %2642 = vmatpush3.bf16.msra.mxu1 %v2998_v7  ;;  %563 = vst [vmem:[#allocation2 + $0x40] sm:$0xff] %v3370_v22  ;;  %564 = vst [vmem:[#allocation2 + $0x48] sm:$0x3] %v3370_v22  ;;  %v3007_v23 = vld [vmem:[#allocation9 + $0x70] sm:$0xff]   ;;  %v3004_v24 = vld [vmem:[#allocation9 + $0xe0] sm:$0xff]   ;;  %p3284_p13 = pneg %p3283_p12 }
  0xd4   : > { %2643 = vmatprep.subr.bf16.mxu1 %v3000_v8  ;;  %565 = vst [vmem:[#allocation2 + $0x50] sm:$0xff] %v3370_v22  ;;  %566 = vst [vmem:[#allocation2 + $0x58] sm:$0x3] %v3370_v22  ;;  %v3009_v25 = vld [vmem:[#allocation9 + $0x78] sm:$0xff]   ;;  %v3006_v26 = vld [vmem:[#allocation9 + $0xe8] sm:$0xff]   ;;  %p3290_p2 = por %p3289_p3, %p3288_p1 }
  0xd5   : > { %2548 = vmatpush3.bf16.msra.mxu0 %v2985_v2  ;;  %567 = vst [vmem:[#allocation2 + $0x60] sm:$0xff] %v3370_v22  ;;  %568 = vst [vmem:[#allocation2 + $0x68] sm:$0x3] %v3370_v22  ;;  %v3011_v27 = vld [vmem:[#allocation9] sm:$0xff]   ;;  %v3008_v28 = vld [vmem:[#allocation9 + $0xf0] sm:$0xff]  }
  0xd6   : > { %2549 = vmatprep.subr.bf16.mxu0 %v2986_v3  ;;  %569 = vst [vmem:[#allocation2 + $0x70] sm:$0xff] %v3370_v22  ;;  %570 = vst [vmem:[#allocation2 + $0x78] sm:$0x3] %v3370_v22  ;;  %v3010_v29 = vld [vmem:[#allocation9 + $0xf8] sm:$0xff]   ;;  %v3729_v30 = vld [vmem:[#allocation9 + $0x100] sm:$0xff]   ;;  %p3291_p8 = pnand %p3290_p2, %p3284_p13 }
  0xd7   : > { %2644 = vmatpush3.bf16.msra.mxu1 %v3000_v8  ;;  %571 = vst [vmem:[#allocation2 + $0x80] sm:$0xff] %v3370_v22  ;;  %572 = vst [vmem:[#allocation2 + $0x88] sm:$0x3] %v3370_v22  ;;  %v2286_v31 = vld [vmem:[#allocation8] ss:$0 sm:$0xff]  ;;  %v612_v40 = vld [vmem:[#allocation2 + $0x1] sm:$0xff] }
  0xd8   : > { %2645 = vmatprep.subr.bf16.mxu1 %v3002_v10  ;;  %573 = vst [vmem:[#allocation2 + $0x90] sm:$0xff] %v3370_v22  ;;  %574 = vst [vmem:[#allocation2 + $0x98] sm:$0x3] %v3370_v22  ;;  %v3013_v49 = vld [vmem:[#allocation9 + $0x8] sm:$0xff]   ;;  %v3015_v60 = vld [vmem:[#allocation9 + $0x10] sm:$0xff]  }
  0xd9   : > { %2550 = vmatpush3.bf16.msra.mxu0 %v2986_v3  ;;  %v3014_v8 = vld [vmem:[#allocation9 + $0x108] sm:$0xff]  }
  0xda   : > { %2551 = vmatprep.subr.bf16.mxu0 %v2987_v6 }
  0xdb   : > { %2646 = vmatpush3.bf16.msra.mxu1 %v3002_v10 }
  0xdc   : > { %2647 = vmatprep.subr.bf16.mxu1 %v3004_v24 }
  0xdd   : > { %2552 = vmatpush3.bf16.msra.mxu0 %v2987_v6 }
  0xde   : > { %2553 = vmatprep.subr.bf16.mxu0 %v2988_v9 }
  0xdf   : > { %2648 = vmatpush3.bf16.msra.mxu1 %v3004_v24  ;;  %v3020_v24 = vld [vmem:[#allocation9 + $0x120] sm:$0xff]  }
  0xe0   : > { %2649 = vmatprep.subr.bf16.mxu1 %v3006_v26 }
  0xe1   : > { %2554 = vmatpush3.bf16.msra.mxu0 %v2988_v9  ;;  %v3017_v9 = vld [vmem:[#allocation9 + $0x18] sm:$0xff]  }
  0xe2   : > { %2555 = vmatprep.subr.bf16.mxu0 %v2989_v11 }
  0xe3   : > { %2650 = vmatpush3.bf16.msra.mxu1 %v3006_v26  ;;  %v3022_v26 = vld [vmem:[#allocation9 + $0x128] sm:$0xff]  }
  0xe4   : > { %2651 = vmatprep.subr.bf16.mxu1 %v3008_v28 }
  0xe5   : > { %2556 = vmatpush3.bf16.msra.mxu0 %v2989_v11 }
  0xe6   : > { %2557 = vmatprep.subr.bf16.mxu0 %v2990_v12 }
  0xe7   : > { %2652 = vmatpush3.bf16.msra.mxu1 %v3008_v28  ;;  %v3024_v28 = vld [vmem:[#allocation9 + $0x130] sm:$0xff]  }
  0xe8   : > { %2653 = vmatprep.subr.bf16.mxu1 %v3010_v29 }
  0xe9   : > { %2558 = vmatpush3.bf16.msra.mxu0 %v2990_v12 }
  0xea   : > { %2567 = vmatprep.subr.bf16.mxu0 %v2995_v15 }
  0xeb   : > { %2654 = vmatpush3.bf16.msra.mxu1 %v3010_v29 }
  0xec   : > { %2560 = vmatmul.mubr.bf16.vlgmr.msra.gmra.mrb[0].mxu0 %v381_v13  ;;  %2663 = vmatprep.subr.bf16.mxu1 %v3729_v30  ;;  %v3019_v13 = vld [vmem:[#allocation9 + $0x20] sm:$0xff]  }
  0xed   : > { %2563 = vmatprep.mubr.bf16.mxu0 %v383_v14  ;;  %2568 = vmatpush3.bf16.msra.mxu0 %v2995_v15  ;;  %v3016_v14 = vld [vmem:[#allocation9 + $0x110] sm:$0xff]  }
  0xee   : > { %2569 = vmatprep.subr.bf16.mxu0 %v2997_v16 }
  0xf1   : > { %2570 = vmatpush3.bf16.msra.mxu0 %v2997_v16 }
  0xf2   : > { %2571 = vmatprep.subr.bf16.mxu0 %v2999_v18 }
  0xf4   : > { %2564 = vmatmul.mubr.bf16.gmra.mrb[4].mxu0 %v385_v17 }
  0xf5   : > { %2572 = vmatpush3.bf16.msra.mxu0 %v2999_v18 }
  0xf6   : > { %2573 = vmatprep.subr.bf16.mxu0 %v3001_v19 }
  0xf9   : > { %2574 = vmatpush3.bf16.msra.mxu0 %v3001_v19 }
  0xfa   : > { %2575 = vmatprep.subr.bf16.mxu0 %v3003_v20 }
  0xfd   : > { %2576 = vmatpush3.bf16.msra.mxu0 %v3003_v20  ;;  %v3018_v20 = vld [vmem:[#allocation9 + $0x118] sm:$0xff]  }
  0xfe   : > { %2577 = vmatprep.subr.bf16.mxu0 %v3005_v21 }
 0x101   : > { %2578 = vmatpush3.bf16.msra.mxu0 %v3005_v21  ;;  %v3021_v21 = vld [vmem:[#allocation9 + $0x28] sm:$0xff]  }
 0x102   : > { %2579 = vmatprep.subr.bf16.mxu0 %v3007_v23 }
 0x105   : > { %2580 = vmatpush3.bf16.msra.mxu0 %v3007_v23  ;;  %v3023_v23 = vld [vmem:[#allocation9 + $0x30] sm:$0xff]  }
 0x106   : > { %2581 = vmatprep.subr.bf16.mxu0 %v3009_v25 }
 0x109   : > { %2582 = vmatpush3.bf16.msra.mxu0 %v3009_v25  ;;  %v3025_v25 = vld [vmem:[#allocation9 + $0x38] sm:$0xff]  }
 0x10a   : > { %2591 = vmatprep.subr.bf16.mxu0 %v3011_v27 }
 0x1bf   : > { %v2561_v32 = vpop.f32.mrb[0].mxu0 }
 0x1c0   : > { %v525_v33 = vadd.f32 %v2561_v32, %v2286_v31  ;;  %v516_v34 = vpop.f32.mrb[1].mxu0 }
 0x1c1   : > { %v517_v35 = vadd.f32 %v2286_v31, %v516_v34  ;;  %v2562_v36 = vpop.f32.mrb[2].mxu0  ;;  %v3028_v34 = vld [vmem:[#allocation9 + $0x140] sm:$0xff]  }
 0x1c2   : > { %v3732_v37 = vmax.f32 %v525_v33, 0.0  ;;  %v528_v38 = vadd.f32 %v2562_v36, %v2286_v31  ;;  %v519_v39 = vpop.f32.mrb[3].mxu0  ;;  %v3031_v33 = vld [vmem:[#allocation9 + $0x90] sm:$0xff]   ;;  %v867_v36 = vld [vmem:[#allocation2 + $0x2] sm:$0xff] }
 0x1c3   : > { %v3734_v41 = vmax.f32 %v517_v35, 0.0  ;;  %v520_v42 = vadd.f32 %v2286_v31, %v519_v39  ;;  %v3030_v39 = vld [vmem:[#allocation9 + $0x148] sm:$0xff]  }
 0x1c4   : > { %578 = vst [vmem:[#allocation2 + $0x31] sm:$0xff] %v3732_v37  ;;  %v3737_v43 = vmax.f32 %v528_v38, 0.0 }
 0x1c5   : > { %576 = vst [vmem:[#allocation2 + $0x11] sm:$0xff] %v3734_v41  ;;  %v3740_v44 = vmax.f32 %v520_v42, 0.0  ;;  %v620_v45 = vpack.c.bf16 %v3734_v41, %v612_v40  ;;  %v3033_v40 = vld [vmem:[#allocation9 + $0x98] sm:$0xff]   ;;  %v3035_v42 = vld [vmem:[#allocation9 + $0xa0] sm:$0xff]  }
 0x1c6   : > { %579 = vst [vmem:[#allocation2 + $0x41] sm:$0xff] %v3737_v43  ;;  %v1176_v46 = vpack.c.bf16 %v3737_v43, %v3732_v37 }
 0x1c7   : > { %577 = vst [vmem:[#allocation2 + $0x21] sm:$0xff] %v3740_v44  ;;  %v2565_v47 = vpop.f32.mrb[4].mxu0  ;;  %2583 = vmatprep.mubr.bf16.mxu0 %v620_v45  ;;  %v3749_v48 = vpack.c.bf16 %v3732_v37, %v3740_v44  ;;  %v1175_v50 = vpack.c.bf16 %v3740_v44, %v3734_v41  ;;  %v3032_v44 = vld [vmem:[#allocation9 + $0x150] sm:$0xff]   ;;  %v3037_v37 = vld [vmem:[#allocation9 + $0xa8] sm:$0xff]  }
 0x1c8   : > { %v541_v51 = vadd.f32 %v2565_v47, %v2286_v31  ;;  %v532_v52 = vpop.f32.mrb[5].mxu0  ;;  %v3034_v47 = vld [vmem:[#allocation9 + $0x158] sm:$0xff]  }
 0x1c9   : > { %v533_v53 = vadd.f32 %v2286_v31, %v532_v52  ;;  %v2566_v54 = vpop.f32.mrb[6].mxu0  ;;  %2584 = vmatmul.mubr.bf16.vlgmr.msra.gmra.mrb[8].mxu0 %v3749_v48  ;;  %v3040_v52 = vld [vmem:[#allocation9 + $0x170] sm:$0xff]  }
 0x1ca   : > { %v3754_v55 = vmax.f32 %v541_v51, 0.0  ;;  %v544_v56 = vadd.f32 %v2566_v54, %v2286_v31  ;;  %v535_v57 = vpop.f32.mrb[7].mxu0  ;;  %2592 = vmatpush3.bf16.msra.mxu0 %v3011_v27  ;;  %v3027_v27 = vld [vmem:[#allocation9 + $0x80] sm:$0xff]   ;;  %v3038_v51 = vld [vmem:[#allocation9 + $0x168] sm:$0xff]  }
 0x1cb   : > { %v3756_v58 = vmax.f32 %v533_v53, 0.0  ;;  %v536_v59 = vadd.f32 %v2286_v31, %v535_v57  ;;  %2593 = vmatprep.subr.bf16.mxu0 %v3013_v49  ;;  %v1019_v5 = vld [vmem:[#allocation2 + $0x30] sm:$0xff]  ;;  %v3026_v31 = vld [vmem:[#allocation9 + $0x138] sm:$0xff]  }
 0x1cc   : > { %582 = vst [vmem:[#allocation2 + $0x71] sm:$0xff] %v3754_v55  ;;  %v3759_v61 = vmax.f32 %v544_v56, 0.0  ;;  %v1017_v1 = vld [vmem:[#allocation2 + $0x10] sm:$0xff]  ;;  %v3042_v57 = vld [vmem:[#allocation9 + $0x178] sm:$0xff]  }
 0x1cd   : > { %580 = vst [vmem:[#allocation2 + $0x51] sm:$0xff] %v3756_v58  ;;  %v3762_v62 = vmax.f32 %v536_v59, 0.0  ;;  %v3764_v63 = vld [vmem:[#allocation2 + $0x40] sm:$0xff]  ;;  %v3768_v0 = vpack.c.bf16 %v3756_v58, %v3737_v43  ;;  %v592_v11 = vpack.c.bf16 %v1017_v1, %v3370_v22  ;;  %v868_v38 = vld [vmem:[#allocation2 + $0x12] sm:$0xff] }
 0x1ce   : > { %583 = vst [vmem:[#allocation2 + $0x81] sm:$0xff] %v3759_v61  ;;  %v1018_v2 = vld [vmem:[#allocation2 + $0x20] sm:$0xff]  ;;  %2594 = vmatpush3.bf16.msra.mxu0 %v3013_v49  ;;  %v1178_v3 = vpack.c.bf16 %v3759_v61, %v3754_v55  ;;  %v1026_v7 = vpack.c.bf16 %v3764_v63, %v1019_v5  ;;  %v875_v41 = vpack.c.bf16 %v868_v38, %v867_v36  ;;  %v870_v54 = vld [vmem:[#allocation2 + $0x32] sm:$0xff] }
 0x1cf   : > { %581 = vst [vmem:[#allocation2 + $0x61] sm:$0xff] %v3762_v62  ;;  %v1025_v4 = vpack.c.bf16 %v1018_v2, %v1017_v1  ;;  %2587 = vmatprep.mubr.bf16.mxu0 %v3768_v0  ;;  %2595 = vmatprep.subr.bf16.mxu0 %v3015_v60  ;;  %v3777_v6 = vpack.c.bf16 %v3754_v55, %v3762_v62  ;;  %v1318_v45 = vld [vmem:[#allocation2 + $0x22] sm:$0xff]  ;;  %v3073_v36 = vld [vmem:[#allocation12 + $0x30] sm:$0xff]  }
 0x1d0   : > { %v1177_v10 = vpack.c.bf16 %v3762_v62, %v3756_v58  ;;  %v3788_v29 = vpack.c.bf16 %v1019_v5, %v1018_v2  ;;  %v1325_v43 = vpack.c.bf16 %v1318_v45, %v868_v38  ;;  %v3036_v49 = vld [vmem:[#allocation9 + $0x160] sm:$0xff]   ;;  %v3807_v55 = vpack.c.bf16 %v870_v54, %v1318_v45  ;;  %v3044_v2 = vld [vmem:[#allocation9 + $0x188] sm:$0xff]  }
 0x1d1   : > { %2655 = vmatprep.mubr.bf16.mxu1 %v1025_v4  ;;  %2588 = vmatmul.mubr.bf16.gmra.mrb[12].mxu0 %v3777_v6  ;;  %v871_v56 = vld [vmem:[#allocation2 + $0x42] sm:$0xff]  ;;  %v3045_v4 = vld [vmem:[#allocation9 + $0x190] sm:$0xff]  }
 0x1d2   : > { %2656 = vmatmul.mubr.bf16.vlgmr.msra.gmra.mrb[0].mxu1 %v1026_v7  ;;  %2596 = vmatpush3.bf16.msra.mxu0 %v3015_v60  ;;  %v3043_v59 = vld [vmem:[#allocation9 + $0x180] sm:$0xff]   ;;  %v1326_v1 = vpack.c.bf16 %v871_v56, %v870_v54 }
 0x1d3   : > { %2664 = vmatpush3.bf16.msra.mxu1 %v3729_v30  ;;  %2607 = vmatprep.mubr.bf16.mxu0 %v592_v11  ;;  %v1023_v12 = vld [vmem:[#allocation2 + $0x70] sm:$0xff]  ;;  %v3074_v38 = vld [vmem:[#allocation12 + $0x38] sm:$0xff]  }
 0x1d4   : > { %2665 = vmatprep.subr.bf16.mxu1 %v3014_v8  ;;  %2597 = vmatprep.subr.bf16.mxu0 %v3017_v9  ;;  %v1021_v16 = vld [vmem:[#allocation2 + $0x50] sm:$0xff] }
 0x1d5   : > { %v3785_v15 = vld [vmem:[#allocation2 + $0x80] sm:$0xff]  ;;  %v3029_v30 = vld [vmem:[#allocation9 + $0x88] sm:$0xff]   ;;  %v3791_v32 = vpack.c.bf16 %v1021_v16, %v3764_v63  ;;  %v872_v53 = vld [vmem:[#allocation2 + $0x52] sm:$0xff] }
 0x1d6   : > { %v1022_v17 = vld [vmem:[#allocation2 + $0x60] sm:$0xff]  ;;  %v1028_v18 = vpack.c.bf16 %v3785_v15, %v1023_v12  ;;  %2598 = vmatpush3.bf16.msra.mxu0 %v3017_v9  ;;  %v3809_v58 = vpack.c.bf16 %v872_v53, %v871_v56  ;;  %v874_v62 = vld [vmem:[#allocation2 + $0x72] sm:$0xff] }
 0x1d7   : > { %2666 = vmatpush3.bf16.msra.mxu1 %v3014_v8  ;;  %v1027_v19 = vpack.c.bf16 %v1022_v17, %v1021_v16  ;;  %2599 = vmatprep.subr.bf16.mxu0 %v3019_v13  ;;  %v3795_v35 = vpack.c.bf16 %v1023_v12, %v1022_v17  ;;  %v1322_v60 = vld [vmem:[#allocation2 + $0x62] sm:$0xff]  ;;  %v3046_v8 = vld [vmem:[#allocation9 + $0x198] sm:$0xff]   ;;  %v3049_v11 = vld [vmem:[#allocation9 + $0x1b0] sm:$0xff]   ;;  %v1479_v17 = vpack.c.bf16 %v3370_v22, %v3785_v15 }
 0x1d8   : > { %2667 = vmatprep.subr.bf16.mxu1 %v3016_v14  ;;  %v3813_v63 = vpack.c.bf16 %v874_v62, %v1322_v60  ;;  %v3816_v5 = vld [vmem:[#allocation2 + $0x82] sm:$0xff]  ;;  %v3050_v12 = vld [vmem:[#allocation9 + $0x1b8] sm:$0xff]   ;;  %v3053_v16 = vld [vmem:[#allocation9 + $0x1d0] sm:$0xff]  }
 0x1d9   : > { %2659 = vmatprep.mubr.bf16.mxu1 %v1027_v19  ;;  %v1328_v7 = vpack.c.bf16 %v3816_v5, %v874_v62  ;;  %v3047_v9 = vld [vmem:[#allocation9 + $0x1a0] sm:$0xff]   ;;  %v3060_v15 = vld [vmem:[#allocation9 + $0x208] sm:$0xff]  }
 0x1da   : > { %2660 = vmatmul.mubr.bf16.gmra.mrb[4].mxu1 %v1028_v18  ;;  %2600 = vmatpush3.bf16.msra.mxu0 %v3019_v13  ;;  %v3051_v13 = vld [vmem:[#allocation9 + $0x1c0] sm:$0xff]   ;;  %v3054_v18 = vld [vmem:[#allocation9 + $0x1d8] sm:$0xff]  }
 0x1db   : > { %2668 = vmatpush3.bf16.msra.mxu1 %v3016_v14  ;;  %2679 = vmatprep.mubr.bf16.mxu1 %v1175_v50  ;;  %v3041_v50 = vld [vmem:[#allocation9 + $0xb8] sm:$0xff]   ;;  %v3052_v14 = vld [vmem:[#allocation9 + $0x1c8] sm:$0xff]   ;;  %v3055_v19 = vld [vmem:[#allocation9 + $0x1e0] sm:$0xff]  }
 0x1dc   : > { %2669 = vmatprep.subr.bf16.mxu1 %v3018_v20  ;;  %2601 = vmatprep.subr.bf16.mxu0 %v3021_v21  ;;  %v3059_v22 = vld [vmem:[#allocation9 + $0x200] sm:$0xff]  }
 0x1de   : > { %2602 = vmatpush3.bf16.msra.mxu0 %v3021_v21  ;;  %v3057_v21 = vld [vmem:[#allocation9 + $0x1f0] sm:$0xff]  }
 0x1df   : > { %2670 = vmatpush3.bf16.msra.mxu1 %v3018_v20  ;;  %2603 = vmatprep.subr.bf16.mxu0 %v3023_v23  ;;  %v3056_v20 = vld [vmem:[#allocation9 + $0x1e8] sm:$0xff]  }
 0x1e0   : > { %2671 = vmatprep.subr.bf16.mxu1 %v3020_v24 }
 0x1e2   : > { %2604 = vmatpush3.bf16.msra.mxu0 %v3023_v23  ;;  %v3058_v23 = vld [vmem:[#allocation9 + $0x1f8] sm:$0xff]  }
 0x1e3   : > { %2672 = vmatpush3.bf16.msra.mxu1 %v3020_v24  ;;  %2605 = vmatprep.subr.bf16.mxu0 %v3025_v25  ;;  %v1625_v24 = vld [vmem:[#allocation2 + $0x91] sm:$0xff] }
 0x1e4   : > { %2673 = vmatprep.subr.bf16.mxu1 %v3022_v26 }
 0x1e6   : > { %2606 = vmatpush3.bf16.msra.mxu0 %v3025_v25  ;;  %v1629_v25 = vpack.c.bf16 %v1625_v24, %v3759_v61  ;;  %v3069_v61 = vld [vmem:[#allocation12 + $0x10] sm:$0xff]  }
 0x1e7   : > { %2674 = vmatpush3.bf16.msra.mxu1 %v3022_v26  ;;  %2615 = vmatprep.subr.bf16.mxu0 %v3027_v27  ;;  %v3062_v26 = vld [vmem:[#allocation9 + $0x218] sm:$0xff]  }
 0x1e8   : > { %2675 = vmatprep.subr.bf16.mxu1 %v3024_v28 }
 0x1e9   : > { %2608 = vmatmul.mubr.bf16.vlgmr.msra.gmra.mrb[8].mxu0 %v3788_v29 }
 0x1ea   : > { %2611 = vmatprep.mubr.bf16.mxu0 %v3791_v32  ;;  %2616 = vmatpush3.bf16.msra.mxu0 %v3027_v27  ;;  %v3063_v27 = vld [vmem:[#allocation9 + $0x220] sm:$0xff]  }
 0x1eb   : > { %2676 = vmatpush3.bf16.msra.mxu1 %v3024_v28  ;;  %2617 = vmatprep.subr.bf16.mxu0 %v3029_v30  ;;  %v3067_v28 = vld [vmem:[#allocation12] sm:$0xff]  }
 0x1ec   : > { %2677 = vmatprep.subr.bf16.mxu1 %v3026_v31 }
 0x1ee   : > { %2618 = vmatpush3.bf16.msra.mxu0 %v3029_v30  ;;  %v3066_v30 = vld [vmem:[#allocation9 + $0x238] sm:$0xff]  }
 0x1ef   : > { %2678 = vmatpush3.bf16.msra.mxu1 %v3026_v31  ;;  %2619 = vmatprep.subr.bf16.mxu0 %v3031_v33  ;;  %v3070_v31 = vld [vmem:[#allocation12 + $0x18] sm:$0xff]  }
 0x1f0   : > { %2687 = vmatprep.subr.bf16.mxu1 %v3028_v34 }
 0x1f1   : > { %2612 = vmatmul.mubr.bf16.gmra.mrb[12].mxu0 %v3795_v35 }
 0x1f2   : > { %2680 = vmatmul.mubr.bf16.vlgmr.msra.gmra.mrb[0].mxu1 %v1176_v46  ;;  %2620 = vmatpush3.bf16.msra.mxu0 %v3031_v33  ;;  %v3039_v46 = vld [vmem:[#allocation9 + $0xb0] sm:$0xff]  }
 0x1f3   : > { %2683 = vmatprep.mubr.bf16.mxu1 %v1177_v10  ;;  %2688 = vmatpush3.bf16.msra.mxu1 %v3028_v34  ;;  %v3048_v10 = vld [vmem:[#allocation9 + $0x1a8] sm:$0xff]   ;;  %v1775_v33 = vld [vmem:[#allocation2 + $0x92] sm:$0xff] }
 0x1f4   : > { %2689 = vmatprep.subr.bf16.mxu1 %v3030_v39  ;;  %2631 = vmatprep.mubr.bf16.mxu0 %v875_v41  ;;  %v1779_v34 = vpack.c.bf16 %v1775_v33, %v3816_v5 }
 0x1f5   : > { %2621 = vmatprep.subr.bf16.mxu0 %v3033_v40 }
 0x1f6   : > { %2622 = vmatpush3.bf16.msra.mxu0 %v3033_v40 }
 0x1f7   : > { %2690 = vmatpush3.bf16.msra.mxu1 %v3030_v39  ;;  %2623 = vmatprep.subr.bf16.mxu0 %v3035_v42 }
 0x1f8   : > { %2691 = vmatprep.subr.bf16.mxu1 %v3032_v44 }
 0x1fa   : > { %2684 = vmatmul.mubr.bf16.gmra.mrb[4].mxu1 %v1178_v3  ;;  %2624 = vmatpush3.bf16.msra.mxu0 %v3035_v42  ;;  %v1327_v3 = vpack.c.bf16 %v1322_v60, %v872_v53 }
 0x1fb   : > { %2692 = vmatpush3.bf16.msra.mxu1 %v3032_v44  ;;  %2703 = vmatprep.mubr.bf16.mxu1 %v1325_v43 }
 0x1fc   : > { %2693 = vmatprep.subr.bf16.mxu1 %v3034_v47  ;;  %2625 = vmatprep.subr.bf16.mxu0 %v3037_v37 }
 0x1fe   : > { %2626 = vmatpush3.bf16.msra.mxu0 %v3037_v37 }
 0x1ff   : > { %2694 = vmatpush3.bf16.msra.mxu1 %v3034_v47  ;;  %2627 = vmatprep.subr.bf16.mxu0 %v3039_v46 }
 0x200   : > { %2695 = vmatprep.subr.bf16.mxu1 %v3036_v49 }
 0x202   : > { %2628 = vmatpush3.bf16.msra.mxu0 %v3039_v46  ;;  %v2371_v46 = vld [vmem:[#allocation11] ss:$0 sm:$0xff] }
 0x203   : > { %2696 = vmatpush3.bf16.msra.mxu1 %v3036_v49  ;;  %2629 = vmatprep.subr.bf16.mxu0 %v3041_v50 }
 0x204   : > { %2697 = vmatprep.subr.bf16.mxu1 %v3038_v51 }
 0x206   : > { %2630 = vmatpush3.bf16.msra.mxu0 %v3041_v50 }
 0x207   : > { %2698 = vmatpush3.bf16.msra.mxu1 %v3038_v51  ;;  %2783 = vmatprep.subr.bf16.mxu0 %v3067_v28 }
 0x208   : > { %2699 = vmatprep.subr.bf16.mxu1 %v3040_v52 }
 0x209   : > { %2632 = vmatmul.mubr.bf16.vlgmr.msra.gmra.mrb[8].mxu0 %v3807_v55 }
 0x20a   : > { %2635 = vmatprep.mubr.bf16.mxu0 %v3809_v58  ;;  %2784 = vmatpush3.bf16.msra.mxu0 %v3067_v28 }
 0x20b   : > { %2700 = vmatpush3.bf16.msra.mxu1 %v3040_v52 }
 0x20c   : > { %2701 = vmatprep.subr.bf16.mxu1 %v3042_v57 }
 0x20f   : > { %2702 = vmatpush3.bf16.msra.mxu1 %v3042_v57 }
 0x210   : > { %2711 = vmatprep.subr.bf16.mxu1 %v3043_v59 }
 0x211   : > { %2636 = vmatmul.mubr.bf16.gmra.mrb[12].mxu0 %v3813_v63 }
 0x212   : > { %2704 = vmatmul.mubr.bf16.vlgmr.msra.gmra.mrb[0].mxu1 %v1326_v1 }
 0x213   : > { %2707 = vmatprep.mubr.bf16.mxu1 %v1327_v3  ;;  %2712 = vmatpush3.bf16.msra.mxu1 %v3043_v59 }
 0x214   : > { %2713 = vmatprep.subr.bf16.mxu1 %v3044_v2 }
 0x217   : > { %2714 = vmatpush3.bf16.msra.mxu1 %v3044_v2 }
 0x218   : > { %2715 = vmatprep.subr.bf16.mxu1 %v3045_v4 }
 0x21a   : > { %2708 = vmatmul.mubr.bf16.gmra.mrb[4].mxu1 %v1328_v7 }
 0x21b   : > { %2716 = vmatpush3.bf16.msra.mxu1 %v3045_v4  ;;  %2727 = vmatprep.mubr.bf16.mxu1 %v3788_v29  ;;  %v3068_v29 = vld [vmem:[#allocation12 + $0x8] sm:$0xff]  }
 0x21c   : > { %2717 = vmatprep.subr.bf16.mxu1 %v3046_v8  ;;  %2785 = vmatprep.subr.bf16.mxu0 %v3068_v29 }
 0x21d   : > { %2786 = vmatpush3.bf16.msra.mxu0 %v3068_v29  ;;  %v3080_v29 = vld [vmem:[%s3687_s16 + $0x8] sm:$0xff]  }
 0x21e   : > { %2787 = vmatprep.subr.bf16.mxu0 %v3069_v61 }
 0x21f   : > { %2718 = vmatpush3.bf16.msra.mxu1 %v3046_v8 }
 0x220   : > { %2719 = vmatprep.subr.bf16.mxu1 %v3047_v9 }
 0x221   : > { %2788 = vmatpush3.bf16.msra.mxu0 %v3069_v61 }
 0x222   : > { %2789 = vmatprep.subr.bf16.mxu0 %v3070_v31 }
 0x223   : > { %2720 = vmatpush3.bf16.msra.mxu1 %v3047_v9 }
 0x224   : > { %2721 = vmatprep.subr.bf16.mxu1 %v3048_v10 }
 0x225   : > { %2790 = vmatpush3.bf16.msra.mxu0 %v3070_v31  ;;  %v2092_v31 = vunpack.c.h.bf16 %v3080_v29 }
 0x227   : > { %2722 = vmatpush3.bf16.msra.mxu1 %v3048_v10 }
 0x228   : > { %2723 = vmatprep.subr.bf16.mxu1 %v3049_v11 }
 0x22b   : > { %2724 = vmatpush3.bf16.msra.mxu1 %v3049_v11 }
 0x22c   : > { %2725 = vmatprep.subr.bf16.mxu1 %v3050_v12 }
 0x22f   : > { %2726 = vmatpush3.bf16.msra.mxu1 %v3050_v12 }
 0x230   : > { %2735 = vmatprep.subr.bf16.mxu1 %v3051_v13 }
 0x232   : > { %2728 = vmatmul.mubr.bf16.vlgmr.msra.gmra.mrb[0].mxu1 %v3791_v32  ;;  %v3071_v32 = vld [vmem:[#allocation12 + $0x20] sm:$0xff]  }
 0x233   : > { %2731 = vmatprep.mubr.bf16.mxu1 %v3795_v35  ;;  %2736 = vmatpush3.bf16.msra.mxu1 %v3051_v13  ;;  %v3072_v35 = vld [vmem:[#allocation12 + $0x28] sm:$0xff]  }
 0x234   : > { %2737 = vmatprep.subr.bf16.mxu1 %v3052_v14  ;;  %2791 = vmatprep.subr.bf16.mxu0 %v3071_v32 }
 0x235   : > { %2792 = vmatpush3.bf16.msra.mxu0 %v3071_v32 }
 0x236   : > { %2793 = vmatprep.subr.bf16.mxu0 %v3072_v35 }
 0x237   : > { %2738 = vmatpush3.bf16.msra.mxu1 %v3052_v14 }
 0x238   : > { %2739 = vmatprep.subr.bf16.mxu1 %v3053_v16 }
 0x239   : > { %2794 = vmatpush3.bf16.msra.mxu0 %v3072_v35 }
 0x23a   : > { %2732 = vmatmul.mubr.bf16.gmra.mrb[4].mxu1 %v1479_v17  ;;  %2795 = vmatprep.subr.bf16.mxu0 %v3073_v36 }
 0x23b   : > { %2740 = vmatpush3.bf16.msra.mxu1 %v3053_v16  ;;  %2751 = vmatprep.mubr.bf16.mxu1 %v3749_v48  ;;  %v3061_v48 = vld [vmem:[#allocation9 + $0x210] sm:$0xff]  }
 0x23c   : > { %2741 = vmatprep.subr.bf16.mxu1 %v3054_v18 }
 0x23d   : > { %2796 = vmatpush3.bf16.msra.mxu0 %v3073_v36 }
 0x23e   : > { %2797 = vmatprep.subr.bf16.mxu0 %v3074_v38 }
 0x23f   : > { %2742 = vmatpush3.bf16.msra.mxu1 %v3054_v18 }
 0x240   : > { %2743 = vmatprep.subr.bf16.mxu1 %v3055_v19 }
 0x241   : > { %2798 = vmatpush3.bf16.msra.mxu0 %v3074_v38 }
 0x243   : > { %2744 = vmatpush3.bf16.msra.mxu1 %v3055_v19 }
 0x244   : > { %2745 = vmatprep.subr.bf16.mxu1 %v3056_v20 }
 0x247   : > { %2746 = vmatpush3.bf16.msra.mxu1 %v3056_v20 }
 0x248   : > { %2747 = vmatprep.subr.bf16.mxu1 %v3057_v21 }
 0x24b   : > { %2748 = vmatpush3.bf16.msra.mxu1 %v3057_v21 }
 0x24c   : > { %2749 = vmatprep.subr.bf16.mxu1 %v3058_v23 }
 0x24f   : > { %2750 = vmatpush3.bf16.msra.mxu1 %v3058_v23 }
 0x250   : > { %2759 = vmatprep.subr.bf16.mxu1 %v3059_v22 }
 0x252   : > { %2752 = vmatmul.mubr.bf16.vlgmr.msra.gmra.mrb[0].mxu1 %v3768_v0  ;;  %v3064_v0 = vld [vmem:[#allocation9 + $0x228] sm:$0xff]  }
 0x253   : > { %2755 = vmatprep.mubr.bf16.mxu1 %v3777_v6  ;;  %2760 = vmatpush3.bf16.msra.mxu1 %v3059_v22  ;;  %v3065_v6 = vld [vmem:[#allocation9 + $0x230] sm:$0xff]  }
 0x254   : > { %2761 = vmatprep.subr.bf16.mxu1 %v3060_v15 }
 0x257   : > { %2762 = vmatpush3.bf16.msra.mxu1 %v3060_v15  ;;  %v2372_v15 = vld [vmem:[#allocation14] ss:$0 sm:$0xff] }
 0x258   : > { %2763 = vmatprep.subr.bf16.mxu1 %v3061_v48 }
 0x25a   : > { %2756 = vmatmul.mubr.bf16.gmra.mrb[4].mxu1 %v1629_v25 }
 0x25b   : > { %2764 = vmatpush3.bf16.msra.mxu1 %v3061_v48  ;;  %2775 = vmatprep.mubr.bf16.mxu1 %v3807_v55 }
 0x25c   : > { %2765 = vmatprep.subr.bf16.mxu1 %v3062_v26 }
 0x25f   : > { %2766 = vmatpush3.bf16.msra.mxu1 %v3062_v26  ;;  %v3079_v26 = vld [vmem:[%s3687_s16] sm:$0xff]  }
 0x260   : > { %2767 = vmatprep.subr.bf16.mxu1 %v3063_v27  ;;  %v2090_v33 = vunpack.c.h.bf16 %v3079_v26 }
 0x263   : > { %2768 = vmatpush3.bf16.msra.mxu1 %v3063_v27  ;;  %v2089_v27 = vunpack.c.l.bf16 %v3079_v26 }
 0x264   : > { %2769 = vmatprep.subr.bf16.mxu1 %v3064_v0 }
 0x267   : > { %2770 = vmatpush3.bf16.msra.mxu1 %v3064_v0 }
 0x268   : > { %2771 = vmatprep.subr.bf16.mxu1 %v3065_v6 }
 0x26b   : > { %2772 = vmatpush3.bf16.msra.mxu1 %v3065_v6 }
 0x26c   : > { %2773 = vmatprep.subr.bf16.mxu1 %v3066_v30 }
 0x26f   : > { %2774 = vmatpush3.bf16.msra.mxu1 %v3066_v30  ;;  %v2091_v30 = vunpack.c.l.bf16 %v3080_v29 }
 0x272   : > { %2776 = vmatmul.mubr.bf16.vlgmr.msra.gmra.mrb[0].mxu1 %v3809_v58 }
 0x273   : > { %2779 = vmatprep.mubr.bf16.mxu1 %v3813_v63 }
 0x27a   : > { %2780 = vmatmul.mubr.bf16.gmra.mrb[4].mxu1 %v1779_v34 }
 0x2dc   : > { %v2633_v39 = vpop.f32.mrb[8].mxu0 }
 0x2dd   : > { %v978_v40 = vpop.f32.mrb[9].mxu0 }
 0x2de   : > { %v2634_v41 = vpop.f32.mrb[10].mxu0 }
 0x2df   : > { %v981_v42 = vpop.f32.mrb[11].mxu0 }
 0x2e4   : > { %v2637_v44 = vpop.f32.mrb[12].mxu0 }
 0x2e5   : > { %v994_v45 = vpop.f32.mrb[13].mxu0 }
 0x2e6   : > { %v2638_v47 = vpop.f32.mrb[14].mxu0 }
 0x2e7   : > { %v997_v37 = vpop.f32.mrb[15].mxu0 }
 0x345   : > { %v2777_v43 = vpop.f32.mrb[0].mxu1 }
 0x346   : > { %v2807_v49 = vadd.f32 %v2777_v43, %v2633_v39  ;;  %v1879_v50 = vpop.f32.mrb[1].mxu1 }
 0x347   : > { %v2808_v51 = vadd.f32 %v1879_v50, %v978_v40  ;;  %v2778_v52 = vpop.f32.mrb[2].mxu1 }
 0x348   : > { %v1927_v53 = vadd.f32 %v2807_v49, %v2371_v46  ;;  %v2809_v54 = vadd.f32 %v2778_v52, %v2634_v41  ;;  %v1882_v55 = vpop.f32.mrb[3].mxu1 }
 0x349   : > { %v1925_v56 = vadd.f32 %v2808_v51, %v2371_v46  ;;  %v2810_v57 = vadd.f32 %v1882_v55, %v981_v42  ;;  %v3081_v51 = vld [vmem:[%s3687_s16 + $0x18] sm:$0xff]  }
 0x34a   : > { %v1928_v58 = vadd.f32 %v2809_v54, %v2371_v46  ;;  %v1935_v60 = vmax.f32 %v1927_v53, 0.0  ;;  %v2095_v52 = vunpack.c.l.bf16 %v3081_v51  ;;  %v2096_v54 = vunpack.c.h.bf16 %v3081_v51 }
 0x34b   : > { %v1926_v59 = vadd.f32 %v2810_v57, %v2371_v46  ;;  %v1933_v63 = vmax.f32 %v1925_v56, 0.0  ;;  %v3082_v57 = vld [vmem:[%s3687_s16 + $0x10] sm:$0xff]  }
 0x34c   : > { %v1936_v62 = vmax.f32 %v1928_v58, 0.0  ;;  %v2093_v58 = vunpack.c.l.bf16 %v3082_v57 }
 0x34d   : > { %v1934_v1 = vmax.f32 %v1926_v59, 0.0  ;;  %v2781_v2 = vpop.f32.mrb[4].mxu1 }
 0x34e   : > { %v1942_v3 = vpack.c.bf16 %v1936_v62, %v1935_v60  ;;  %v2811_v4 = vadd.f32 %v2781_v2, %v2637_v44  ;;  %v1895_v5 = vpop.f32.mrb[5].mxu1  ;;  %v2094_v60 = vunpack.c.h.bf16 %v3082_v57 }
 0x34f   : > { %v2812_v7 = vadd.f32 %v1895_v5, %v994_v45  ;;  %v2782_v8 = vpop.f32.mrb[6].mxu1  ;;  %v1941_v9 = vpack.c.bf16 %v1934_v1, %v1933_v63 }
 0x350   : > { %v1931_v10 = vadd.f32 %v2811_v4, %v2371_v46  ;;  %v2813_v11 = vadd.f32 %v2782_v8, %v2638_v47  ;;  %v1898_v12 = vpop.f32.mrb[7].mxu1 }
 0x351   : > { %v1929_v13 = vadd.f32 %v2812_v7, %v2371_v46  ;;  %v2814_v14 = vadd.f32 %v1898_v12, %v997_v37  ;;  %2799 = vmatprep.mubr.bf16.mxu0 %v1941_v9 }
 0x352   : > { %v1932_v16 = vadd.f32 %v2813_v11, %v2371_v46  ;;  %2800 = vmatmul.mubr.bf16.vlgmr.msra.gmra.mrb[16].mxu0 %v1942_v3  ;;  %v1939_v18 = vmax.f32 %v1931_v10, 0.0 }
 0x353   : > { %v1930_v17 = vadd.f32 %v2814_v14, %v2371_v46  ;;  %v1937_v20 = vmax.f32 %v1929_v13, 0.0 }
 0x354   : > { %v1940_v19 = vmax.f32 %v1932_v16, 0.0 }
 0x355   : > { %v1938_v21 = vmax.f32 %v1930_v17, 0.0 }
 0x356   : > { %v1944_v23 = vpack.c.bf16 %v1940_v19, %v1939_v18 }
 0x357   : > { %v1943_v22 = vpack.c.bf16 %v1938_v21, %v1937_v20 }
 0x359   : > { %2803 = vmatprep.mubr.bf16.mxu0 %v1943_v22 }
 0x35a   : > { %2804 = vmatmul.mubr.bf16.gmra.mrb[20].mxu0 %v1944_v23 }
 0x425   : > { %v2801_v48 = vpop.f32.mrb[16].mxu0 }
 0x426   : > { %v2059_v24 = vadd.f32 %v2801_v48, %v2372_v15  ;;  %v2050_v25 = vpop.f32.mrb[17].mxu0 }
 0x427   : > { %v2051_v0 = vadd.f32 %v2372_v15, %v2050_v25  ;;  %v2802_v6 = vpop.f32.mrb[18].mxu0 }
 0x428   : > { %v2083_v28 = vmax.f32 %v2059_v24, 0.0  ;;  %v2062_v61 = vadd.f32 %v2802_v6, %v2372_v15  ;;  %v2053_v32 = vpop.f32.mrb[19].mxu0 }
 0x429   : > { %v2081_v34 = vmax.f32 %v2051_v0, 0.0  ;;  %v2054_v35 = vadd.f32 %v2372_v15, %v2053_v32 }
 0x42a   : > { %v2084_v36 = vmax.f32 %v2062_v61, 0.0  ;;  %v2099_v40 = vadd.f32 %v2091_v30, %v2083_v28 }
 0x42b   : > { %v2097_v38 = vadd.f32 %v2089_v27, %v2081_v34  ;;  %v2082_v39 = vmax.f32 %v2054_v35, 0.0 }
 0x42c   : > { %v2100_v41 = vadd.f32 %v2092_v31, %v2084_v36 }
 0x42d   : > { %v2098_v42 = vadd.f32 %v2090_v33, %v2082_v39  ;;  %v2805_v44 = vpop.f32.mrb[20].mxu0 }
 0x42e   : > { %v2396_v45 = vpack.c.bf16 %v2100_v41, %v2099_v40  ;;  %v2075_v47 = vadd.f32 %v2805_v44, %v2372_v15  ;;  %v2066_v37 = vpop.f32.mrb[21].mxu0 }
 0x42f   : > { %v2391_v43 = vpack.c.bf16 %v2098_v42, %v2097_v38  ;;  %v2067_v46 = vadd.f32 %v2372_v15, %v2066_v37  ;;  %v2806_v49 = vpop.f32.mrb[22].mxu0 }
 0x430   : > { %2408 = vst [vmem:[%s377_s8 + $0x8] sm:$0xff] %v2396_v45   ;;  %v2087_v50 = vmax.f32 %v2075_v47, 0.0  ;;  %v2078_v53 = vadd.f32 %v2806_v49, %v2372_v15  ;;  %v2069_v55 = vpop.f32.mrb[23].mxu0 }
 0x431   : > { %2392 = vst [vmem:[%s377_s8] sm:$0xff] %v2391_v43   ;;  %v2085_v56 = vmax.f32 %v2067_v46, 0.0  ;;  %v2070_v59 = vadd.f32 %v2372_v15, %v2069_v55 }
 0x432   : > { %v2088_v62 = vmax.f32 %v2078_v53, 0.0  ;;  %v2103_v1 = vadd.f32 %v2095_v52, %v2087_v50 }
 0x433   : > { %v2086_v63 = vmax.f32 %v2070_v59, 0.0  ;;  %v2101_v3 = vadd.f32 %v2093_v58, %v2085_v56 }
 0x434   : > { %v2104_v2 = vadd.f32 %v2096_v54, %v2088_v62 }
 0x435   : > { %v2102_v4 = vadd.f32 %v2094_v60, %v2086_v63 }
 0x436   : > { %v2406_v5 = vpack.c.bf16 %v2104_v2, %v2103_v1 }
 0x437   : > { %v2401_v7 = vpack.c.bf16 %v2102_v4, %v2101_v3 }
 0x438   : > { %2410 = vst [vmem:[%s377_s8 + $0x18] sm:$0xff] %v2406_v5  }
 0x439   : > { %2409 = vst [vmem:[%s377_s8 + $0x10] sm:$0xff] %v2401_v7  }
 0x43a   : > { %3294 = shalt.err (!%p3291_p8)
}
 0x43b   : > { %s3295_s19 = scalar_lea.hbm %s3844_s12, 512  ;;  %s3299_s8 = scalar_lea.hbm %s3895_s7, 1024 }
 0x43c   : > { %p3296_p4 = scmp.ne.s32.totalorder %s3844_s12, %s3295_s19  ;;  %p3300_p0 = scmp.lt.u32.totalorder %s3844_s12, %s3895_s7 }
 0x43d   : > { %p3301_p5 = scmp.lt.u32.totalorder %s3299_s8, %s3295_s19  ;;  %p3303_p6 = scmp.lt.u32.totalorder %s3295_s19, %s3844_s12 }
 0x43e   : > { %p3297_p10 = pnand %p3296_p4, %p3917_p9 }
 0x43f   : > { %p3302_p7 = por %p3301_p5, %p3300_p0 }
 0x440   : > { %p3298_p11 = pneg %p3297_p10 }
 0x441   : > { %p3304_p12 = por %p3303_p6, %p3302_p7 }
 0x443   : > { %p3305_p13 = pnand %p3304_p12, %p3298_p11 }
 0x445   : > { %3308 = shalt.err (!%p3305_p13)
}
 0x446   : > { %s3372_s22 = smov 64   ;;  %s3373_s30 = smov 4  }
 0x447   : > { %2897 = dma.vmem_to_hbm [thread:$0]  (%p3917_p9), %s3839_s23, 512, %s3844_s12, %s2122_s13, %s3372_s22, %s3372_s22, %s3373_s30  }
 0x448 PF: > { %s2150_s14 = sand.u32 1, %s3347_s24   ;;  %p3918_p1 = scmp.ne.s32.totalorder %s3907_s21, 0 }
 0x449   : > { %p3919_p3 = scmp.ge.s32.totalorder %s3359_s27, 2  ;;  %s2151_s29 = scalar_lea.sflag [#allocation5], %s2150_s14 }
 0x44b   : > { %p2923_p2 = pnand %p3919_p3, %p3918_p1 }
 0x44d   : > { %3342 = dma.done.wait (!%p2923_p2), %s2151_s29, 512  }
 0x44e   : > { %3344 = vsyncadd (!%p2923_p2), %s2151_s29, 4294966784  ;;  %p23_p8 = scmp.ge.s32.totalorder %s3599_s11, 4   ;;  %s3920_s24 = smov %s3351_s25 }
 0x44f   : > { %s3921_s25 = smov %s3355_s26  ;;  %s3922_s26 = smov %s3610_s17 }
 0x450   : > { %s3923_s27 = smov %s3599_s11  ;;  %25 = sbr.rel (!%p23_p8) target bundleno = 8 (0x8), region = 127 }
 0x457   :  { %2156 = vsyncpa [#allocation4], 1 }
 0x458   :  { %2158 = vsyncpa [#allocation4 + $0x1], 1 }
 0x459   :  { %2159 = vsyncpa [#allocation7], 1 }
 0x45a   :  { %2160 = vsyncpa [#allocation10], 1 }
 0x45b   :  { %2161 = vsyncpa [#allocation13], 1 }
 0x45c   :  { %2162 = vsyncpa [#allocation5], 1 }
 0x45d   :  { %2164 = vsyncpa [#allocation5 + $0x1], 1 }

// kernel: a_call__.2
= control target key start
LH: loop header
LB: loop body
LE: loop exit
PB: predicated region body
PF: predicated region fallthrough
CT: control target
= control target key end

     0   :  { %s4312_s0 = inlined_call_operand.hbm [shape: bf16[2,8,2,8,256], index: 0, kind: input, shape index: {}]   ;;  %s4313_s1 = inlined_call_operand.hbm [shape: bf16[128,128], index: 1, kind: input, shape index: {}]   ;;  %s4314_s2 = inlined_call_operand.hbm [shape: f32[1,128], index: 2, kind: input, shape index: {}]   ;;  %s4315_s3 = inlined_call_operand.hbm [shape: bf16[9,128,128], index: 3, kind: input, shape index: {}]   ;;  %s4316_s4 = inlined_call_operand.hbm [shape: f32[1,128], index: 4, kind: input, shape index: {}]   ;;  %s4317_s5 = inlined_call_operand.hbm [shape: bf16[128,128], index: 5, kind: input, shape index: {}]   ;;  %s4318_s6 = inlined_call_operand.hbm [shape: f32[1,128], index: 6, kind: input, shape index: {}]   ;;  %s4319_s7 = inlined_call_operand.hbm [shape: bf16[128,128], index: 7, kind: input, shape index: {}]   ;;  %s4320_s8 = inlined_call_operand.hbm [shape: f32[1,128], index: 8, kind: input, shape index: {}]   ;;  %s4321_s9 = inlined_call_operand.hbm [shape: bf16[2,8,8,128], index: 9, kind: output, shape index: {}]  }
   0x1   :  { %4326 = sst [smem:[#allocation25_spill]] %s4313_s1 }
   0x2   :  { %4327 = sst [smem:[#allocation26_spill]] %s4321_s9 }
   0x3   :  { %14 = vsyncpa [#allocation4], 0 }
   0x4   :  { %16 = vsyncpa [#allocation4 + $0x1], 0 }
   0x5   :  { %17 = vsyncpa [#allocation7], 0 }
   0x6   :  { %18 = vsyncpa [#allocation10], 0 }
   0x7   :  { %19 = vsyncpa [#allocation13], 0 }
   0x8   :  { %20 = vsyncpa [#allocation16], 0 }
   0x9   :  { %21 = vsyncpa [#allocation5], 0 }
   0xa   :  { %23 = vsyncpa [#allocation5 + $0x1], 0  ;;  %s3801_s30 = smov 0   ;;  %s3803_s10 = smov 0  }
   0xb   :  { %s3805_s11 = smov 0   ;;  %s3807_s12 = smov 0  }
   0xc LB: > { %s3733_s13 = smov [#allocation6]   ;;  %s3822_s15 = sadd.s32 4294967295, %s3731_s12   ;;  %s3731_s12 = sphi %s3807_s12, %s4354_s12   ;;  %s3727_s11 = sphi %s3805_s11, %s4353_s11   ;;  %s3723_s10 = sphi %s3803_s10, %s4352_s10   ;;  %s3719_s30 = sphi %s3801_s30, %s4351_s30  }
   0xd   : > { %s266_s14 = sshll.u32 %s3733_s13, 4  ;;  %p2502_p0 = scmp.ge.s32.totalorder %s3731_s12, 1  ;;  %s3827_s14 = int_to_ptr.vmem [resolvable:$true] %s266_s14 }
   0xe   : > { %p4323_p1 = scmp.eq.s32.totalorder %s3822_s15, 0  ;;  %p254_p2 = scmp.lt.s32.totalorder %s3731_s12, 3 }
   0xf   : > { %s3734_s17 = smov [#allocation9]   ;;  %s3735_s20 = smov [#allocation12]  }
  0x10   : > { %p3829_p3 = pnand %p2502_p0, %p254_p2  ;;  %s290_s18 = sshll.u32 %s3734_s17, 4  ;;  %s3842_s18 = int_to_ptr.vmem [resolvable:$true] %s290_s18 }
  0x11   : > { %s314_s21 = sshll.u32 %s3735_s20, 4  ;;  %s4330_s1 = sld [smem:[#allocation25_spill]]  ;;  %s3844_s21 = int_to_ptr.vmem [resolvable:$true] %s314_s21 }
  0x12   : > { %s4328_s16 = scalar_select %p3829_p3, 1, 0 }
  0x13   : > { %p3192_p5 = pneg %p3829_p3 }
  0x15   : > { %p3838_p6 = pnand %p3192_p5, %p4323_p1 }
  0x17   : > { %s3395_s24 = scalar_lea.hbm %s4330_s1, 1024  ;;  %p3854_p8 = pneg %p3838_p6 }
  0x18   : > { %p3396_p7 = scmp.ne.s32.totalorder %s4330_s1, %s3395_s24  ;;  %p3402_p11 = scmp.lt.u32.totalorder %s3395_s24, %s4330_s1 }
  0x1a   : > { %p3398_p9 = pnand %p3854_p8, %p3396_p7 }
  0x1c   : > { %p3399_p10 = pneg %p3398_p9 }
  0x1e   : > { %p3404_p12 = pnand %p3402_p11, %p3399_p10 }
  0x20   : > { %3407 = shalt.err (!%p3404_p12)
}
  0x21   : > { %s3408_s13 = scalar_lea.vmem %s3827_s14, 1024  ;;  %p3416_p5 = scmp.lt.s32.totalorder %s3827_s14, %s3827_s14 }
  0x22   : > { %p3409_p13 = scmp.ne.s32.totalorder %s3827_s14, %s3408_s13  ;;  %p3417_p4 = scmp.lt.s32.totalorder %s3408_s13, %s3408_s13 }
  0x24   : > { %p3411_p0 = pnand %p3409_p13, %p3854_p8  ;;  %p3418_p7 = por %p3417_p4, %p3416_p5 }
  0x26   : > { %p3412_p2 = pneg %p3411_p0 }
  0x28   : > { %p3419_p9 = pnand %p3418_p7, %p3412_p2 }
  0x2a   : > { %3422 = shalt.err (!%p3419_p9)
}
  0x2b   : > { %s3736_s17 = smov 64   ;;  %s3737_s20 = smov 4  }
  0x2c   : > { %3195 = dma.hbm_to_vmem [thread:$0]  (!%p3838_p6), %s4330_s1, 1024, %s3827_s14, [#allocation7], %s3736_s17, %s3736_s17, %s3737_s20  }
  0x2d   : > { %s3423_s26 = scalar_lea.hbm %s4315_s3, 9216 }
  0x2e   : > { %p3424_p4 = scmp.ne.s32.totalorder %s4315_s3, %s3423_s26  ;;  %p3430_p12 = scmp.lt.u32.totalorder %s3423_s26, %s4315_s3 }
  0x30   : > { %p3426_p10 = pnand %p3424_p4, %p3854_p8 }
  0x32   : > { %p3427_p11 = pneg %p3426_p10 }
  0x34   : > { %p3432_p13 = pnand %p3430_p12, %p3427_p11 }
  0x36   : > { %3435 = shalt.err (!%p3432_p13)
}
  0x37   : > { %s3436_s14 = scalar_lea.vmem %s3842_s18, 9216  ;;  %p3444_p7 = scmp.lt.s32.totalorder %s3842_s18, %s3842_s18 }
  0x38   : > { %p3437_p0 = scmp.ne.s32.totalorder %s3842_s18, %s3436_s14  ;;  %p3445_p9 = scmp.lt.s32.totalorder %s3436_s14, %s3436_s14 }
  0x3a   : > { %p3439_p2 = pnand %p3437_p0, %p3854_p8  ;;  %p3446_p4 = por %p3445_p9, %p3444_p7 }
  0x3c   : > { %p3440_p5 = pneg %p3439_p2 }
  0x3e   : > { %p3447_p10 = pnand %p3446_p4, %p3440_p5 }
  0x40   : > { %3450 = shalt.err (!%p3447_p10)
}
  0x41   : > { %3201 = dma.hbm_to_vmem [thread:$0]  (!%p3838_p6), %s4315_s3, 9216, %s3842_s18, [#allocation10], %s3736_s17, %s3736_s17, %s3737_s20  }
  0x42   : > { %s3451_s25 = scalar_lea.hbm %s4317_s5, 1024 }
  0x43   : > { %p3452_p11 = scmp.ne.s32.totalorder %s4317_s5, %s3451_s25  ;;  %p3458_p0 = scmp.lt.u32.totalorder %s3451_s25, %s4317_s5 }
  0x45   : > { %p3454_p12 = pnand %p3452_p11, %p3854_p8 }
  0x47   : > { %p3455_p13 = pneg %p3454_p12 }
  0x49   : > { %p3460_p2 = pnand %p3458_p0, %p3455_p13 }
  0x4b   : > { %3463 = shalt.err (!%p3460_p2)
}
  0x4c   : > { %s3464_s18 = scalar_lea.vmem %s3844_s21, 1024  ;;  %p3472_p4 = scmp.lt.s32.totalorder %s3844_s21, %s3844_s21 }
  0x4d   : > { %p3465_p5 = scmp.ne.s32.totalorder %s3844_s21, %s3464_s18  ;;  %p3473_p10 = scmp.lt.s32.totalorder %s3464_s18, %s3464_s18 }
  0x4f   : > { %p3467_p7 = pnand %p3465_p5, %p3854_p8  ;;  %p3474_p11 = por %p3473_p10, %p3472_p4 }
  0x51   : > { %p3468_p9 = pneg %p3467_p7 }
  0x53   : > { %p3475_p12 = pnand %p3474_p11, %p3468_p9 }
  0x55   : > { %3478 = shalt.err (!%p3475_p12)
}
  0x56   : > { %3207 = dma.hbm_to_vmem [thread:$0]  (!%p3838_p6), %s4317_s5, 1024, %s3844_s21, [#allocation13], %s3736_s17, %s3736_s17, %s3737_s20  }
  0x57   : > { %s3738_s22 = smov [#allocation15]   ;;  %s3739_s24 = smov [#allocation8]  }
  0x58   : > { %s338_s23 = sshll.u32 %s3738_s22, 4  ;;  %s280_s25 = sshll.u32 %s3739_s24, 4  ;;  %s339_s23 = int_to_ptr.vmem [resolvable:$true] %s338_s23  ;;  %s281_s25 = int_to_ptr.vmem [resolvable:$true] %s280_s25 }
  0x59   : > { %s3479_s29 = scalar_lea.hbm %s4319_s7, 1024 }
  0x5a   : > { %p3480_p13 = scmp.ne.s32.totalorder %s4319_s7, %s3479_s29  ;;  %p3486_p5 = scmp.lt.u32.totalorder %s3479_s29, %s4319_s7 }
  0x5c   : > { %p3482_p0 = pnand %p3480_p13, %p3854_p8 }
  0x5e   : > { %p3483_p2 = pneg %p3482_p0 }
  0x60   : > { %p3488_p7 = pnand %p3486_p5, %p3483_p2 }
  0x62   : > { %3491 = shalt.err (!%p3488_p7)
}
  0x63   : > { %s3492_s21 = scalar_lea.vmem %s339_s23, 1024  ;;  %p3500_p11 = scmp.lt.s32.totalorder %s339_s23, %s339_s23 }
  0x64   : > { %p3493_p9 = scmp.ne.s32.totalorder %s339_s23, %s3492_s21  ;;  %p3501_p12 = scmp.lt.s32.totalorder %s3492_s21, %s3492_s21 }
  0x66   : > { %p3495_p4 = pnand %p3493_p9, %p3854_p8  ;;  %p3502_p1 = por %p3501_p12, %p3500_p11 }
  0x68   : > { %p3496_p10 = pneg %p3495_p4 }
  0x6a   : > { %p3503_p3 = pnand %p3502_p1, %p3496_p10 }
  0x6c   : > { %3506 = shalt.err (!%p3503_p3)
}
  0x6d   : > { %3213 = dma.hbm_to_vmem [thread:$0]  (!%p3838_p6), %s4319_s7, 1024, %s339_s23, [#allocation16], %s3736_s17, %s3736_s17, %s3737_s20  }
  0x6e   : > { %s3507_s26 = scalar_lea.hbm %s4314_s2, 16 }
  0x6f   : > { %p3508_p1 = scmp.ne.s32.totalorder %s4314_s2, %s3507_s26  ;;  %p3514_p0 = scmp.lt.u32.totalorder %s3507_s26, %s4314_s2 }
  0x71   : > { %p3510_p3 = pnand %p3508_p1, %p3854_p8 }
  0x73   : > { %p3511_p13 = pneg %p3510_p3 }
  0x75   : > { %p3516_p2 = pnand %p3514_p0, %p3511_p13 }
  0x77   : > { %3519 = shalt.err (!%p3516_p2)
}
  0x78   : > { %s3520_s14 = scalar_lea.vmem %s281_s25, 16  ;;  %s3527_s17 = scalar_lea.vmem %s281_s25, 32 }
  0x79   : > { %p3521_p5 = scmp.ne.s32.totalorder %s281_s25, %s3520_s14  ;;  %p3528_p4 = scmp.lt.s32.totalorder %s281_s25, %s281_s25 }
  0x7a   : > { %p3529_p10 = scmp.lt.s32.totalorder %s3527_s17, %s3520_s14 }
  0x7b   : > { %p3523_p7 = pnand %p3521_p5, %p3854_p8 }
  0x7c   : > { %p3530_p11 = por %p3529_p10, %p3528_p4 }
  0x7d   : > { %p3524_p9 = pneg %p3523_p7 }
  0x7f   : > { %p3531_p12 = pnand %p3530_p11, %p3524_p9 }
  0x81   : > { %3534 = shalt.err (!%p3531_p12)
}
  0x82   : > { %3198 = dma.hbm_to_vmem [thread:$0]  (!%p3838_p6), %s4314_s2, 16, %s281_s25, [#allocation7]  }
  0x83   : > { %s3740_s21 = smov [#allocation11]   ;;  %s3741_s9 = smov [#allocation14]  }
  0x84   : > { %s304_s1 = sshll.u32 %s3740_s21, 4  ;;  %s328_s22 = sshll.u32 %s3741_s9, 4  ;;  %s305_s1 = int_to_ptr.vmem [resolvable:$true] %s304_s1  ;;  %s329_s22 = int_to_ptr.vmem [resolvable:$true] %s328_s22 }
  0x85   : > { %s3535_s28 = scalar_lea.hbm %s4316_s4, 16 }
  0x86   : > { %p3536_p1 = scmp.ne.s32.totalorder %s4316_s4, %s3535_s28  ;;  %p3542_p0 = scmp.lt.u32.totalorder %s3535_s28, %s4316_s4 }
  0x88   : > { %p3538_p3 = pnand %p3536_p1, %p3854_p8 }
  0x8a   : > { %p3539_p13 = pneg %p3538_p3 }
  0x8c   : > { %p3544_p2 = pnand %p3542_p0, %p3539_p13 }
  0x8e   : > { %3547 = shalt.err (!%p3544_p2)
}
  0x8f   : > { %s3548_s25 = scalar_lea.vmem %s305_s1, 16  ;;  %s3555_s17 = scalar_lea.vmem %s305_s1, 32 }
  0x90   : > { %p3549_p5 = scmp.ne.s32.totalorder %s305_s1, %s3548_s25  ;;  %p3556_p4 = scmp.lt.s32.totalorder %s305_s1, %s305_s1 }
  0x91   : > { %p3557_p10 = scmp.lt.s32.totalorder %s3555_s17, %s3548_s25 }
  0x92   : > { %p3551_p7 = pnand %p3549_p5, %p3854_p8 }
  0x93   : > { %p3558_p11 = por %p3557_p10, %p3556_p4 }
  0x94   : > { %p3552_p9 = pneg %p3551_p7 }
  0x96   : > { %p3559_p12 = pnand %p3558_p11, %p3552_p9 }
  0x98   : > { %3562 = shalt.err (!%p3559_p12)
}
  0x99   : > { %3204 = dma.hbm_to_vmem [thread:$0]  (!%p3838_p6), %s4316_s4, 16, %s305_s1, [#allocation10]  }
  0x9a   : > { %s3563_s24 = scalar_lea.hbm %s4318_s6, 16 }
  0x9b   : > { %p3564_p1 = scmp.ne.s32.totalorder %s4318_s6, %s3563_s24  ;;  %p3570_p0 = scmp.lt.u32.totalorder %s3563_s24, %s4318_s6 }
  0x9d   : > { %p3566_p3 = pnand %p3564_p1, %p3854_p8 }
  0x9f   : > { %p3567_p13 = pneg %p3566_p3 }
  0xa1   : > { %p3572_p2 = pnand %p3570_p0, %p3567_p13 }
  0xa3   : > { %3575 = shalt.err (!%p3572_p2)
}
  0xa4   : > { %s3576_s18 = scalar_lea.vmem %s329_s22, 16  ;;  %s3583_s1 = scalar_lea.vmem %s329_s22, 32 }
  0xa5   : > { %p3577_p5 = scmp.ne.s32.totalorder %s329_s22, %s3576_s18  ;;  %p3584_p4 = scmp.lt.s32.totalorder %s329_s22, %s329_s22 }
  0xa6   : > { %p3585_p10 = scmp.lt.s32.totalorder %s3583_s1, %s3576_s18 }
  0xa7   : > { %p3579_p7 = pnand %p3577_p5, %p3854_p8 }
  0xa8   : > { %p3586_p11 = por %p3585_p10, %p3584_p4 }
  0xa9   : > { %p3580_p9 = pneg %p3579_p7 }
  0xab   : > { %p3587_p12 = pnand %p3586_p11, %p3580_p9 }
  0xad   : > { %3590 = shalt.err (!%p3587_p12)
}
  0xae   : > { %3210 = dma.hbm_to_vmem [thread:$0]  (!%p3838_p6), %s4318_s6, 16, %s329_s22, [#allocation13]  }
  0xaf   : > { %s3742_s17 = smov [#allocation17]   ;;  %s3591_s9 = scalar_lea.hbm %s4320_s8, 16 }
  0xb0   : > { %s352_s20 = sshll.u32 %s3742_s17, 4  ;;  %p3592_p1 = scmp.ne.s32.totalorder %s4320_s8, %s3591_s9  ;;  %s353_s20 = int_to_ptr.vmem [resolvable:$true] %s352_s20 }
  0xb1   : > { %p3598_p0 = scmp.lt.u32.totalorder %s3591_s9, %s4320_s8 }
  0xb2   : > { %p3594_p3 = pnand %p3592_p1, %p3854_p8 }
  0xb4   : > { %p3595_p13 = pneg %p3594_p3 }
  0xb6   : > { %p3600_p2 = pnand %p3598_p0, %p3595_p13 }
  0xb8   : > { %3603 = shalt.err (!%p3600_p2)
}
  0xb9   : > { %s3604_s22 = scalar_lea.vmem %s353_s20, 16  ;;  %s3611_s13 = scalar_lea.vmem %s353_s20, 32 }
  0xba   : > { %p3605_p5 = scmp.ne.s32.totalorder %s353_s20, %s3604_s22  ;;  %p3612_p4 = scmp.lt.s32.totalorder %s353_s20, %s353_s20 }
  0xbb   : > { %p3613_p10 = scmp.lt.s32.totalorder %s3611_s13, %s3604_s22 }
  0xbc   : > { %p3607_p7 = pnand %p3605_p5, %p3854_p8 }
  0xbd   : > { %p3614_p11 = por %p3613_p10, %p3612_p4 }
  0xbe   : > { %p3608_p9 = pneg %p3607_p7 }
  0xc0   : > { %p3615_p12 = pnand %p3614_p11, %p3608_p9 }
  0xc2   : > { %3618 = shalt.err (!%p3615_p12)
}
  0xc3   : > { %3216 = dma.hbm_to_vmem [thread:$0]  (!%p3838_p6), %s4320_s8, 16, %s353_s20, [#allocation16]  }
  0xc4   : > { %s2501_s27 = sadd.s32 4294967294, %s3731_s12   ;;  %s4025_s19 = sadd.s32 1, %s3731_s12  }
  0xc5   : > { %s33_s14 = ssub.s32 %s3731_s12, %s4025_s19  ;;  %s36_s25 = sadd.s32 1, %s3727_s11 }
  0xc6   : > { %p34_p8 = scmp.eq.s32.totalorder %s33_s14, 0  ;;  %p43_p1 = scmp.ne.s32.totalorder %s3727_s11, %s3723_s10 }
  0xc7   : > { %p44_p3 = scmp.eq.s32.totalorder %s3731_s12, 0  ;;  %p49_p13 = scmp.ne.s32.totalorder %s3723_s10, %s3719_s30 }
  0xc8   : > { %s4036_s17 = scalar_select %p34_p8, %s3727_s11, %s36_s25  }
  0xc9   : > { %p4038_p0 = por %p44_p3, %p43_p1  ;;  %p4333_p2 = scmp.eq.s32.totalorder %s3822_s15, 0 }
  0xca   : > { %p241_p5 = scmp.eq.s32.totalorder %s3822_s15, 1  ;;  %p247_p7 = scmp.eq.s32.totalorder %s2501_s27, 1 }
  0xcb   : > { %p4044_p6 = por %p4333_p2, %p49_p13  ;;  %p3233_p9 = scmp.lt.s32.totalorder %s3731_s12, 2 }
  0xcc   : > { %s363_s21 = sand.u32 1, %s3727_s11   ;;  %p4051_p4 = por %p241_p5, %p43_p1 }
  0xcd   : > { %p4055_p10 = por %p247_p7, %p49_p13  ;;  %s2512_s26 = sshll.u32 %s363_s21, 6 }
  0xce   : > { %s4335_s9 = scalar_select %p4051_p4, 1, 0 }
  0xcf   : > { %s4336_s24 = scalar_select %p4055_p10, 1, 0 }
  0xd0   : > { %s2635_s28 = sshll.u32 %s3731_s12, 11  ;;  %s367_s18 = scalar_lea.vmem [#allocation3], %s2512_s26 }
  0xd1   : > { %s4063_s13 = scalar_lea.hbm %s4312_s0, %s2635_s28  ;;  %s374_s1 = sshll.u32 %s367_s18, 4  ;;  %s4065_s1 = int_to_ptr.vmem [resolvable:$true] %s374_s1 }
  0xd2   : > { %p4069_p11 = pnand %p3233_p9, %p4038_p0  ;;  %s4073_s14 = scalar_lea.sflag [#allocation4], %s363_s21 }
  0xd3   : > { %s3619_s25 = scalar_lea.hbm %s4063_s13, 1024  ;;  %s3624_s23 = scalar_lea.hbm %s4312_s0, 4096 }
  0xd4   : > { %p3620_p12 = scmp.ne.s32.totalorder %s4063_s13, %s3619_s25  ;;  %p3621_p8 = pneg %p4069_p11 }
  0xd5   : > { %p3625_p13 = scmp.lt.u32.totalorder %s4063_s13, %s4312_s0  ;;  %p3626_p0 = scmp.lt.u32.totalorder %s3624_s23, %s3619_s25 }
  0xd6   : > { %p3622_p1 = pnand %p3621_p8, %p3620_p12  ;;  %p3628_p5 = scmp.lt.u32.totalorder %s3619_s25, %s4063_s13 }
  0xd7   : > { %p3627_p2 = por %p3626_p0, %p3625_p13 }
  0xd8   : > { %p3623_p3 = pneg %p3622_p1 }
  0xd9   : > { %p3629_p7 = por %p3628_p5, %p3627_p2 }
  0xdb   : > { %p3630_p9 = pnand %p3629_p7, %p3623_p3 }
  0xdd   : > { %3633 = shalt.err (!%p3630_p9)
}
  0xde   : > { %s3634_s21 = scalar_lea.vmem %s4065_s1, 1024  ;;  %s3743_s18 = smov [#allocation3]  }
  0xdf   : > { %p3635_p12 = scmp.ne.s32.totalorder %s4065_s1, %s3634_s21  ;;  %s3639_s26 = sshll.u32 %s3743_s18, 4  ;;  %s3640_s26 = int_to_ptr.vmem [resolvable:$false] %s3639_s26 }
  0xe0   : > { %s3641_s28 = scalar_lea.vmem %s3640_s26, 2048  ;;  %p3642_p4 = scmp.lt.s32.totalorder %s4065_s1, %s3640_s26 }
  0xe1   : > { %p3637_p1 = pnand %p3635_p12, %p3621_p8  ;;  %p3643_p13 = scmp.lt.s32.totalorder %s3641_s28, %s3634_s21 }
  0xe3   : > { %p3638_p10 = pneg %p3637_p1  ;;  %p3644_p0 = por %p3643_p13, %p3642_p4 }
  0xe5   : > { %p3645_p2 = pnand %p3644_p0, %p3638_p10 }
  0xe7   : > { %3648 = shalt.err (!%p3645_p2)
}
  0xe8   : > { %s3744_s25 = smov 256   ;;  %s3745_s23 = smov 128  }
  0xe9   : > { %s3746_s29 = smov 8   ;;  %p4338_p8 = scmp.ne.s32.totalorder %s4328_s16, 0 }
  0xea   : > { %3220 = dma.hbm_to_vmem [thread:$0]  (!%p4069_p11), %s4063_s13, 1024, %s4065_s1, %s4073_s14, %s3744_s25, %s3745_s23, %s3746_s29  }
  0xeb   : > { %386 = sbr.rel (%p4338_p8) target bundleno = 1181 (0x49d), region = 56  ;;  %s4104_s22 = sand.u32 (!%p4338_p8), 1, %s3723_s10  }
  0xec   : > { %s2516_s21 = sshll.u32 (!%p4338_p8), %s4104_s22, 6  ;;  %s389_s18 = scalar_lea.sflag (!%p4338_p8), [#allocation4], %s4104_s22 }
  0xed   : > { %s4108_s26 = scalar_lea.vmem (!%p4338_p8), [#allocation3], %s2516_s21 }
  0xf2   : > { %3694 = dma.done.wait (%p4044_p6), %s389_s18, 1024  }
  0xf3   : > { %3696 = vsyncadd (%p4044_p6), %s389_s18, 4294966272  ;;  %p4339_p4 = scmp.eq.s32.totalorder %s3822_s15, 0 }
  0xf5   : > { %3698 = dma.done.wait (%p4339_p4), [#allocation7], 1040   ;;  %p4340_p10 = pmov %p4339_p4 }
  0xf6   : > { %p4341_p11 = pmov %p4339_p4 }
  0xf7   : > { %3700 = vsyncadd (%p4340_p10), [#allocation7], 4294966256 }
  0xf8   : > { %3702 = dma.done.wait (%p4341_p11), [#allocation10], 9232   ;;  %p4342_p3 = pmov %p4339_p4 }
  0xfa   : > { %3704 = vsyncadd (%p4342_p3), [#allocation10], 4294958064  ;;  %p4343_p5 = pmov %p4342_p3 }
  0xfb   : > { %p4344_p7 = pmov %p4342_p3 }
  0xfc   : > { %3706 = dma.done.wait (%p4343_p5), [#allocation13], 1040  }
  0xfd   : > { %3708 = vsyncadd (%p4344_p7), [#allocation13], 4294966256  ;;  %p4345_p6 = pmov %p4342_p3 }
  0xfe   : > { %p4346_p9 = pmov %p4342_p3 }
  0xff   : > { %3710 = dma.done.wait (%p4345_p6), [#allocation16], 1040  }
 0x100   : > { %3712 = vsyncadd (%p4346_p9), [#allocation16], 4294966256  ;;  %v3291_v0 = vld [vmem:[#allocation6] sm:$0xff]   ;;  %v3292_v1 = vld [vmem:[#allocation6 + $0x8] sm:$0xff]   ;;  %v3747_v22 = vmov 0.0   ;;  %s2525_s16 = sshll.u32 %s4104_s22, 5 }
 0x101   : > { %2804 = vmatprep.subr.bf16.mxu0 %v3291_v0  ;;  %v3293_v2 = vld [vmem:[#allocation6 + $0x10] sm:$0xff]   ;;  %v3294_v3 = vld [vmem:[#allocation6 + $0x18] sm:$0xff]   ;;  %v3299_v4 = vld [vmem:[%s4108_s26] ss:$8 sps:$4 sm:$0xff]   ;;  %642 = vst [vmem:[#allocation2 + $0x30] sm:$0xff] %v3747_v22  ;;  %s458_s20 = scalar_lea.vmem [#allocation18], %s2525_s16 }
 0x102   : > { %2805 = vmatpush3.bf16.msra.mxu0 %v3291_v0  ;;  %2820 = vmatprep.mubr.bf16.mxu0 %v3299_v4  ;;  %v3295_v5 = vld [vmem:[#allocation6 + $0x20] sm:$0xff]   ;;  %v3306_v7 = vld [vmem:[#allocation9 + $0xc8] sm:$0xff]   ;;  %v3308_v9 = vld [vmem:[#allocation9 + $0xd0] sm:$0xff]   ;;  %643 = vst [vmem:[#allocation2 + $0x38] sm:$0x3] %v3747_v22  ;;  %s2352_s13 = sshll.u32 %s458_s20, 4  ;;  %s4263_s13 = int_to_ptr.vmem [resolvable:$true] %s2352_s13 }
 0x103   : > { %2806 = vmatprep.subr.bf16.mxu0 %v3292_v1  ;;  %v3304_v6 = vld [vmem:[#allocation9 + $0xc0] sm:$0xff]   ;;  %v3297_v10 = vld [vmem:[#allocation6 + $0x30] sm:$0xff]   ;;  %v3310_v11 = vld [vmem:[#allocation9 + $0xd8] sm:$0xff]   ;;  %636 = vst [vmem:[#allocation2] sm:$0xff] %v3747_v22  ;;  %s2636_s1 = sshll.u32 %s3822_s15, 9  ;;  %s4347_s28 = sld [smem:[#allocation26_spill]] }
 0x104   : > { %2900 = vmatprep.subr.bf16.mxu1 %v3304_v6  ;;  %v3296_v8 = vld [vmem:[#allocation6 + $0x28] sm:$0xff]   ;;  %v3298_v12 = vld [vmem:[#allocation6 + $0x38] sm:$0xff]   ;;  %637 = vst [vmem:[#allocation2 + $0x8] sm:$0x3] %v3747_v22  ;;  %638 = vst [vmem:[#allocation2 + $0x10] sm:$0xff] %v3747_v22  ;;  %s2339_s23 = scalar_lea.sflag [#allocation5], %s4104_s22 }
 0x105   : > { %2901 = vmatpush3.bf16.msra.mxu1 %v3304_v6  ;;  %v3303_v13 = vld [vmem:[#allocation9 + $0x40] sm:$0xff]   ;;  %v3300_v14 = vld [vmem:[%s4108_s26 + $0x10] ss:$8 sps:$4 sm:$0xff]   ;;  %639 = vst [vmem:[#allocation2 + $0x18] sm:$0x3] %v3747_v22  ;;  %640 = vst [vmem:[#allocation2 + $0x20] sm:$0xff] %v3747_v22 }
 0x106   : > { %2807 = vmatpush3.bf16.msra.mxu0 %v3292_v1  ;;  %2902 = vmatprep.subr.bf16.mxu1 %v3306_v7  ;;  %v3301_v15 = vld [vmem:[%s4108_s26 + $0x20] ss:$8 sps:$4 sm:$0xff]   ;;  %v3307_v17 = vld [vmem:[#allocation9 + $0x50] sm:$0xff]   ;;  %641 = vst [vmem:[#allocation2 + $0x28] sm:$0x3] %v3747_v22  ;;  %644 = vst [vmem:[#allocation2 + $0x40] sm:$0xff] %v3747_v22 }
 0x107   : > { %2808 = vmatprep.subr.bf16.mxu0 %v3293_v2  ;;  %v3305_v16 = vld [vmem:[#allocation9 + $0x48] sm:$0xff]   ;;  %v3309_v19 = vld [vmem:[#allocation9 + $0x58] sm:$0xff]   ;;  %v3311_v20 = vld [vmem:[#allocation9 + $0x60] sm:$0xff]   ;;  %645 = vst [vmem:[#allocation2 + $0x48] sm:$0x3] %v3747_v22  ;;  %s3649_s29 = scalar_lea.vmem %s4263_s13, 512 }
 0x108   : > { %v3302_v18 = vld [vmem:[%s4108_s26 + $0x30] ss:$8 sps:$4 sm:$0xff]   ;;  %646 = vst [vmem:[#allocation2 + $0x50] sm:$0xff] %v3747_v22  ;;  %647 = vst [vmem:[#allocation2 + $0x58] sm:$0x3] %v3747_v22  ;;  %v3312_v24 = vld [vmem:[#allocation9 + $0xe0] sm:$0xff]   ;;  %p3650_p12 = scmp.ne.s32.totalorder %s4263_s13, %s3649_s29 }
 0x109   : > { %2903 = vmatpush3.bf16.msra.mxu1 %v3306_v7  ;;  %v3313_v21 = vld [vmem:[#allocation9 + $0x68] sm:$0xff]   ;;  %648 = vst [vmem:[#allocation2 + $0x60] sm:$0xff] %v3747_v22  ;;  %649 = vst [vmem:[#allocation2 + $0x68] sm:$0x3] %v3747_v22  ;;  %v3315_v23 = vld [vmem:[#allocation9 + $0x70] sm:$0xff]   ;;  %s4268_s25 = scalar_lea.hbm %s4347_s28, %s2636_s1  ;;  %p4348_p1 = scmp.ne.s32.totalorder %s4335_s9, 0 }
 0x10a   : > { %2809 = vmatpush3.bf16.msra.mxu0 %v3293_v2  ;;  %2904 = vmatprep.subr.bf16.mxu1 %v3308_v9  ;;  %650 = vst [vmem:[#allocation2 + $0x70] sm:$0xff] %v3747_v22  ;;  %651 = vst [vmem:[#allocation2 + $0x78] sm:$0x3] %v3747_v22  ;;  %v3317_v25 = vld [vmem:[#allocation9 + $0x78] sm:$0xff]   ;;  %v3314_v26 = vld [vmem:[#allocation9 + $0xe8] sm:$0xff]   ;;  %s3748_s15 = smov [#allocation18]  }
 0x10b   : > { %2810 = vmatprep.subr.bf16.mxu0 %v3294_v3  ;;  %652 = vst [vmem:[#allocation2 + $0x80] sm:$0xff] %v3747_v22  ;;  %653 = vst [vmem:[#allocation2 + $0x88] sm:$0x3] %v3747_v22  ;;  %v3319_v27 = vld [vmem:[#allocation9] sm:$0xff]   ;;  %v3316_v28 = vld [vmem:[#allocation9 + $0xf0] sm:$0xff]   ;;  %p3651_p13 = pnand %p3650_p12, %p4348_p1  ;;  %s3653_s21 = sshll.u32 %s3748_s15, 4  ;;  %s3654_s21 = int_to_ptr.vmem [resolvable:$false] %s3653_s21 }
 0x10c   : > { %654 = vst [vmem:[#allocation2 + $0x90] sm:$0xff] %v3747_v22  ;;  %655 = vst [vmem:[#allocation2 + $0x98] sm:$0x3] %v3747_v22  ;;  %v3318_v29 = vld [vmem:[#allocation9 + $0xf8] sm:$0xff]   ;;  %v4154_v30 = vld [vmem:[#allocation9 + $0x100] sm:$0xff]   ;;  %s3655_s18 = scalar_lea.vmem %s3654_s21, 1024  ;;  %p3656_p2 = scmp.lt.s32.totalorder %s4263_s13, %s3654_s21 }
 0x10d   : > { %2905 = vmatpush3.bf16.msra.mxu1 %v3308_v9  ;;  %v2526_v31 = vld [vmem:[#allocation8] ss:$0 sm:$0xff]  ;;  %v693_v40 = vld [vmem:[#allocation2 + $0x1] sm:$0xff]  ;;  %v3321_v49 = vld [vmem:[#allocation9 + $0x8] sm:$0xff]   ;;  %p3652_p0 = pneg %p3651_p13  ;;  %p3657_p8 = scmp.lt.s32.totalorder %s3655_s18, %s3649_s29 }
 0x10e   : > { %2811 = vmatpush3.bf16.msra.mxu0 %v3294_v3  ;;  %2906 = vmatprep.subr.bf16.mxu1 %v3310_v11  ;;  %v3323_v60 = vld [vmem:[#allocation9 + $0x10] sm:$0xff]   ;;  %v3325_v9 = vld [vmem:[#allocation9 + $0x18] sm:$0xff]  }
 0x10f   : > { %2812 = vmatprep.subr.bf16.mxu0 %v3295_v5  ;;  %p3658_p4 = por %p3657_p8, %p3656_p2 }
 0x111   : > { %2907 = vmatpush3.bf16.msra.mxu1 %v3310_v11  ;;  %p3659_p10 = pnand %p3658_p4, %p3652_p0 }
 0x112   : > { %2813 = vmatpush3.bf16.msra.mxu0 %v3295_v5  ;;  %2908 = vmatprep.subr.bf16.mxu1 %v3312_v24 }
 0x113   : > { %2814 = vmatprep.subr.bf16.mxu0 %v3296_v8 }
 0x115   : > { %2909 = vmatpush3.bf16.msra.mxu1 %v3312_v24  ;;  %v3328_v24 = vld [vmem:[#allocation9 + $0x120] sm:$0xff]  }
 0x116   : > { %2815 = vmatpush3.bf16.msra.mxu0 %v3296_v8  ;;  %2910 = vmatprep.subr.bf16.mxu1 %v3314_v26  ;;  %v3322_v8 = vld [vmem:[#allocation9 + $0x108] sm:$0xff]  }
 0x117   : > { %2816 = vmatprep.subr.bf16.mxu0 %v3297_v10 }
 0x119   : > { %2911 = vmatpush3.bf16.msra.mxu1 %v3314_v26  ;;  %v3330_v26 = vld [vmem:[#allocation9 + $0x128] sm:$0xff]  }
 0x11a   : > { %2817 = vmatpush3.bf16.msra.mxu0 %v3297_v10  ;;  %2912 = vmatprep.subr.bf16.mxu1 %v3316_v28 }
 0x11b   : > { %2818 = vmatprep.subr.bf16.mxu0 %v3298_v12 }
 0x11d   : > { %2913 = vmatpush3.bf16.msra.mxu1 %v3316_v28  ;;  %v3332_v28 = vld [vmem:[#allocation9 + $0x130] sm:$0xff]  }
 0x11e   : > { %2819 = vmatpush3.bf16.msra.mxu0 %v3298_v12  ;;  %2914 = vmatprep.subr.bf16.mxu1 %v3318_v29 }
 0x11f   : > { %2828 = vmatprep.subr.bf16.mxu0 %v3303_v13 }
 0x121   : > { %2821 = vmatmul.mubr.bf16.vlgmr.msra.gmra.mrb[0].mxu0 %v3300_v14  ;;  %2915 = vmatpush3.bf16.msra.mxu1 %v3318_v29  ;;  %v3324_v14 = vld [vmem:[#allocation9 + $0x110] sm:$0xff]  }
 0x122   : > { %2824 = vmatprep.mubr.bf16.mxu0 %v3301_v15  ;;  %2829 = vmatpush3.bf16.msra.mxu0 %v3303_v13  ;;  %v3327_v13 = vld [vmem:[#allocation9 + $0x20] sm:$0xff]  }
 0x123   : > { %2830 = vmatprep.subr.bf16.mxu0 %v3305_v16  ;;  %2924 = vmatprep.subr.bf16.mxu1 %v4154_v30 }
 0x126   : > { %2831 = vmatpush3.bf16.msra.mxu0 %v3305_v16 }
 0x127   : > { %2832 = vmatprep.subr.bf16.mxu0 %v3307_v17 }
 0x129   : > { %2825 = vmatmul.mubr.bf16.gmra.mrb[4].mxu0 %v3302_v18 }
 0x12a   : > { %2833 = vmatpush3.bf16.msra.mxu0 %v3307_v17 }
 0x12b   : > { %2834 = vmatprep.subr.bf16.mxu0 %v3309_v19 }
 0x12e   : > { %2835 = vmatpush3.bf16.msra.mxu0 %v3309_v19 }
 0x12f   : > { %2836 = vmatprep.subr.bf16.mxu0 %v3311_v20 }
 0x132   : > { %2837 = vmatpush3.bf16.msra.mxu0 %v3311_v20  ;;  %v3326_v20 = vld [vmem:[#allocation9 + $0x118] sm:$0xff]  }
 0x133   : > { %2838 = vmatprep.subr.bf16.mxu0 %v3313_v21 }
 0x136   : > { %2839 = vmatpush3.bf16.msra.mxu0 %v3313_v21  ;;  %v3329_v21 = vld [vmem:[#allocation9 + $0x28] sm:$0xff]  }
 0x137   : > { %2840 = vmatprep.subr.bf16.mxu0 %v3315_v23 }
 0x13a   : > { %2841 = vmatpush3.bf16.msra.mxu0 %v3315_v23  ;;  %v3331_v23 = vld [vmem:[#allocation9 + $0x30] sm:$0xff]  }
 0x13b   : > { %2842 = vmatprep.subr.bf16.mxu0 %v3317_v25 }
 0x13e   : > { %2843 = vmatpush3.bf16.msra.mxu0 %v3317_v25  ;;  %v3333_v25 = vld [vmem:[#allocation9 + $0x38] sm:$0xff]  }
 0x13f   : > { %2852 = vmatprep.subr.bf16.mxu0 %v3319_v27 }
 0x1f4   : > { %v2822_v32 = vpop.f32.mrb[0].mxu0 }
 0x1f5   : > { %v606_v33 = vadd.f32 %v2822_v32, %v2526_v31  ;;  %v597_v34 = vpop.f32.mrb[1].mxu0 }
 0x1f6   : > { %v598_v35 = vadd.f32 %v2526_v31, %v597_v34  ;;  %v2823_v36 = vpop.f32.mrb[2].mxu0  ;;  %v3336_v34 = vld [vmem:[#allocation9 + $0x140] sm:$0xff]  }
 0x1f7   : > { %v4157_v37 = vmax.f32 %v606_v33, 0.0  ;;  %v609_v38 = vadd.f32 %v2823_v36, %v2526_v31  ;;  %v600_v39 = vpop.f32.mrb[3].mxu0  ;;  %v3339_v33 = vld [vmem:[#allocation9 + $0x90] sm:$0xff]   ;;  %v948_v36 = vld [vmem:[#allocation2 + $0x2] sm:$0xff] }
 0x1f8   : > { %v4159_v41 = vmax.f32 %v598_v35, 0.0  ;;  %v601_v42 = vadd.f32 %v2526_v31, %v600_v39  ;;  %v3338_v39 = vld [vmem:[#allocation9 + $0x148] sm:$0xff]  }
 0x1f9   : > { %659 = vst [vmem:[#allocation2 + $0x31] sm:$0xff] %v4157_v37  ;;  %v4162_v43 = vmax.f32 %v609_v38, 0.0 }
 0x1fa   : > { %657 = vst [vmem:[#allocation2 + $0x11] sm:$0xff] %v4159_v41  ;;  %v4165_v44 = vmax.f32 %v601_v42, 0.0  ;;  %v701_v45 = vpack.c.bf16 %v4159_v41, %v693_v40  ;;  %v3341_v40 = vld [vmem:[#allocation9 + $0x98] sm:$0xff]   ;;  %v3343_v42 = vld [vmem:[#allocation9 + $0xa0] sm:$0xff]  }
 0x1fb   : > { %660 = vst [vmem:[#allocation2 + $0x41] sm:$0xff] %v4162_v43  ;;  %v1257_v46 = vpack.c.bf16 %v4162_v43, %v4157_v37 }
 0x1fc   : > { %658 = vst [vmem:[#allocation2 + $0x21] sm:$0xff] %v4165_v44  ;;  %v2826_v47 = vpop.f32.mrb[4].mxu0  ;;  %2844 = vmatprep.mubr.bf16.mxu0 %v701_v45  ;;  %v4174_v48 = vpack.c.bf16 %v4157_v37, %v4165_v44  ;;  %v1256_v50 = vpack.c.bf16 %v4165_v44, %v4159_v41  ;;  %v3340_v44 = vld [vmem:[#allocation9 + $0x150] sm:$0xff]   ;;  %v3345_v37 = vld [vmem:[#allocation9 + $0xa8] sm:$0xff]  }
 0x1fd   : > { %v622_v51 = vadd.f32 %v2826_v47, %v2526_v31  ;;  %v613_v52 = vpop.f32.mrb[5].mxu0  ;;  %v3342_v47 = vld [vmem:[#allocation9 + $0x158] sm:$0xff]  }
 0x1fe   : > { %v614_v53 = vadd.f32 %v2526_v31, %v613_v52  ;;  %v2827_v54 = vpop.f32.mrb[6].mxu0  ;;  %2845 = vmatmul.mubr.bf16.vlgmr.msra.gmra.mrb[8].mxu0 %v4174_v48  ;;  %v3348_v52 = vld [vmem:[#allocation9 + $0x170] sm:$0xff]  }
 0x1ff   : > { %v4179_v55 = vmax.f32 %v622_v51, 0.0  ;;  %v625_v56 = vadd.f32 %v2827_v54, %v2526_v31  ;;  %v616_v57 = vpop.f32.mrb[7].mxu0  ;;  %2853 = vmatpush3.bf16.msra.mxu0 %v3319_v27  ;;  %v3335_v27 = vld [vmem:[#allocation9 + $0x80] sm:$0xff]   ;;  %v3346_v51 = vld [vmem:[#allocation9 + $0x168] sm:$0xff]  }
 0x200   : > { %v4181_v58 = vmax.f32 %v614_v53, 0.0  ;;  %v617_v59 = vadd.f32 %v2526_v31, %v616_v57  ;;  %2854 = vmatprep.subr.bf16.mxu0 %v3321_v49  ;;  %v1100_v5 = vld [vmem:[#allocation2 + $0x30] sm:$0xff]  ;;  %v3334_v31 = vld [vmem:[#allocation9 + $0x138] sm:$0xff]  }
 0x201   : > { %663 = vst [vmem:[#allocation2 + $0x71] sm:$0xff] %v4179_v55  ;;  %v4184_v61 = vmax.f32 %v625_v56, 0.0  ;;  %v1098_v1 = vld [vmem:[#allocation2 + $0x10] sm:$0xff]  ;;  %v3350_v57 = vld [vmem:[#allocation9 + $0x178] sm:$0xff]  }
 0x202   : > { %661 = vst [vmem:[#allocation2 + $0x51] sm:$0xff] %v4181_v58  ;;  %v4187_v62 = vmax.f32 %v617_v59, 0.0  ;;  %v4189_v63 = vld [vmem:[#allocation2 + $0x40] sm:$0xff]  ;;  %v4193_v0 = vpack.c.bf16 %v4181_v58, %v4162_v43  ;;  %v673_v11 = vpack.c.bf16 %v1098_v1, %v3747_v22  ;;  %v949_v38 = vld [vmem:[#allocation2 + $0x12] sm:$0xff] }
 0x203   : > { %664 = vst [vmem:[#allocation2 + $0x81] sm:$0xff] %v4184_v61  ;;  %v1099_v2 = vld [vmem:[#allocation2 + $0x20] sm:$0xff]  ;;  %2855 = vmatpush3.bf16.msra.mxu0 %v3321_v49  ;;  %v1259_v3 = vpack.c.bf16 %v4184_v61, %v4179_v55  ;;  %v1107_v7 = vpack.c.bf16 %v4189_v63, %v1100_v5  ;;  %v956_v41 = vpack.c.bf16 %v949_v38, %v948_v36  ;;  %v951_v54 = vld [vmem:[#allocation2 + $0x32] sm:$0xff] }
 0x204   : > { %662 = vst [vmem:[#allocation2 + $0x61] sm:$0xff] %v4187_v62  ;;  %v1106_v4 = vpack.c.bf16 %v1099_v2, %v1098_v1  ;;  %2848 = vmatprep.mubr.bf16.mxu0 %v4193_v0  ;;  %2856 = vmatprep.subr.bf16.mxu0 %v3323_v60  ;;  %v4202_v6 = vpack.c.bf16 %v4179_v55, %v4187_v62  ;;  %v1399_v45 = vld [vmem:[#allocation2 + $0x22] sm:$0xff]  ;;  %v3381_v36 = vld [vmem:[#allocation12 + $0x30] sm:$0xff]  }
 0x205   : > { %v1258_v10 = vpack.c.bf16 %v4187_v62, %v4181_v58  ;;  %v4213_v29 = vpack.c.bf16 %v1100_v5, %v1099_v2  ;;  %v1406_v43 = vpack.c.bf16 %v1399_v45, %v949_v38  ;;  %v3344_v49 = vld [vmem:[#allocation9 + $0x160] sm:$0xff]   ;;  %v4232_v55 = vpack.c.bf16 %v951_v54, %v1399_v45  ;;  %v3352_v2 = vld [vmem:[#allocation9 + $0x188] sm:$0xff]  }
 0x206   : > { %2916 = vmatprep.mubr.bf16.mxu1 %v1106_v4  ;;  %2849 = vmatmul.mubr.bf16.gmra.mrb[12].mxu0 %v4202_v6  ;;  %v952_v56 = vld [vmem:[#allocation2 + $0x42] sm:$0xff]  ;;  %v3353_v4 = vld [vmem:[#allocation9 + $0x190] sm:$0xff]  }
 0x207   : > { %2917 = vmatmul.mubr.bf16.vlgmr.msra.gmra.mrb[0].mxu1 %v1107_v7  ;;  %2857 = vmatpush3.bf16.msra.mxu0 %v3323_v60  ;;  %v3351_v59 = vld [vmem:[#allocation9 + $0x180] sm:$0xff]   ;;  %v1407_v1 = vpack.c.bf16 %v952_v56, %v951_v54 }
 0x208   : > { %2925 = vmatpush3.bf16.msra.mxu1 %v4154_v30  ;;  %2868 = vmatprep.mubr.bf16.mxu0 %v673_v11  ;;  %v1104_v12 = vld [vmem:[#allocation2 + $0x70] sm:$0xff]  ;;  %v3382_v38 = vld [vmem:[#allocation12 + $0x38] sm:$0xff]  }
 0x209   : > { %2926 = vmatprep.subr.bf16.mxu1 %v3322_v8  ;;  %2858 = vmatprep.subr.bf16.mxu0 %v3325_v9  ;;  %v1102_v16 = vld [vmem:[#allocation2 + $0x50] sm:$0xff] }
 0x20a   : > { %v4210_v15 = vld [vmem:[#allocation2 + $0x80] sm:$0xff]  ;;  %v3337_v30 = vld [vmem:[#allocation9 + $0x88] sm:$0xff]   ;;  %v4216_v32 = vpack.c.bf16 %v1102_v16, %v4189_v63  ;;  %v953_v53 = vld [vmem:[#allocation2 + $0x52] sm:$0xff] }
 0x20b   : > { %v1103_v17 = vld [vmem:[#allocation2 + $0x60] sm:$0xff]  ;;  %v1109_v18 = vpack.c.bf16 %v4210_v15, %v1104_v12  ;;  %2859 = vmatpush3.bf16.msra.mxu0 %v3325_v9  ;;  %v4234_v58 = vpack.c.bf16 %v953_v53, %v952_v56  ;;  %v955_v62 = vld [vmem:[#allocation2 + $0x72] sm:$0xff] }
 0x20c   : > { %2927 = vmatpush3.bf16.msra.mxu1 %v3322_v8  ;;  %v1108_v19 = vpack.c.bf16 %v1103_v17, %v1102_v16  ;;  %2860 = vmatprep.subr.bf16.mxu0 %v3327_v13  ;;  %v4220_v35 = vpack.c.bf16 %v1104_v12, %v1103_v17  ;;  %v1403_v60 = vld [vmem:[#allocation2 + $0x62] sm:$0xff]  ;;  %v3354_v8 = vld [vmem:[#allocation9 + $0x198] sm:$0xff]   ;;  %v3357_v11 = vld [vmem:[#allocation9 + $0x1b0] sm:$0xff]   ;;  %v1560_v17 = vpack.c.bf16 %v3747_v22, %v4210_v15 }
 0x20d   : > { %2928 = vmatprep.subr.bf16.mxu1 %v3324_v14  ;;  %v4238_v63 = vpack.c.bf16 %v955_v62, %v1403_v60  ;;  %v4241_v5 = vld [vmem:[#allocation2 + $0x82] sm:$0xff]  ;;  %v3358_v12 = vld [vmem:[#allocation9 + $0x1b8] sm:$0xff]   ;;  %v3361_v16 = vld [vmem:[#allocation9 + $0x1d0] sm:$0xff]  }
 0x20e   : > { %2920 = vmatprep.mubr.bf16.mxu1 %v1108_v19  ;;  %v1409_v7 = vpack.c.bf16 %v4241_v5, %v955_v62  ;;  %v3355_v9 = vld [vmem:[#allocation9 + $0x1a0] sm:$0xff]   ;;  %v3368_v15 = vld [vmem:[#allocation9 + $0x208] sm:$0xff]  }
 0x20f   : > { %2921 = vmatmul.mubr.bf16.gmra.mrb[4].mxu1 %v1109_v18  ;;  %2861 = vmatpush3.bf16.msra.mxu0 %v3327_v13  ;;  %v3359_v13 = vld [vmem:[#allocation9 + $0x1c0] sm:$0xff]   ;;  %v3362_v18 = vld [vmem:[#allocation9 + $0x1d8] sm:$0xff]  }
 0x210   : > { %2929 = vmatpush3.bf16.msra.mxu1 %v3324_v14  ;;  %2940 = vmatprep.mubr.bf16.mxu1 %v1256_v50  ;;  %v3349_v50 = vld [vmem:[#allocation9 + $0xb8] sm:$0xff]   ;;  %v3360_v14 = vld [vmem:[#allocation9 + $0x1c8] sm:$0xff]   ;;  %v3363_v19 = vld [vmem:[#allocation9 + $0x1e0] sm:$0xff]  }
 0x211   : > { %2930 = vmatprep.subr.bf16.mxu1 %v3326_v20  ;;  %2862 = vmatprep.subr.bf16.mxu0 %v3329_v21  ;;  %v3367_v22 = vld [vmem:[#allocation9 + $0x200] sm:$0xff]  }
 0x213   : > { %2863 = vmatpush3.bf16.msra.mxu0 %v3329_v21  ;;  %v3365_v21 = vld [vmem:[#allocation9 + $0x1f0] sm:$0xff]  }
 0x214   : > { %2931 = vmatpush3.bf16.msra.mxu1 %v3326_v20  ;;  %2864 = vmatprep.subr.bf16.mxu0 %v3331_v23  ;;  %v3364_v20 = vld [vmem:[#allocation9 + $0x1e8] sm:$0xff]  }
 0x215   : > { %2932 = vmatprep.subr.bf16.mxu1 %v3328_v24 }
 0x217   : > { %2865 = vmatpush3.bf16.msra.mxu0 %v3331_v23  ;;  %v3366_v23 = vld [vmem:[#allocation9 + $0x1f8] sm:$0xff]  }
 0x218   : > { %2933 = vmatpush3.bf16.msra.mxu1 %v3328_v24  ;;  %2866 = vmatprep.subr.bf16.mxu0 %v3333_v25  ;;  %v1706_v24 = vld [vmem:[#allocation2 + $0x91] sm:$0xff] }
 0x219   : > { %2934 = vmatprep.subr.bf16.mxu1 %v3330_v26 }
 0x21b   : > { %2867 = vmatpush3.bf16.msra.mxu0 %v3333_v25  ;;  %v1710_v25 = vpack.c.bf16 %v1706_v24, %v4184_v61  ;;  %v3377_v61 = vld [vmem:[#allocation12 + $0x10] sm:$0xff]  }
 0x21c   : > { %2935 = vmatpush3.bf16.msra.mxu1 %v3330_v26  ;;  %2876 = vmatprep.subr.bf16.mxu0 %v3335_v27  ;;  %v3370_v26 = vld [vmem:[#allocation9 + $0x218] sm:$0xff]  }
 0x21d   : > { %2936 = vmatprep.subr.bf16.mxu1 %v3332_v28 }
 0x21e   : > { %2869 = vmatmul.mubr.bf16.vlgmr.msra.gmra.mrb[8].mxu0 %v4213_v29 }
 0x21f   : > { %2872 = vmatprep.mubr.bf16.mxu0 %v4216_v32  ;;  %2877 = vmatpush3.bf16.msra.mxu0 %v3335_v27  ;;  %v3371_v27 = vld [vmem:[#allocation9 + $0x220] sm:$0xff]  }
 0x220   : > { %2937 = vmatpush3.bf16.msra.mxu1 %v3332_v28  ;;  %2878 = vmatprep.subr.bf16.mxu0 %v3337_v30  ;;  %v3375_v28 = vld [vmem:[#allocation12] sm:$0xff]  }
 0x221   : > { %2938 = vmatprep.subr.bf16.mxu1 %v3334_v31 }
 0x223   : > { %2879 = vmatpush3.bf16.msra.mxu0 %v3337_v30  ;;  %v3374_v30 = vld [vmem:[#allocation9 + $0x238] sm:$0xff]  }
 0x224   : > { %2939 = vmatpush3.bf16.msra.mxu1 %v3334_v31  ;;  %2880 = vmatprep.subr.bf16.mxu0 %v3339_v33  ;;  %v3378_v31 = vld [vmem:[#allocation12 + $0x18] sm:$0xff]  }
 0x225   : > { %2948 = vmatprep.subr.bf16.mxu1 %v3336_v34 }
 0x226   : > { %2873 = vmatmul.mubr.bf16.gmra.mrb[12].mxu0 %v4220_v35 }
 0x227   : > { %2941 = vmatmul.mubr.bf16.vlgmr.msra.gmra.mrb[0].mxu1 %v1257_v46  ;;  %2881 = vmatpush3.bf16.msra.mxu0 %v3339_v33  ;;  %v3347_v46 = vld [vmem:[#allocation9 + $0xb0] sm:$0xff]  }
 0x228   : > { %2944 = vmatprep.mubr.bf16.mxu1 %v1258_v10  ;;  %2949 = vmatpush3.bf16.msra.mxu1 %v3336_v34  ;;  %v3356_v10 = vld [vmem:[#allocation9 + $0x1a8] sm:$0xff]   ;;  %v1856_v33 = vld [vmem:[#allocation2 + $0x92] sm:$0xff] }
 0x229   : > { %2950 = vmatprep.subr.bf16.mxu1 %v3338_v39  ;;  %2892 = vmatprep.mubr.bf16.mxu0 %v956_v41  ;;  %v1860_v34 = vpack.c.bf16 %v1856_v33, %v4241_v5 }
 0x22a   : > { %2882 = vmatprep.subr.bf16.mxu0 %v3341_v40 }
 0x22b   : > { %2883 = vmatpush3.bf16.msra.mxu0 %v3341_v40 }
 0x22c   : > { %2951 = vmatpush3.bf16.msra.mxu1 %v3338_v39  ;;  %2884 = vmatprep.subr.bf16.mxu0 %v3343_v42  ;;  %v3383_v39 = vld [vmem:[#allocation15] sm:$0xff]  }
 0x22d   : > { %2952 = vmatprep.subr.bf16.mxu1 %v3340_v44 }
 0x22f   : > { %2945 = vmatmul.mubr.bf16.gmra.mrb[4].mxu1 %v1259_v3  ;;  %2885 = vmatpush3.bf16.msra.mxu0 %v3343_v42  ;;  %v1408_v3 = vpack.c.bf16 %v1403_v60, %v953_v53 }
 0x230   : > { %2953 = vmatpush3.bf16.msra.mxu1 %v3340_v44  ;;  %2964 = vmatprep.mubr.bf16.mxu1 %v1406_v43 }
 0x231   : > { %2954 = vmatprep.subr.bf16.mxu1 %v3342_v47  ;;  %2886 = vmatprep.subr.bf16.mxu0 %v3345_v37 }
 0x233   : > { %2887 = vmatpush3.bf16.msra.mxu0 %v3345_v37 }
 0x234   : > { %2955 = vmatpush3.bf16.msra.mxu1 %v3342_v47  ;;  %2888 = vmatprep.subr.bf16.mxu0 %v3347_v46 }
 0x235   : > { %2956 = vmatprep.subr.bf16.mxu1 %v3344_v49 }
 0x237   : > { %2889 = vmatpush3.bf16.msra.mxu0 %v3347_v46 }
 0x238   : > { %2957 = vmatpush3.bf16.msra.mxu1 %v3344_v49  ;;  %2890 = vmatprep.subr.bf16.mxu0 %v3349_v50  ;;  %v2611_v49 = vld [vmem:[#allocation11] ss:$0 sm:$0xff] }
 0x239   : > { %2958 = vmatprep.subr.bf16.mxu1 %v3346_v51 }
 0x23b   : > { %2891 = vmatpush3.bf16.msra.mxu0 %v3349_v50 }
 0x23c   : > { %2959 = vmatpush3.bf16.msra.mxu1 %v3346_v51  ;;  %3044 = vmatprep.subr.bf16.mxu0 %v3375_v28 }
 0x23d   : > { %2960 = vmatprep.subr.bf16.mxu1 %v3348_v52 }
 0x23e   : > { %2893 = vmatmul.mubr.bf16.vlgmr.msra.gmra.mrb[8].mxu0 %v4232_v55 }
 0x23f   : > { %2896 = vmatprep.mubr.bf16.mxu0 %v4234_v58  ;;  %3045 = vmatpush3.bf16.msra.mxu0 %v3375_v28  ;;  %v3390_v28 = vld [vmem:[#allocation15 + $0x38] sm:$0xff]  }
 0x240   : > { %2961 = vmatpush3.bf16.msra.mxu1 %v3348_v52 }
 0x241   : > { %2962 = vmatprep.subr.bf16.mxu1 %v3350_v57 }
 0x244   : > { %2963 = vmatpush3.bf16.msra.mxu1 %v3350_v57 }
 0x245   : > { %2972 = vmatprep.subr.bf16.mxu1 %v3351_v59 }
 0x246   : > { %2897 = vmatmul.mubr.bf16.gmra.mrb[12].mxu0 %v4238_v63 }
 0x247   : > { %2965 = vmatmul.mubr.bf16.vlgmr.msra.gmra.mrb[0].mxu1 %v1407_v1 }
 0x248   : > { %2968 = vmatprep.mubr.bf16.mxu1 %v1408_v3  ;;  %2973 = vmatpush3.bf16.msra.mxu1 %v3351_v59 }
 0x249   : > { %2974 = vmatprep.subr.bf16.mxu1 %v3352_v2 }
 0x24c   : > { %2975 = vmatpush3.bf16.msra.mxu1 %v3352_v2 }
 0x24d   : > { %2976 = vmatprep.subr.bf16.mxu1 %v3353_v4 }
 0x24f   : > { %2969 = vmatmul.mubr.bf16.gmra.mrb[4].mxu1 %v1409_v7 }
 0x250   : > { %2977 = vmatpush3.bf16.msra.mxu1 %v3353_v4  ;;  %2988 = vmatprep.mubr.bf16.mxu1 %v4213_v29  ;;  %v3376_v29 = vld [vmem:[#allocation12 + $0x8] sm:$0xff]  }
 0x251   : > { %2978 = vmatprep.subr.bf16.mxu1 %v3354_v8  ;;  %3046 = vmatprep.subr.bf16.mxu0 %v3376_v29 }
 0x252   : > { %3047 = vmatpush3.bf16.msra.mxu0 %v3376_v29  ;;  %v3392_v29 = vld [vmem:[%s4108_s26 + $0x10] ss:$8 sps:$4 sm:$0xff]  }
 0x253   : > { %3048 = vmatprep.subr.bf16.mxu0 %v3377_v61 }
 0x254   : > { %2979 = vmatpush3.bf16.msra.mxu1 %v3354_v8 }
 0x255   : > { %2980 = vmatprep.subr.bf16.mxu1 %v3355_v9 }
 0x256   : > { %3049 = vmatpush3.bf16.msra.mxu0 %v3377_v61  ;;  %v3394_v61 = vld [vmem:[%s4108_s26 + $0x30] ss:$8 sps:$4 sm:$0xff]  }
 0x257   : > { %3050 = vmatprep.subr.bf16.mxu0 %v3378_v31 }
 0x258   : > { %2981 = vmatpush3.bf16.msra.mxu1 %v3355_v9 }
 0x259   : > { %2982 = vmatprep.subr.bf16.mxu1 %v3356_v10 }
 0x25a   : > { %3051 = vmatpush3.bf16.msra.mxu0 %v3378_v31 }
 0x25c   : > { %2983 = vmatpush3.bf16.msra.mxu1 %v3356_v10 }
 0x25d   : > { %2984 = vmatprep.subr.bf16.mxu1 %v3357_v11 }
 0x260   : > { %2985 = vmatpush3.bf16.msra.mxu1 %v3357_v11 }
 0x261   : > { %2986 = vmatprep.subr.bf16.mxu1 %v3358_v12 }
 0x264   : > { %2987 = vmatpush3.bf16.msra.mxu1 %v3358_v12 }
 0x265   : > { %2996 = vmatprep.subr.bf16.mxu1 %v3359_v13 }
 0x267   : > { %2989 = vmatmul.mubr.bf16.vlgmr.msra.gmra.mrb[0].mxu1 %v4216_v32  ;;  %v3379_v32 = vld [vmem:[#allocation12 + $0x20] sm:$0xff]  }
 0x268   : > { %2992 = vmatprep.mubr.bf16.mxu1 %v4220_v35  ;;  %2997 = vmatpush3.bf16.msra.mxu1 %v3359_v13  ;;  %v3380_v35 = vld [vmem:[#allocation12 + $0x28] sm:$0xff]  }
 0x269   : > { %2998 = vmatprep.subr.bf16.mxu1 %v3360_v14  ;;  %3052 = vmatprep.subr.bf16.mxu0 %v3379_v32 }
 0x26a   : > { %3053 = vmatpush3.bf16.msra.mxu0 %v3379_v32 }
 0x26b   : > { %3054 = vmatprep.subr.bf16.mxu0 %v3380_v35 }
 0x26c   : > { %2999 = vmatpush3.bf16.msra.mxu1 %v3360_v14  ;;  %v3384_v14 = vld [vmem:[#allocation15 + $0x8] sm:$0xff]  }
 0x26d   : > { %3000 = vmatprep.subr.bf16.mxu1 %v3361_v16 }
 0x26e   : > { %3055 = vmatpush3.bf16.msra.mxu0 %v3380_v35 }
 0x26f   : > { %2993 = vmatmul.mubr.bf16.gmra.mrb[4].mxu1 %v1560_v17  ;;  %3056 = vmatprep.subr.bf16.mxu0 %v3381_v36 }
 0x270   : > { %3001 = vmatpush3.bf16.msra.mxu1 %v3361_v16  ;;  %3012 = vmatprep.mubr.bf16.mxu1 %v4174_v48  ;;  %v3369_v48 = vld [vmem:[#allocation9 + $0x210] sm:$0xff]  }
 0x271   : > { %3002 = vmatprep.subr.bf16.mxu1 %v3362_v18 }
 0x272   : > { %3057 = vmatpush3.bf16.msra.mxu0 %v3381_v36 }
 0x273   : > { %3058 = vmatprep.subr.bf16.mxu0 %v3382_v38 }
 0x274   : > { %3003 = vmatpush3.bf16.msra.mxu1 %v3362_v18 }
 0x275   : > { %3004 = vmatprep.subr.bf16.mxu1 %v3363_v19 }
 0x276   : > { %3059 = vmatpush3.bf16.msra.mxu0 %v3382_v38 }
 0x277   : > { %3068 = vmatprep.subr.bf16.mxu0 %v3383_v39 }
 0x278   : > { %3005 = vmatpush3.bf16.msra.mxu1 %v3363_v19 }
 0x279   : > { %3006 = vmatprep.subr.bf16.mxu1 %v3364_v20 }
 0x27c   : > { %3007 = vmatpush3.bf16.msra.mxu1 %v3364_v20 }
 0x27d   : > { %3008 = vmatprep.subr.bf16.mxu1 %v3365_v21 }
 0x280   : > { %3009 = vmatpush3.bf16.msra.mxu1 %v3365_v21 }
 0x281   : > { %3010 = vmatprep.subr.bf16.mxu1 %v3366_v23 }
 0x284   : > { %3011 = vmatpush3.bf16.msra.mxu1 %v3366_v23  ;;  %v3385_v23 = vld [vmem:[#allocation15 + $0x10] sm:$0xff]  }
 0x285   : > { %3020 = vmatprep.subr.bf16.mxu1 %v3367_v22 }
 0x287   : > { %3013 = vmatmul.mubr.bf16.vlgmr.msra.gmra.mrb[0].mxu1 %v4193_v0  ;;  %v3372_v0 = vld [vmem:[#allocation9 + $0x228] sm:$0xff]  }
 0x288   : > { %3016 = vmatprep.mubr.bf16.mxu1 %v4202_v6  ;;  %3021 = vmatpush3.bf16.msra.mxu1 %v3367_v22  ;;  %v3373_v6 = vld [vmem:[#allocation9 + $0x230] sm:$0xff]  }
 0x289   : > { %3022 = vmatprep.subr.bf16.mxu1 %v3368_v15 }
 0x28c   : > { %3023 = vmatpush3.bf16.msra.mxu1 %v3368_v15 }
 0x28d   : > { %3024 = vmatprep.subr.bf16.mxu1 %v3369_v48 }
 0x28f   : > { %3017 = vmatmul.mubr.bf16.gmra.mrb[4].mxu1 %v1710_v25  ;;  %v3386_v25 = vld [vmem:[#allocation15 + $0x18] sm:$0xff]  }
 0x290   : > { %3025 = vmatpush3.bf16.msra.mxu1 %v3369_v48  ;;  %3036 = vmatprep.mubr.bf16.mxu1 %v4232_v55 }
 0x291   : > { %3026 = vmatprep.subr.bf16.mxu1 %v3370_v26 }
 0x294   : > { %3027 = vmatpush3.bf16.msra.mxu1 %v3370_v26  ;;  %v3391_v26 = vld [vmem:[%s4108_s26] ss:$8 sps:$4 sm:$0xff]  }
 0x295   : > { %3028 = vmatprep.subr.bf16.mxu1 %v3371_v27 }
 0x298   : > { %3029 = vmatpush3.bf16.msra.mxu1 %v3371_v27  ;;  %v3387_v27 = vld [vmem:[#allocation15 + $0x20] sm:$0xff]  }
 0x299   : > { %3030 = vmatprep.subr.bf16.mxu1 %v3372_v0 }
 0x29c   : > { %3031 = vmatpush3.bf16.msra.mxu1 %v3372_v0  ;;  %v3388_v0 = vld [vmem:[#allocation15 + $0x28] sm:$0xff]  }
 0x29d   : > { %3032 = vmatprep.subr.bf16.mxu1 %v3373_v6 }
 0x2a0   : > { %3033 = vmatpush3.bf16.msra.mxu1 %v3373_v6  ;;  %v3389_v6 = vld [vmem:[#allocation15 + $0x30] sm:$0xff]  }
 0x2a1   : > { %3034 = vmatprep.subr.bf16.mxu1 %v3374_v30 }
 0x2a4   : > { %3035 = vmatpush3.bf16.msra.mxu1 %v3374_v30  ;;  %v3393_v30 = vld [vmem:[%s4108_s26 + $0x20] ss:$8 sps:$4 sm:$0xff]  }
 0x2a7   : > { %3037 = vmatmul.mubr.bf16.vlgmr.msra.gmra.mrb[0].mxu1 %v4234_v58 }
 0x2a8   : > { %3040 = vmatprep.mubr.bf16.mxu1 %v4238_v63 }
 0x2af   : > { %3041 = vmatmul.mubr.bf16.gmra.mrb[4].mxu1 %v1860_v34 }
 0x311   : > { %v2894_v40 = vpop.f32.mrb[8].mxu0 }
 0x312   : > { %v1059_v41 = vpop.f32.mrb[9].mxu0 }
 0x313   : > { %v2895_v42 = vpop.f32.mrb[10].mxu0 }
 0x314   : > { %v1062_v44 = vpop.f32.mrb[11].mxu0 }
 0x319   : > { %v2898_v45 = vpop.f32.mrb[12].mxu0 }
 0x31a   : > { %v1075_v47 = vpop.f32.mrb[13].mxu0 }
 0x31b   : > { %v2899_v37 = vpop.f32.mrb[14].mxu0 }
 0x31c   : > { %v1078_v43 = vpop.f32.mrb[15].mxu0 }
 0x37a   : > { %v3038_v46 = vpop.f32.mrb[0].mxu1 }
 0x37b   : > { %v3092_v50 = vadd.f32 %v3038_v46, %v2894_v40  ;;  %v1960_v51 = vpop.f32.mrb[1].mxu1  ;;  %v2612_v40 = vld [vmem:[#allocation14] ss:$0 sm:$0xff] }
 0x37c   : > { %v3093_v52 = vadd.f32 %v1960_v51, %v1059_v41  ;;  %v3039_v53 = vpop.f32.mrb[2].mxu1  ;;  %v2621_v41 = vld [vmem:[#allocation17] ss:$0 sm:$0xff] }
 0x37d   : > { %v2008_v54 = vadd.f32 %v3092_v50, %v2611_v49  ;;  %v3094_v55 = vadd.f32 %v3039_v53, %v2895_v42  ;;  %v1963_v56 = vpop.f32.mrb[3].mxu1 }
 0x37e   : > { %v2006_v57 = vadd.f32 %v3093_v52, %v2611_v49  ;;  %v3095_v58 = vadd.f32 %v1963_v56, %v1062_v44 }
 0x37f   : > { %v2009_v59 = vadd.f32 %v3094_v55, %v2611_v49  ;;  %v2016_v62 = vmax.f32 %v2008_v54, 0.0 }
 0x380   : > { %v2007_v60 = vadd.f32 %v3095_v58, %v2611_v49  ;;  %v2014_v1 = vmax.f32 %v2006_v57, 0.0 }
 0x381   : > { %v2017_v63 = vmax.f32 %v2009_v59, 0.0 }
 0x382   : > { %v2015_v2 = vmax.f32 %v2007_v60, 0.0  ;;  %v3042_v3 = vpop.f32.mrb[4].mxu1 }
 0x383   : > { %v2023_v4 = vpack.c.bf16 %v2017_v63, %v2016_v62  ;;  %v3096_v5 = vadd.f32 %v3042_v3, %v2898_v45  ;;  %v1976_v7 = vpop.f32.mrb[5].mxu1 }
 0x384   : > { %v3097_v8 = vadd.f32 %v1976_v7, %v1075_v47  ;;  %v3043_v9 = vpop.f32.mrb[6].mxu1  ;;  %v2022_v10 = vpack.c.bf16 %v2015_v2, %v2014_v1 }
 0x385   : > { %v2012_v11 = vadd.f32 %v3096_v5, %v2611_v49  ;;  %v3098_v12 = vadd.f32 %v3043_v9, %v2899_v37  ;;  %v1979_v13 = vpop.f32.mrb[7].mxu1 }
 0x386   : > { %v2010_v16 = vadd.f32 %v3097_v8, %v2611_v49  ;;  %v3099_v17 = vadd.f32 %v1979_v13, %v1078_v43  ;;  %3060 = vmatprep.mubr.bf16.mxu0 %v2022_v10 }
 0x387   : > { %v2013_v18 = vadd.f32 %v3098_v12, %v2611_v49  ;;  %3061 = vmatmul.mubr.bf16.vlgmr.msra.gmra.mrb[16].mxu0 %v2023_v4  ;;  %v2020_v20 = vmax.f32 %v2012_v11, 0.0 }
 0x388   : > { %v2011_v19 = vadd.f32 %v3099_v17, %v2611_v49  ;;  %3069 = vmatpush3.bf16.msra.mxu0 %v3383_v39  ;;  %v2018_v22 = vmax.f32 %v2010_v16, 0.0 }
 0x389   : > { %v2021_v21 = vmax.f32 %v2013_v18, 0.0  ;;  %3070 = vmatprep.subr.bf16.mxu0 %v3384_v14 }
 0x38a   : > { %v2019_v15 = vmax.f32 %v2011_v19, 0.0 }
 0x38b   : > { %v2025_v48 = vpack.c.bf16 %v2021_v21, %v2020_v20 }
 0x38c   : > { %3071 = vmatpush3.bf16.msra.mxu0 %v3384_v14  ;;  %v2024_v24 = vpack.c.bf16 %v2019_v15, %v2018_v22 }
 0x38d   : > { %3072 = vmatprep.subr.bf16.mxu0 %v3385_v23 }
 0x38e   : > { %3064 = vmatprep.mubr.bf16.mxu0 %v2024_v24 }
 0x38f   : > { %3065 = vmatmul.mubr.bf16.gmra.mrb[20].mxu0 %v2025_v48 }
 0x390   : > { %3073 = vmatpush3.bf16.msra.mxu0 %v3385_v23  ;;  %3084 = vmatprep.mubr.bf16.mxu0 %v3391_v26 }
 0x391   : > { %3074 = vmatprep.subr.bf16.mxu0 %v3386_v25 }
 0x394   : > { %3075 = vmatpush3.bf16.msra.mxu0 %v3386_v25 }
 0x395   : > { %3076 = vmatprep.subr.bf16.mxu0 %v3387_v27 }
 0x398   : > { %3077 = vmatpush3.bf16.msra.mxu0 %v3387_v27 }
 0x399   : > { %3078 = vmatprep.subr.bf16.mxu0 %v3388_v0 }
 0x39c   : > { %3079 = vmatpush3.bf16.msra.mxu0 %v3388_v0 }
 0x39d   : > { %3080 = vmatprep.subr.bf16.mxu0 %v3389_v6 }
 0x3a0   : > { %3081 = vmatpush3.bf16.msra.mxu0 %v3389_v6 }
 0x3a1   : > { %3082 = vmatprep.subr.bf16.mxu0 %v3390_v28 }
 0x3a4   : > { %3083 = vmatpush3.bf16.msra.mxu0 %v3390_v28 }
 0x3a7   : > { %3085 = vmatmul.mubr.bf16.vlgmr.msra.gmra.mrb[24].mxu0 %v3392_v29 }
 0x3a8   : > { %3088 = vmatprep.mubr.bf16.mxu0 %v3393_v30 }
 0x3af   : > { %3089 = vmatmul.mubr.bf16.gmra.mrb[28].mxu0 %v3394_v61 }
 0x45a   : > { %v3062_v31 = vpop.f32.mrb[16].mxu0 }
 0x45b   : > { %v2131_v32 = vpop.f32.mrb[17].mxu0  ;;  %v2140_v42 = vadd.f32 %v3062_v31, %v2612_v40 }
 0x45c   : > { %v3063_v33 = vpop.f32.mrb[18].mxu0  ;;  %v2132_v44 = vadd.f32 %v2612_v40, %v2131_v32 }
 0x45d   : > { %v2134_v34 = vpop.f32.mrb[19].mxu0  ;;  %v2143_v47 = vadd.f32 %v3063_v33, %v2612_v40  ;;  %v2164_v51 = vmax.f32 %v2140_v42, 0.0 }
 0x45e   : > { %v2135_v46 = vadd.f32 %v2612_v40, %v2134_v34  ;;  %v2162_v55 = vmax.f32 %v2132_v44, 0.0 }
 0x45f   : > { %v2165_v58 = vmax.f32 %v2143_v47, 0.0 }
 0x460   : > { %v2163_v62 = vmax.f32 %v2135_v46, 0.0 }
 0x462   : > { %v3066_v35 = vpop.f32.mrb[20].mxu0 }
 0x463   : > { %v2147_v36 = vpop.f32.mrb[21].mxu0  ;;  %v2156_v2 = vadd.f32 %v3066_v35, %v2612_v40 }
 0x464   : > { %v3067_v38 = vpop.f32.mrb[22].mxu0  ;;  %v2148_v4 = vadd.f32 %v2612_v40, %v2147_v36 }
 0x465   : > { %v2150_v39 = vpop.f32.mrb[23].mxu0  ;;  %v2159_v8 = vadd.f32 %v3067_v38, %v2612_v40  ;;  %v2168_v17 = vmax.f32 %v2156_v2, 0.0 }
 0x466   : > { %v2151_v12 = vadd.f32 %v2612_v40, %v2150_v39  ;;  %v2166_v21 = vmax.f32 %v2148_v4, 0.0 }
 0x467   : > { %v2169_v15 = vmax.f32 %v2159_v8, 0.0 }
 0x468   : > { %v2167_v25 = vmax.f32 %v2151_v12, 0.0 }
 0x47a   : > { %v3086_v45 = vpop.f32.mrb[24].mxu0 }
 0x47b   : > { %v2284_v37 = vadd.f32 %v3086_v45, %v2621_v41  ;;  %v2275_v43 = vpop.f32.mrb[25].mxu0 }
 0x47c   : > { %v2276_v49 = vadd.f32 %v2621_v41, %v2275_v43  ;;  %v3087_v50 = vpop.f32.mrb[26].mxu0 }
 0x47d   : > { %v2308_v52 = vmax.f32 %v2284_v37, 0.0  ;;  %v2287_v53 = vadd.f32 %v3087_v50, %v2621_v41  ;;  %v2278_v54 = vpop.f32.mrb[27].mxu0 }
 0x47e   : > { %v2306_v56 = vmax.f32 %v2276_v49, 0.0  ;;  %v2279_v57 = vadd.f32 %v2621_v41, %v2278_v54 }
 0x47f   : > { %v2316_v59 = vadd.f32 %v2308_v52, %v2164_v51  ;;  %v2309_v60 = vmax.f32 %v2287_v53, 0.0 }
 0x480   : > { %v2314_v63 = vadd.f32 %v2306_v56, %v2162_v55  ;;  %v2307_v1 = vmax.f32 %v2279_v57, 0.0 }
 0x481   : > { %v2317_v3 = vadd.f32 %v2309_v60, %v2165_v58 }
 0x482   : > { %v2315_v5 = vadd.f32 %v2307_v1, %v2163_v62  ;;  %v3090_v7 = vpop.f32.mrb[28].mxu0 }
 0x483   : > { %v2645_v9 = vpack.c.bf16 %v2317_v3, %v2316_v59  ;;  %v2300_v10 = vadd.f32 %v3090_v7, %v2621_v41  ;;  %v2291_v11 = vpop.f32.mrb[29].mxu0 }
 0x484   : > { %v2640_v13 = vpack.c.bf16 %v2315_v5, %v2314_v63  ;;  %v2292_v14 = vadd.f32 %v2621_v41, %v2291_v11  ;;  %v3091_v16 = vpop.f32.mrb[30].mxu0 }
 0x485   : > { %2657 = vst [vmem:[%s458_s20 + $0x8] sm:$0xff] %v2645_v9   ;;  %v2312_v18 = vmax.f32 %v2300_v10, 0.0  ;;  %v2303_v19 = vadd.f32 %v3091_v16, %v2621_v41  ;;  %v2294_v20 = vpop.f32.mrb[31].mxu0 }
 0x486   : > { %2641 = vst [vmem:[%s458_s20] sm:$0xff] %v2640_v13   ;;  %v2310_v23 = vmax.f32 %v2292_v14, 0.0  ;;  %v2295_v22 = vadd.f32 %v2621_v41, %v2294_v20 }
 0x487   : > { %v2320_v48 = vadd.f32 %v2312_v18, %v2168_v17  ;;  %v2313_v24 = vmax.f32 %v2303_v19, 0.0 }
 0x488   : > { %v2318_v26 = vadd.f32 %v2310_v23, %v2166_v21  ;;  %v2311_v27 = vmax.f32 %v2295_v22, 0.0 }
 0x489   : > { %v2321_v0 = vadd.f32 %v2313_v24, %v2169_v15 }
 0x48a   : > { %v2319_v6 = vadd.f32 %v2311_v27, %v2167_v25 }
 0x48b   : > { %v2655_v28 = vpack.c.bf16 %v2321_v0, %v2320_v48 }
 0x48c   : > { %v2650_v29 = vpack.c.bf16 %v2319_v6, %v2318_v26 }
 0x48d   : > { %2659 = vst [vmem:[%s458_s20 + $0x18] sm:$0xff] %v2655_v28  }
 0x48e   : > { %2658 = vst [vmem:[%s458_s20 + $0x10] sm:$0xff] %v2650_v29  }
 0x48f   : > { %3662 = shalt.err (!%p3659_p10)
}
 0x490   : > { %s3663_s26 = scalar_lea.hbm %s4268_s25, 512  ;;  %s3667_s1 = scalar_lea.hbm %s4347_s28, 1024 }
 0x491   : > { %p3664_p11 = scmp.ne.s32.totalorder %s4268_s25, %s3663_s26  ;;  %p3668_p7 = scmp.lt.u32.totalorder %s4268_s25, %s4347_s28 }
 0x492   : > { %p3669_p6 = scmp.lt.u32.totalorder %s3667_s1, %s3663_s26  ;;  %p3671_p12 = scmp.lt.u32.totalorder %s3663_s26, %s4268_s25 }
 0x493   : > { %p3665_p3 = pnand %p3664_p11, %p4348_p1 }
 0x494   : > { %p3670_p9 = por %p3669_p6, %p3668_p7 }
 0x495   : > { %p3666_p5 = pneg %p3665_p3 }
 0x496   : > { %p3672_p13 = por %p3671_p12, %p3670_p9 }
 0x498   : > { %p3673_p0 = pnand %p3672_p13, %p3666_p5 }
 0x49a   : > { %3676 = shalt.err (!%p3673_p0)
}
 0x49b   : > { %s3749_s29 = smov 64   ;;  %s3750_s15 = smov 4  }
 0x49c   : > { %3190 = dma.vmem_to_hbm [thread:$0]  (%p4348_p1), %s4263_s13, 512, %s4268_s25, %s2339_s23, %s3749_s29, %s3749_s29, %s3750_s15  }
 0x49d PF: > { %s2367_s21 = sand.u32 1, %s3719_s30   ;;  %p4349_p2 = scmp.ne.s32.totalorder %s4336_s24, 0 }
 0x49e   : > { %p4350_p8 = scmp.ge.s32.totalorder %s3731_s12, 2  ;;  %s2368_s18 = scalar_lea.sflag [#allocation5], %s2367_s21 }
 0x4a0   : > { %p3222_p4 = pnand %p4350_p8, %p4349_p2 }
 0x4a2   : > { %3714 = dma.done.wait (!%p3222_p4), %s2368_s18, 512  }
 0x4a3   : > { %3716 = vsyncadd (!%p3222_p4), %s2368_s18, 4294966784  ;;  %p26_p10 = scmp.ge.s32.totalorder %s4025_s19, 4   ;;  %s4351_s30 = smov %s3723_s10 }
 0x4a4   : > { %s4352_s10 = smov %s3727_s11  ;;  %s4353_s11 = smov %s4036_s17 }
 0x4a5   : > { %s4354_s12 = smov %s4025_s19  ;;  %28 = sbr.rel (!%p26_p10) target bundleno = 12 (0xc), region = 143 }
 0x4ac   :  { %2373 = vsyncpa [#allocation4], 1 }
 0x4ad   :  { %2375 = vsyncpa [#allocation4 + $0x1], 1 }
 0x4ae   :  { %2376 = vsyncpa [#allocation7], 1 }
 0x4af   :  { %2377 = vsyncpa [#allocation10], 1 }
 0x4b0   :  { %2378 = vsyncpa [#allocation13], 1 }
 0x4b1   :  { %2379 = vsyncpa [#allocation16], 1 }
 0x4b2   :  { %2380 = vsyncpa [#allocation5], 1 }
 0x4b3   :  { %2382 = vsyncpa [#allocation5 + $0x1], 1 }

</bundles_post_ra>
